<compile_context>
chip_gen: v5e
topology: v5e:2x2
jax: 0.10.0
libtpu: 0.0.40
codegen_flags: <defaults>
</compile_context>

<pallas_src>
import functools

import jax
import jax.numpy as jnp
from jax.experimental import pallas as pl
from jax.experimental.pallas import tpu as pltpu

# ----------------------------- synthetic config ------------------------------
IMAGE_SIZE = 28
PATCH_SIZE = 14
NUM_PATCHES = (IMAGE_SIZE // PATCH_SIZE) ** 2        # 4
SEQ_LEN = NUM_PATCHES + 1                            # +cls -> 5 real tokens/image
PAD_SEQ = 8                                          # padded to a sublane boundary
HIDDEN = 128
NUM_HEADS = 4
HEAD_DIM = HIDDEN // NUM_HEADS                       # 32
MLP_DIM = 4 * HIDDEN
NUM_LAYERS = 2                                       # -> 3 hidden states per image
LN_EPS = 1e-6
NEG_INF = -1e30
assert PAD_SEQ & (PAD_SEQ - 1) == 0 and PAD_SEQ >= SEQ_LEN

MEAN = jnp.array([0.485, 0.456, 0.406], jnp.float32).reshape(1, 3, 1, 1)
STD = jnp.array([0.229, 0.224, 0.225], jnp.float32).reshape(1, 3, 1, 1)


# --------------------------------- kernel ------------------------------------
def _dino_kernel(patches_ref, patch_w_ref, patch_b_ref, cls_ref, pos_ref,
                 qkv_w_ref, qkv_b_ref, proj_w_ref, proj_b_ref,
                 fc1_w_ref, fc1_b_ref, fc2_w_ref, fc2_b_ref,
                 loss_ref, x_ref, attn_ref, acc_ref,
                 *, nb, heads, head_dim, pad_seq, seq, half):
    """grid=(NUM_LAYERS,). Step 0 additionally builds the patch/cls/pos embedding.

    x_ref    : [nb*pad_seq, H] f32 VMEM scratch; persists layer -> layer.
    attn_ref : [nb*pad_seq, H] f32 VMEM scratch; per-head outputs land in
               lane-offset slots so the head concat costs one K=128 matmul.
    acc_ref  : (1, 1) f32 SMEM scratch; running sum of per-hidden-state MSE terms.
    """
    l = pl.program_id(0)
    m = nb * pad_seq
    d_model = HIDDEN
    shift = pad_seq.bit_length() - 1                 # pad_seq is a power of two
    inv_td = 1.0 / float(seq * d_model)              # torch MSE over one [T, D] slice

    def mse_term(x):
        # sum_b mean_{T,D}((pred_b - target_b)^2); padding rows masked out.
        d = x[:half, :] - x[half:, :]
        tok = jax.lax.broadcasted_iota(jnp.int32, (half, 1), 0) & (pad_seq - 1)
        d = d * (tok < seq).astype(jnp.float32)
        return jnp.sum(d * d) * inv_td

    def layer_norm(v):                               # affine folded into next matmul
        mu = jnp.mean(v, axis=-1, keepdims=True)
        var = jnp.mean(jnp.square(v - mu), axis=-1, keepdims=True)
        return (v - mu) * jax.lax.rsqrt(var + LN_EPS)

    # -------- step 0: patch embedding + cls + pos + embeddings-level MSE --------
    @pl.when(l == 0)
    def _():
        pe = jnp.dot(patches_ref[...], patch_w_ref[...],
                     preferred_element_type=jnp.float32) + patch_b_ref[...]
        cls_row = cls_ref[...] + pos_ref[0:1, :]
        pos_tok = pos_ref[1:seq, :]
        x_ref[...] = jnp.zeros_like(x_ref)
        for b in range(nb):                          # static unroll (nb is tiny)
            x_ref[b * pad_seq:b * pad_seq + 1, :] = cls_row
            x_ref[b * pad_seq + 1:b * pad_seq + seq, :] = (
                pe[b * (seq - 1):(b + 1) * (seq - 1), :] + pos_tok)
        acc_ref[0, 0] = mse_term(x_ref[...])

    # ----------------------- encoder block for layer l --------------------------
    x = x_ref[...]
    scale = 1.0 / float(head_dim) ** 0.5

    # block-diagonal (per-image) mask with padded key columns removed; generated
    # in-kernel from iota -> no [M, M] HBM input.
    row = jax.lax.broadcasted_iota(jnp.int32, (m, m), 0)
    col = jax.lax.broadcasted_iota(jnp.int32, (m, m), 1)
    keep = jnp.logical_and((row >> shift) == (col >> shift),
                           (col & (pad_seq - 1)) < seq)
    bias = jnp.where(keep, 0.0, NEG_INF)

    # attention (LN1 affine folded into qkv_w/qkv_b; bf16 operands, f32 accum)
    h = layer_norm(x).astype(jnp.bfloat16)
    qkv = jnp.dot(h, qkv_w_ref[...], preferred_element_type=jnp.float32) + qkv_b_ref[...]
    # TODO(synk): at real scale use lax.fori_loop(..., unroll=True) over heads and
    #             flash-style KV tiling instead of this static unroll / dense mask.
    for hh in range(heads):
        lo = hh * head_dim
        q = qkv[:, lo:lo + head_dim].astype(jnp.bfloat16)
        k = qkv[:, d_model + lo:d_model + lo + head_dim].astype(jnp.bfloat16)
        v = qkv[:, 2 * d_model + lo:2 * d_model + lo + head_dim].astype(jnp.bfloat16)
        s = jax.lax.dot_general(q, k, (((1,), (1,)), ((), ())),
                                preferred_element_type=jnp.float32) * scale + bias
        s = s - jnp.max(s, axis=-1, keepdims=True)
        p = jnp.exp(s)
        p = p * pl.reciprocal(jnp.sum(p, axis=-1, keepdims=True), approx=True)
        attn_ref[:, lo:lo + head_dim] = jnp.dot(p.astype(jnp.bfloat16), v,
                                                preferred_element_type=jnp.float32)
    # head concat folded into ONE K=128 projection matmul (LayerScale 1 folded in).
    x = x + (jnp.dot(attn_ref[...].astype(jnp.bfloat16), proj_w_ref[...],
                     preferred_element_type=jnp.float32) + proj_b_ref[...])

    # MLP (LN2 affine folded into fc1, LayerScale 2 folded into fc2)
    h = layer_norm(x).astype(jnp.bfloat16)
    h = jnp.dot(h, fc1_w_ref[...], preferred_element_type=jnp.float32) + fc1_b_ref[...]
    # TODO(synk): HF Dinov2 uses exact erf GELU; tanh approximation kept here.
    h = jax.nn.gelu(h, approximate=True).astype(jnp.bfloat16)
    x = x + (jnp.dot(h, fc2_w_ref[...], preferred_element_type=jnp.float32)
             + fc2_b_ref[...])

    x_ref[...] = x
    acc_ref[0, 0] = acc_ref[0, 0] + mse_term(x)

    @pl.when(l == pl.num_programs(0) - 1)
    def _():
        loss_ref[0, 0] = acc_ref[0, 0]


# ------------------------------ kernel wrapper --------------------------------
def _pallas_dino_loss(patches, fused, nb):
    m = nb * PAD_SEQ

    def full(shape):      # fetched once; same block every grid step
        return pl.BlockSpec(shape, lambda l, _n=len(shape): (0,) * _n)

    def layer(shape):     # stacked per-layer weights, streamed over the grid
        return pl.BlockSpec((None,) + shape,
                            lambda l, _n=len(shape): (l,) + (0,) * _n)

    kernel = functools.partial(_dino_kernel, nb=nb, heads=NUM_HEADS,
                               head_dim=HEAD_DIM, pad_seq=PAD_SEQ,
                               seq=SEQ_LEN, half=m // 2)
    loss = pl.pallas_call(
        kernel,
        out_shape=jax.ShapeDtypeStruct((1, 1), jnp.float32),
        grid=(NUM_LAYERS,),
        in_specs=[
            full(patches.shape),                          # patches  bf16
            full((3 * PATCH_SIZE * PATCH_SIZE, HIDDEN)),  # patch_w  bf16
            full((1, HIDDEN)),                            # patch_b  f32
            full((1, HIDDEN)),                            # cls      f32
            full((SEQ_LEN, HIDDEN)),                      # pos      f32
            layer((HIDDEN, 3 * HIDDEN)),                  # qkv_w    bf16 [L,...]
            layer((1, 3 * HIDDEN)),                       # qkv_b    f32
            layer((HIDDEN, HIDDEN)),                      # proj_w   bf16
            layer((1, HIDDEN)),                           # proj_b   f32
            layer((HIDDEN, MLP_DIM)),                     # fc1_w    bf16
            layer((1, MLP_DIM)),                          # fc1_b    f32
            layer((MLP_DIM, HIDDEN)),                     # fc2_w    bf16
            layer((1, HIDDEN)),                           # fc2_b    f32
        ],
        out_specs=pl.BlockSpec((1, 1), lambda l: (0, 0),
                               memory_space=pltpu.MemorySpace.SMEM),
        scratch_shapes=[
            pltpu.VMEM((m, HIDDEN), jnp.float32),         # x, persists across layers
            pltpu.VMEM((m, HIDDEN), jnp.float32),         # per-head attention slots
            pltpu.SMEM((1, 1), jnp.float32),              # running MSE sum
        ],
        compiler_params=pltpu.CompilerParams(
            dimension_semantics=("arbitrary",),           # x carries layer -> layer
            vmem_limit_bytes=32 * 1024 * 1024,            # explicit, fits all gens
        ),
    )(patches, fused["patch_w"], fused["patch_b"], fused["cls"], fused["pos"],
      fused["qkv_w"], fused["qkv_b"], fused["proj_w"], fused["proj_b"],
      fused["fc1_w"], fused["fc1_b"], fused["fc2_w"], fused["fc2_b"])
    return loss[0, 0]


# ----------------------------- params / preprocessing -------------------------
def init_params(key):
    def nrm(shape, s=0.02):
        nonlocal key
        key, sub = jax.random.split(key)
        return s * jax.random.normal(sub, shape, jnp.float32)

    params = {
        "patch_w": nrm((3 * PATCH_SIZE * PATCH_SIZE, HIDDEN)),
        "patch_b": nrm((HIDDEN,), 0.01),
        "cls": nrm((1, HIDDEN)),
        "pos": nrm((SEQ_LEN, HIDDEN)),
        "layers": [],
    }
    for _ in range(NUM_LAYERS):
        params["layers"].append(dict(
            ln1_g=1.0 + nrm((HIDDEN,), 0.05), ln1_b=nrm((HIDDEN,), 0.05),
            qkv_w=nrm((HIDDEN, 3 * HIDDEN)), qkv_b=nrm((3 * HIDDEN,), 0.01),
            proj_w=nrm((HIDDEN, HIDDEN)), proj_b=nrm((HIDDEN,), 0.01),
            ls1=1.0 + nrm((HIDDEN,), 0.05),
            ln2_g=1.0 + nrm((HIDDEN,), 0.05), ln2_b=nrm((HIDDEN,), 0.05),
            fc1_w=nrm((HIDDEN, MLP_DIM)), fc1_b=nrm((MLP_DIM,), 0.01),
            fc2_w=nrm((MLP_DIM, HIDDEN)), fc2_b=nrm((HIDDEN,), 0.01),
            ls2=1.0 + nrm((HIDDEN,), 0.05),
        ))
    return params


def prepare_fused_params(params):
    """Fold LN affine + LayerScale into adjacent matmul weights; cast weights bf16."""
    bf = jnp.bfloat16
    fused = {
        "patch_w": params["patch_w"].astype(bf),
        "patch_b": params["patch_b"].reshape(1, HIDDEN),
        "cls": params["cls"].reshape(1, HIDDEN),
        "pos": params["pos"],
    }
    stacks = {k: [] for k in ("qkv_w", "qkv_b", "proj_w", "proj_b",
                              "fc1_w", "fc1_b", "fc2_w", "fc2_b")}
    for lp in params["layers"]:
        # (norm(x)*g + b) @ W  ==  norm(x) @ (g[:,None]*W) + b @ W
        stacks["qkv_w"].append((lp["ln1_g"][:, None] * lp["qkv_w"]).astype(bf))
        stacks["qkv_b"].append((lp["qkv_b"] + lp["ln1_b"] @ lp["qkv_w"]).reshape(1, -1))
        # x + ls1 * (attn @ Wp + bp)  ==  x + attn @ (Wp*ls1) + bp*ls1
        stacks["proj_w"].append((lp["proj_w"] * lp["ls1"][None, :]).astype(bf))
        stacks["proj_b"].append((lp["proj_b"] * lp["ls1"]).reshape(1, -1))
        stacks["fc1_w"].append((lp["ln2_g"][:, None] * lp["fc1_w"]).astype(bf))
        stacks["fc1_b"].append((lp["fc1_b"] + lp["ln2_b"] @ lp["fc1_w"]).reshape(1, -1))
        stacks["fc2_w"].append((lp["fc2_w"] * lp["ls2"][None, :]).astype(bf))
        stacks["fc2_b"].append((lp["fc2_b"] * lp["ls2"]).reshape(1, -1))
    for k, v in stacks.items():
        fused[k] = jnp.stack(v)
    return fused


def _preprocess(images):
    """*0.5+0.5, bilinear resize, ImageNet normalize, patchify (channel-major)."""
    nb = images.shape[0]
    images = images * 0.5 + 0.5
    images = jax.image.resize(images, (nb, 3, IMAGE_SIZE, IMAGE_SIZE), method="bilinear")
    images = (images - MEAN) / STD
    gh = IMAGE_SIZE // PATCH_SIZE
    p = images.reshape(nb, 3, gh, PATCH_SIZE, gh, PATCH_SIZE)
    # TODO(synk): at 518px move this transpose/patchify into the kernel (strided
    #             reads from an ANY/HBM ref) to avoid an extra HBM pass.
    p = p.transpose(0, 2, 4, 1, 3, 5).reshape(nb, gh * gh, 3 * PATCH_SIZE * PATCH_SIZE)
    return p


@jax.jit
def dino_percep_loss(pred, target, fused):
    """sum_i F.mse_loss(cat(pred_hidden_states)[i], cat(target_hidden_states)[i])."""
    images = jnp.concatenate([pred, target], axis=0)     # single batched encode
    nb = images.shape[0]
    patches = _preprocess(images).reshape(nb * NUM_PATCHES, -1).astype(jnp.bfloat16)
    return _pallas_dino_loss(patches, fused, nb)


# ------------------------- pure-JAX reference (checking) ----------------------
def _ln(v):
    mu = jnp.mean(v, axis=-1, keepdims=True)
    var = jnp.mean(jnp.square(v - mu), axis=-1, keepdims=True)
    return (v - mu) * jax.lax.rsqrt(var + LN_EPS)


def _bdot(a, b):
    return jnp.dot(a.astype(jnp.bfloat16), b.astype(jnp.bfloat16),
                   preferred_element_type=jnp.float32)


@jax.jit
def reference_loss(pred, target, fused):
    """Pure-JAX mirror of the kernel math (same folded bf16 weights, f32 accum)."""
    images = jnp.concatenate([pred, target], axis=0)
    nb = images.shape[0]
    half = nb // 2
    patches = _preprocess(images)
    pe = _bdot(patches, fused["patch_w"]) + fused["patch_b"]
    cls = jnp.broadcast_to(fused["cls"][None], (nb, 1, HIDDEN))
    x = jnp.concatenate([cls, pe], axis=1) + fused["pos"][None]

    def mse(x):
        d = x[:half] - x[half:]
        return jnp.sum(d * d) / float(SEQ_LEN * HIDDEN)

    loss = mse(x)
    scale = 1.0 / float(HEAD_DIM) ** 0.5
    for l in range(NUM_LAYERS):
        qkv = _bdot(_ln(x), fused["qkv_w"][l]) + fused["qkv_b"][l]
        heads_out = []
        for hh in range(NUM_HEADS):
            lo = hh * HEAD_DIM
            q = qkv[..., lo:lo + HEAD_DIM]
            k = qkv[..., HIDDEN + lo:HIDDEN + lo + HEAD_DIM]
            v = qkv[..., 2 * HIDDEN + lo:2 * HIDDEN + lo + HEAD_DIM]
            s = jnp.einsum("bqd,bkd->bqk", q.astype(jnp.bfloat16),
                           k.astype(jnp.bfloat16),
                           preferred_element_type=jnp.float32) * scale
            p = jax.nn.softmax(s, axis=-1)
            heads_out.append(jnp.einsum("bqk,bkd->bqd", p.astype(jnp.bfloat16),
                                        v.astype(jnp.bfloat16),
                                        preferred_element_type=jnp.float32))
        attn = jnp.concatenate(heads_out, axis=-1)
        x = x + _bdot(attn, fused["proj_w"][l]) + fused["proj_b"][l]
        h = _bdot(_ln(x), fused["fc1_w"][l]) + fused["fc1_b"][l]
        h = jax.nn.gelu(h, approximate=True)
        x = x + _bdot(h, fused["fc2_w"][l]) + fused["fc2_b"][l]
        loss = loss + mse(x)
    return loss


# ------------------------------------ main ------------------------------------
if __name__ == "__main__":
    key = jax.random.PRNGKey(0)
    kp, k1, k2 = jax.random.split(key, 3)
    params = init_params(kp)
    fused = prepare_fused_params(params)
    pred = jax.random.normal(k1, (2, 3, 16, 16), jnp.float32)
    target = jax.random.normal(k2, (2, 3, 16, 16), jnp.float32)

    loss = dino_percep_loss(pred, target, fused)
    jax.block_until_ready(loss)
    assert loss.shape == () and bool(jnp.isfinite(loss))

    ref = reference_loss(pred, target, fused)
    rel = abs(float(loss) - float(ref)) / max(abs(float(ref)), 1e-6)
    assert rel < 5e-2, f"kernel {float(loss)} vs reference {float(ref)} (rel={rel:.4f})"
    print("KERNEL_OK")
</pallas_src>

<mosaic_0001>
module attributes {stable_mosaic.version = 11 : i64} {
  func.func @_dino_kernel(%arg0: i32, %arg1: memref<16x588xbf16, #tpu.memory_space<vmem>>, %arg2: memref<588x128xbf16, #tpu.memory_space<vmem>>, %arg3: memref<1x128xf32, #tpu.memory_space<vmem>>, %arg4: memref<1x128xf32, #tpu.memory_space<vmem>>, %arg5: memref<5x128xf32, #tpu.memory_space<vmem>>, %arg6: memref<1x128x384xbf16, #tpu.memory_space<vmem>>, %arg7: memref<1x1x384xf32, #tpu.memory_space<vmem>>, %arg8: memref<1x128x128xbf16, #tpu.memory_space<vmem>>, %arg9: memref<1x1x128xf32, #tpu.memory_space<vmem>>, %arg10: memref<1x128x512xbf16, #tpu.memory_space<vmem>>, %arg11: memref<1x1x512xf32, #tpu.memory_space<vmem>>, %arg12: memref<1x512x128xbf16, #tpu.memory_space<vmem>>, %arg13: memref<1x1x128xf32, #tpu.memory_space<vmem>>, %arg14: memref<1x1xf32, #tpu.memory_space<smem>>, %arg15: memref<32x128xf32, #tpu.memory_space<vmem>>, %arg16: memref<32x128xf32, #tpu.memory_space<vmem>>, %arg17: memref<1x1xf32, #tpu.memory_space<smem>>) attributes {dimension_semantics = [#tpu.dimension_semantics<arbitrary>], iteration_bounds = array<i64: 2>, scalar_prefetch = 0 : i64, scratch_operands = 3 : i64, tpu.core_type = #tpu.core_type<tc>, window_params = [{pipeline_mode = #tpu.pipeline_mode<synchronous>, transform_indices = @transform_0, window_bounds = array<i64: 16, 588>}, {pipeline_mode = #tpu.pipeline_mode<synchronous>, transform_indices = @transform_1, window_bounds = array<i64: 588, 128>}, {pipeline_mode = #tpu.pipeline_mode<synchronous>, transform_indices = @transform_2, window_bounds = array<i64: 1, 128>}, {pipeline_mode = #tpu.pipeline_mode<synchronous>, transform_indices = @transform_3, window_bounds = array<i64: 1, 128>}, {pipeline_mode = #tpu.pipeline_mode<synchronous>, transform_indices = @transform_4, window_bounds = array<i64: 5, 128>}, {transform_indices = @transform_5, window_bounds = array<i64: 1, 128, 384>}, {transform_indices = @transform_6, window_bounds = array<i64: 1, 1, 384>}, {transform_indices = @transform_7, window_bounds = array<i64: 1, 128, 128>}, {transform_indices = @transform_8, window_bounds = array<i64: 1, 1, 128>}, {transform_indices = @transform_9, window_bounds = array<i64: 1, 128, 512>}, {transform_indices = @transform_10, window_bounds = array<i64: 1, 1, 512>}, {transform_indices = @transform_11, window_bounds = array<i64: 1, 512, 128>}, {transform_indices = @transform_12, window_bounds = array<i64: 1, 1, 128>}, {transform_indices = @transform_13, window_bounds = array<i64: 1, 1>}]} {
    %c0_i32 = arith.constant 0 : i32
    %0 = arith.cmpi eq, %arg0, %c0_i32 : i32
    %1 = arith.extui %0 : i1 to i32
    %c0_i32_0 = arith.constant 0 : i32
    %2 = arith.cmpi ne, %1, %c0_i32_0 : i32
    scf.if %2 {
      %c0_84 = arith.constant 0 : index
      %c0_85 = arith.constant 0 : index
      %220 = vector.load %arg1[%c0_84, %c0_85] : memref<16x588xbf16, #tpu.memory_space<vmem>>, vector<16x588xbf16>
      %c0_86 = arith.constant 0 : index
      %c0_87 = arith.constant 0 : index
      %221 = vector.load %arg2[%c0_86, %c0_87] : memref<588x128xbf16, #tpu.memory_space<vmem>>, vector<588x128xbf16>
      %cst_88 = arith.constant dense<0.000000e+00> : vector<16x128xf32>
      %222 = tpu.matmul %220, %221, %cst_88 {dimension_numbers = #tpu.dot_dimension_numbers<[1], [0], [0], [1], [0, 0, 1, 1], [], []>} : vector<16x588xbf16>, vector<588x128xbf16>, vector<16x128xf32> -> vector<16x128xf32>
      %c0_89 = arith.constant 0 : index
      %c0_90 = arith.constant 0 : index
      %223 = vector.load %arg3[%c0_89, %c0_90] : memref<1x128xf32, #tpu.memory_space<vmem>>, vector<1x128xf32>
      %224 = vector.broadcast %223 : vector<1x128xf32> to vector<16x128xf32>
      %225 = arith.addf %222, %224 : vector<16x128xf32>
      %c0_91 = arith.constant 0 : index
      %c0_92 = arith.constant 0 : index
      %226 = vector.load %arg4[%c0_91, %c0_92] : memref<1x128xf32, #tpu.memory_space<vmem>>, vector<1x128xf32>
      %c0_93 = arith.constant 0 : index
      %c0_94 = arith.constant 0 : index
      %227 = vector.load %arg5[%c0_93, %c0_94] : memref<5x128xf32, #tpu.memory_space<vmem>>, vector<1x128xf32>
      %228 = arith.addf %226, %227 : vector<1x128xf32>
      %c1 = arith.constant 1 : index
      %c0_95 = arith.constant 0 : index
      %229 = vector.load %arg5[%c1, %c0_95] : memref<5x128xf32, #tpu.memory_space<vmem>>, vector<4x128xf32>
      %cst_96 = arith.constant 0.000000e+00 : f32
      %230 = vector.broadcast %cst_96 : f32 to vector<32x128xf32>
      %c0_97 = arith.constant 0 : index
      %c0_98 = arith.constant 0 : index
      %231 = vector.load %arg15[%c0_97, %c0_98] : memref<32x128xf32, #tpu.memory_space<vmem>>, vector<32x128xf32>
      tpu.vector_store %arg15[%c0_97, %c0_98], %230 {strides = array<i32>} : memref<32x128xf32, #tpu.memory_space<vmem>>, vector<32x128xf32>,
      %c0_99 = arith.constant 0 : index
      %c0_100 = arith.constant 0 : index
      %232 = vector.load %arg15[%c0_99, %c0_100] : memref<32x128xf32, #tpu.memory_space<vmem>>, vector<1x128xf32>
      tpu.vector_store %arg15[%c0_99, %c0_100], %228 {strides = array<i32>} : memref<32x128xf32, #tpu.memory_space<vmem>>, vector<1x128xf32>,
      %233 = vector.extract_strided_slice %225 {offsets = [0, 0], sizes = [4, 128], strides = [1, 1]} : vector<16x128xf32> to vector<4x128xf32>
      %234 = arith.addf %233, %229 : vector<4x128xf32>
      %c1_101 = arith.constant 1 : index
      %c0_102 = arith.constant 0 : index
      %235 = vector.load %arg15[%c1_101, %c0_102] : memref<32x128xf32, #tpu.memory_space<vmem>>, vector<4x128xf32>
      tpu.vector_store %arg15[%c1_101, %c0_102], %234 {strides = array<i32>} : memref<32x128xf32, #tpu.memory_space<vmem>>, vector<4x128xf32>,
      %c8 = arith.constant 8 : index
      %c0_103 = arith.constant 0 : index
      %236 = vector.load %arg15[%c8, %c0_103] : memref<32x128xf32, #tpu.memory_space<vmem>>, vector<1x128xf32>
      tpu.vector_store %arg15[%c8, %c0_103], %228 {strides = array<i32>} : memref<32x128xf32, #tpu.memory_space<vmem>>, vector<1x128xf32>,
      %237 = vector.extract_strided_slice %225 {offsets = [4, 0], sizes = [4, 128], strides = [1, 1]} : vector<16x128xf32> to vector<4x128xf32>
      %238 = arith.addf %237, %229 : vector<4x128xf32>
      %c9 = arith.constant 9 : index
      %c0_104 = arith.constant 0 : index
      %239 = vector.load %arg15[%c9, %c0_104] : memref<32x128xf32, #tpu.memory_space<vmem>>, vector<4x128xf32>
      tpu.vector_store %arg15[%c9, %c0_104], %238 {strides = array<i32>} : memref<32x128xf32, #tpu.memory_space<vmem>>, vector<4x128xf32>,
      %c16 = arith.constant 16 : index
      %c0_105 = arith.constant 0 : index
      %240 = vector.load %arg15[%c16, %c0_105] : memref<32x128xf32, #tpu.memory_space<vmem>>, vector<1x128xf32>
      tpu.vector_store %arg15[%c16, %c0_105], %228 {strides = array<i32>} : memref<32x128xf32, #tpu.memory_space<vmem>>, vector<1x128xf32>,
      %241 = vector.extract_strided_slice %225 {offsets = [8, 0], sizes = [4, 128], strides = [1, 1]} : vector<16x128xf32> to vector<4x128xf32>
      %242 = arith.addf %241, %229 : vector<4x128xf32>
      %c17 = arith.constant 17 : index
      %c0_106 = arith.constant 0 : index
      %243 = vector.load %arg15[%c17, %c0_106] : memref<32x128xf32, #tpu.memory_space<vmem>>, vector<4x128xf32>
      tpu.vector_store %arg15[%c17, %c0_106], %242 {strides = array<i32>} : memref<32x128xf32, #tpu.memory_space<vmem>>, vector<4x128xf32>,
      %c24 = arith.constant 24 : index
      %c0_107 = arith.constant 0 : index
      %244 = vector.load %arg15[%c24, %c0_107] : memref<32x128xf32, #tpu.memory_space<vmem>>, vector<1x128xf32>
      tpu.vector_store %arg15[%c24, %c0_107], %228 {strides = array<i32>} : memref<32x128xf32, #tpu.memory_space<vmem>>, vector<1x128xf32>,
      %245 = vector.extract_strided_slice %225 {offsets = [12, 0], sizes = [4, 128], strides = [1, 1]} : vector<16x128xf32> to vector<4x128xf32>
      %246 = arith.addf %245, %229 : vector<4x128xf32>
      %c25 = arith.constant 25 : index
      %c0_108 = arith.constant 0 : index
      %247 = vector.load %arg15[%c25, %c0_108] : memref<32x128xf32, #tpu.memory_space<vmem>>, vector<4x128xf32>
      tpu.vector_store %arg15[%c25, %c0_108], %246 {strides = array<i32>} : memref<32x128xf32, #tpu.memory_space<vmem>>, vector<4x128xf32>,
      %c0_109 = arith.constant 0 : index
      %c0_110 = arith.constant 0 : index
      %248 = vector.load %arg15[%c0_109, %c0_110] : memref<32x128xf32, #tpu.memory_space<vmem>>, vector<32x128xf32>
      %249 = vector.extract_strided_slice %248 {offsets = [0, 0], sizes = [16, 128], strides = [1, 1]} : vector<32x128xf32> to vector<16x128xf32>
      %250 = vector.extract_strided_slice %248 {offsets = [16, 0], sizes = [16, 128], strides = [1, 1]} : vector<32x128xf32> to vector<16x128xf32>
      %251 = arith.subf %249, %250 : vector<16x128xf32>
      %252 = tpu.iota {dimensions = array<i32: 0>} : vector<16x1xi32>
      %c7_i32_111 = arith.constant 7 : i32
      %253 = vector.broadcast %c7_i32_111 : i32 to vector<16x1xi32>
      %254 = arith.andi %252, %253 : vector<16x1xi32>
      %c5_i32_112 = arith.constant 5 : i32
      %255 = vector.broadcast %c5_i32_112 : i32 to vector<16x1xi32>
      %256 = arith.cmpi slt, %254, %255 : vector<16x1xi32>
      %257 = arith.extui %256 : vector<16x1xi1> to vector<16x1xi32>
      %258 = arith.sitofp %257 : vector<16x1xi32> to vector<16x1xf32>
      %259 = vector.broadcast %258 : vector<16x1xf32> to vector<16x128xf32>
      %260 = arith.mulf %251, %259 : vector<16x128xf32>
      %261 = arith.mulf %260, %260 : vector<16x128xf32>
      %262 = vector.shape_cast %261 : vector<16x128xf32> to vector<1x16x128xf32>
      %cst_113 = arith.constant dense<0.000000e+00> : vector<1xf32>
      %263 = vector.multi_reduction <add>, %262, %cst_113 [1, 2] : vector<1x16x128xf32> to vector<1xf32>
      %264 = vector.shape_cast %263 : vector<1xf32> to vector<1x1x1xf32>
      %265 = vector.extract %264[0, 0, 0] : f32 from vector<1x1x1xf32>
      %cst_114 = arith.constant 1.562500e-03 : f32
      %266 = arith.mulf %265, %cst_114 : f32
      %c0_115 = arith.constant 0 : index
      %c0_116 = arith.constant 0 : index
      %267 = memref.load %arg17[%c0_115, %c0_116] : memref<1x1xf32, #tpu.memory_space<smem>>
      memref.store %266, %arg17[%c0_115, %c0_116] : memref<1x1xf32, #tpu.memory_space<smem>>
    } else {
    }
    %c0 = arith.constant 0 : index
    %c0_1 = arith.constant 0 : index
    %3 = vector.load %arg15[%c0, %c0_1] : memref<32x128xf32, #tpu.memory_space<vmem>>, vector<32x128xf32>
    %4 = tpu.iota {dimensions = array<i32: 0>} : vector<32x32xi32>
    %5 = tpu.iota {dimensions = array<i32: 1>} : vector<32x32xi32>
    %c3_i32 = arith.constant 3 : i32
    %6 = vector.broadcast %c3_i32 : i32 to vector<32x32xi32>
    %7 = arith.shrsi %4, %6 : vector<32x32xi32>
    %c3_i32_2 = arith.constant 3 : i32
    %8 = vector.broadcast %c3_i32_2 : i32 to vector<32x32xi32>
    %9 = arith.shrsi %5, %8 : vector<32x32xi32>
    %10 = arith.cmpi eq, %7, %9 : vector<32x32xi32>
    %c7_i32 = arith.constant 7 : i32
    %11 = vector.broadcast %c7_i32 : i32 to vector<32x32xi32>
    %12 = arith.andi %5, %11 : vector<32x32xi32>
    %c5_i32 = arith.constant 5 : i32
    %13 = vector.broadcast %c5_i32 : i32 to vector<32x32xi32>
    %14 = arith.cmpi slt, %12, %13 : vector<32x32xi32>
    %15 = arith.andi %10, %14 : vector<32x32xi1>
    %cst = arith.constant 0.000000e+00 : f32
    %cst_3 = arith.constant -1.000000e+30 : f32
    %16 = vector.broadcast %cst : f32 to vector<32x32xf32>
    %17 = vector.broadcast %cst_3 : f32 to vector<32x32xf32>
    %18 = arith.select %15, %16, %17 : vector<32x32xi1>, vector<32x32xf32>
    %cst_4 = arith.constant dense<0.000000e+00> : vector<32xf32>
    %19 = vector.multi_reduction <add>, %3, %cst_4 [1] : vector<32x128xf32> to vector<32xf32>
    %20 = vector.shape_cast %19 : vector<32xf32> to vector<32x1xf32>
    %cst_5 = arith.constant 1.280000e+02 : f32
    %21 = vector.broadcast %cst_5 : f32 to vector<32x1xf32>
    %22 = arith.divf %20, %21 : vector<32x1xf32>
    %23 = vector.broadcast %22 : vector<32x1xf32> to vector<32x128xf32>
    %24 = arith.subf %3, %23 : vector<32x128xf32>
    %25 = arith.mulf %24, %24 : vector<32x128xf32>
    %cst_6 = arith.constant dense<0.000000e+00> : vector<32xf32>
    %26 = vector.multi_reduction <add>, %25, %cst_6 [1] : vector<32x128xf32> to vector<32xf32>
    %27 = vector.shape_cast %26 : vector<32xf32> to vector<32x1xf32>
    %cst_7 = arith.constant 1.280000e+02 : f32
    %28 = vector.broadcast %cst_7 : f32 to vector<32x1xf32>
    %29 = arith.divf %27, %28 : vector<32x1xf32>
    %30 = vector.broadcast %22 : vector<32x1xf32> to vector<32x128xf32>
    %31 = arith.subf %3, %30 : vector<32x128xf32>
    %cst_8 = arith.constant 9.99999997E-7 : f32
    %32 = vector.broadcast %cst_8 : f32 to vector<32x1xf32>
    %33 = arith.addf %29, %32 : vector<32x1xf32>
    %34 = math.rsqrt %33 : vector<32x1xf32>
    %35 = vector.broadcast %34 : vector<32x1xf32> to vector<32x128xf32>
    %36 = arith.mulf %31, %35 : vector<32x128xf32>
    %37 = arith.truncf %36 : vector<32x128xf32> to vector<32x128xbf16>
    %c0_9 = arith.constant 0 : index
    %c0_10 = arith.constant 0 : index
    %c0_11 = arith.constant 0 : index
    %38 = vector.load %arg6[%c0_9, %c0_10, %c0_11] : memref<1x128x384xbf16, #tpu.memory_space<vmem>>, vector<1x128x384xbf16>
    %39 = vector.shape_cast %38 : vector<1x128x384xbf16> to vector<128x384xbf16>
    %cst_12 = arith.constant dense<0.000000e+00> : vector<32x384xf32>
    %40 = tpu.matmul %37, %39, %cst_12 {dimension_numbers = #tpu.dot_dimension_numbers<[1], [0], [0], [1], [0, 0, 1, 1], [], []>} : vector<32x128xbf16>, vector<128x384xbf16>, vector<32x384xf32> -> vector<32x384xf32>
    %c0_13 = arith.constant 0 : index
    %c0_14 = arith.constant 0 : index
    %c0_15 = arith.constant 0 : index
    %41 = vector.load %arg7[%c0_13, %c0_14, %c0_15] : memref<1x1x384xf32, #tpu.memory_space<vmem>>, vector<1x1x384xf32>
    %42 = vector.shape_cast %41 : vector<1x1x384xf32> to vector<1x384xf32>
    %43 = vector.broadcast %42 : vector<1x384xf32> to vector<32x384xf32>
    %44 = arith.addf %40, %43 : vector<32x384xf32>
    %45 = vector.extract_strided_slice %44 {offsets = [0, 0], sizes = [32, 32], strides = [1, 1]} : vector<32x384xf32> to vector<32x32xf32>
    %46 = arith.truncf %45 : vector<32x32xf32> to vector<32x32xbf16>
    %47 = vector.extract_strided_slice %44 {offsets = [0, 128], sizes = [32, 32], strides = [1, 1]} : vector<32x384xf32> to vector<32x32xf32>
    %48 = arith.truncf %47 : vector<32x32xf32> to vector<32x32xbf16>
    %49 = vector.extract_strided_slice %44 {offsets = [0, 256], sizes = [32, 32], strides = [1, 1]} : vector<32x384xf32> to vector<32x32xf32>
    %50 = arith.truncf %49 : vector<32x32xf32> to vector<32x32xbf16>
    %cst_16 = arith.constant dense<0.000000e+00> : vector<32x32xf32>
    %51 = tpu.matmul %46, %48, %cst_16 {dimension_numbers = #tpu.dot_dimension_numbers<[1], [1], [0], [0], [0, 0, 1, 0], [], []>} : vector<32x32xbf16>, vector<32x32xbf16>, vector<32x32xf32> -> vector<32x32xf32>
    %cst_17 = arith.constant 0.176776692 : f32
    %52 = vector.broadcast %cst_17 : f32 to vector<32x32xf32>
    %53 = arith.mulf %51, %52 : vector<32x32xf32>
    %54 = arith.addf %53, %18 : vector<32x32xf32>
    %cst_18 = arith.constant dense<0xFF800000> : vector<32xf32>
    %55 = vector.multi_reduction <maximumf>, %54, %cst_18 [1] : vector<32x32xf32> to vector<32xf32>
    %56 = vector.shape_cast %55 : vector<32xf32> to vector<32x1xf32>
    %57 = vector.broadcast %56 : vector<32x1xf32> to vector<32x32xf32>
    %58 = arith.subf %54, %57 : vector<32x32xf32>
    %59 = math.exp %58 : vector<32x32xf32>
    %cst_19 = arith.constant dense<0.000000e+00> : vector<32xf32>
    %60 = vector.multi_reduction <add>, %59, %cst_19 [1] : vector<32x32xf32> to vector<32xf32>
    %61 = vector.shape_cast %60 : vector<32xf32> to vector<32x1xf32>
    %62 = tpu.reciprocal %61 {approx = true} : vector<32x1xf32> -> vector<32x1xf32>
    %63 = vector.broadcast %62 : vector<32x1xf32> to vector<32x32xf32>
    %64 = arith.mulf %59, %63 : vector<32x32xf32>
    %65 = arith.truncf %64 : vector<32x32xf32> to vector<32x32xbf16>
    %cst_20 = arith.constant dense<0.000000e+00> : vector<32x32xf32>
    %66 = tpu.matmul %65, %50, %cst_20 {dimension_numbers = #tpu.dot_dimension_numbers<[1], [0], [0], [1], [0, 0, 1, 1], [], []>} : vector<32x32xbf16>, vector<32x32xbf16>, vector<32x32xf32> -> vector<32x32xf32>
    %c0_21 = arith.constant 0 : index
    %c0_22 = arith.constant 0 : index
    %67 = vector.load %arg16[%c0_21, %c0_22] : memref<32x128xf32, #tpu.memory_space<vmem>>, vector<32x32xf32>
    tpu.vector_store %arg16[%c0_21, %c0_22], %66 {strides = array<i32>} : memref<32x128xf32, #tpu.memory_space<vmem>>, vector<32x32xf32>,
    %68 = vector.extract_strided_slice %44 {offsets = [0, 32], sizes = [32, 32], strides = [1, 1]} : vector<32x384xf32> to vector<32x32xf32>
    %69 = arith.truncf %68 : vector<32x32xf32> to vector<32x32xbf16>
    %70 = vector.extract_strided_slice %44 {offsets = [0, 160], sizes = [32, 32], strides = [1, 1]} : vector<32x384xf32> to vector<32x32xf32>
    %71 = arith.truncf %70 : vector<32x32xf32> to vector<32x32xbf16>
    %72 = vector.extract_strided_slice %44 {offsets = [0, 288], sizes = [32, 32], strides = [1, 1]} : vector<32x384xf32> to vector<32x32xf32>
    %73 = arith.truncf %72 : vector<32x32xf32> to vector<32x32xbf16>
    %cst_23 = arith.constant dense<0.000000e+00> : vector<32x32xf32>
    %74 = tpu.matmul %69, %71, %cst_23 {dimension_numbers = #tpu.dot_dimension_numbers<[1], [1], [0], [0], [0, 0, 1, 0], [], []>} : vector<32x32xbf16>, vector<32x32xbf16>, vector<32x32xf32> -> vector<32x32xf32>
    %cst_24 = arith.constant 0.176776692 : f32
    %75 = vector.broadcast %cst_24 : f32 to vector<32x32xf32>
    %76 = arith.mulf %74, %75 : vector<32x32xf32>
    %77 = arith.addf %76, %18 : vector<32x32xf32>
    %cst_25 = arith.constant dense<0xFF800000> : vector<32xf32>
    %78 = vector.multi_reduction <maximumf>, %77, %cst_25 [1] : vector<32x32xf32> to vector<32xf32>
    %79 = vector.shape_cast %78 : vector<32xf32> to vector<32x1xf32>
    %80 = vector.broadcast %79 : vector<32x1xf32> to vector<32x32xf32>
    %81 = arith.subf %77, %80 : vector<32x32xf32>
    %82 = math.exp %81 : vector<32x32xf32>
    %cst_26 = arith.constant dense<0.000000e+00> : vector<32xf32>
    %83 = vector.multi_reduction <add>, %82, %cst_26 [1] : vector<32x32xf32> to vector<32xf32>
    %84 = vector.shape_cast %83 : vector<32xf32> to vector<32x1xf32>
    %85 = tpu.reciprocal %84 {approx = true} : vector<32x1xf32> -> vector<32x1xf32>
    %86 = vector.broadcast %85 : vector<32x1xf32> to vector<32x32xf32>
    %87 = arith.mulf %82, %86 : vector<32x32xf32>
    %88 = arith.truncf %87 : vector<32x32xf32> to vector<32x32xbf16>
    %cst_27 = arith.constant dense<0.000000e+00> : vector<32x32xf32>
    %89 = tpu.matmul %88, %73, %cst_27 {dimension_numbers = #tpu.dot_dimension_numbers<[1], [0], [0], [1], [0, 0, 1, 1], [], []>} : vector<32x32xbf16>, vector<32x32xbf16>, vector<32x32xf32> -> vector<32x32xf32>
    %c0_28 = arith.constant 0 : index
    %c32 = arith.constant 32 : index
    %90 = vector.load %arg16[%c0_28, %c32] : memref<32x128xf32, #tpu.memory_space<vmem>>, vector<32x32xf32>
    tpu.vector_store %arg16[%c0_28, %c32], %89 {strides = array<i32>} : memref<32x128xf32, #tpu.memory_space<vmem>>, vector<32x32xf32>,
    %91 = vector.extract_strided_slice %44 {offsets = [0, 64], sizes = [32, 32], strides = [1, 1]} : vector<32x384xf32> to vector<32x32xf32>
    %92 = arith.truncf %91 : vector<32x32xf32> to vector<32x32xbf16>
    %93 = vector.extract_strided_slice %44 {offsets = [0, 192], sizes = [32, 32], strides = [1, 1]} : vector<32x384xf32> to vector<32x32xf32>
    %94 = arith.truncf %93 : vector<32x32xf32> to vector<32x32xbf16>
    %95 = vector.extract_strided_slice %44 {offsets = [0, 320], sizes = [32, 32], strides = [1, 1]} : vector<32x384xf32> to vector<32x32xf32>
    %96 = arith.truncf %95 : vector<32x32xf32> to vector<32x32xbf16>
    %cst_29 = arith.constant dense<0.000000e+00> : vector<32x32xf32>
    %97 = tpu.matmul %92, %94, %cst_29 {dimension_numbers = #tpu.dot_dimension_numbers<[1], [1], [0], [0], [0, 0, 1, 0], [], []>} : vector<32x32xbf16>, vector<32x32xbf16>, vector<32x32xf32> -> vector<32x32xf32>
    %cst_30 = arith.constant 0.176776692 : f32
    %98 = vector.broadcast %cst_30 : f32 to vector<32x32xf32>
    %99 = arith.mulf %97, %98 : vector<32x32xf32>
    %100 = arith.addf %99, %18 : vector<32x32xf32>
    %cst_31 = arith.constant dense<0xFF800000> : vector<32xf32>
    %101 = vector.multi_reduction <maximumf>, %100, %cst_31 [1] : vector<32x32xf32> to vector<32xf32>
    %102 = vector.shape_cast %101 : vector<32xf32> to vector<32x1xf32>
    %103 = vector.broadcast %102 : vector<32x1xf32> to vector<32x32xf32>
    %104 = arith.subf %100, %103 : vector<32x32xf32>
    %105 = math.exp %104 : vector<32x32xf32>
    %cst_32 = arith.constant dense<0.000000e+00> : vector<32xf32>
    %106 = vector.multi_reduction <add>, %105, %cst_32 [1] : vector<32x32xf32> to vector<32xf32>
    %107 = vector.shape_cast %106 : vector<32xf32> to vector<32x1xf32>
    %108 = tpu.reciprocal %107 {approx = true} : vector<32x1xf32> -> vector<32x1xf32>
    %109 = vector.broadcast %108 : vector<32x1xf32> to vector<32x32xf32>
    %110 = arith.mulf %105, %109 : vector<32x32xf32>
    %111 = arith.truncf %110 : vector<32x32xf32> to vector<32x32xbf16>
    %cst_33 = arith.constant dense<0.000000e+00> : vector<32x32xf32>
    %112 = tpu.matmul %111, %96, %cst_33 {dimension_numbers = #tpu.dot_dimension_numbers<[1], [0], [0], [1], [0, 0, 1, 1], [], []>} : vector<32x32xbf16>, vector<32x32xbf16>, vector<32x32xf32> -> vector<32x32xf32>
    %c0_34 = arith.constant 0 : index
    %c64 = arith.constant 64 : index
    %113 = vector.load %arg16[%c0_34, %c64] : memref<32x128xf32, #tpu.memory_space<vmem>>, vector<32x32xf32>
    tpu.vector_store %arg16[%c0_34, %c64], %112 {strides = array<i32>} : memref<32x128xf32, #tpu.memory_space<vmem>>, vector<32x32xf32>,
    %114 = vector.extract_strided_slice %44 {offsets = [0, 96], sizes = [32, 32], strides = [1, 1]} : vector<32x384xf32> to vector<32x32xf32>
    %115 = arith.truncf %114 : vector<32x32xf32> to vector<32x32xbf16>
    %116 = vector.extract_strided_slice %44 {offsets = [0, 224], sizes = [32, 32], strides = [1, 1]} : vector<32x384xf32> to vector<32x32xf32>
    %117 = arith.truncf %116 : vector<32x32xf32> to vector<32x32xbf16>
    %118 = vector.extract_strided_slice %44 {offsets = [0, 352], sizes = [32, 32], strides = [1, 1]} : vector<32x384xf32> to vector<32x32xf32>
    %119 = arith.truncf %118 : vector<32x32xf32> to vector<32x32xbf16>
    %cst_35 = arith.constant dense<0.000000e+00> : vector<32x32xf32>
    %120 = tpu.matmul %115, %117, %cst_35 {dimension_numbers = #tpu.dot_dimension_numbers<[1], [1], [0], [0], [0, 0, 1, 0], [], []>} : vector<32x32xbf16>, vector<32x32xbf16>, vector<32x32xf32> -> vector<32x32xf32>
    %cst_36 = arith.constant 0.176776692 : f32
    %121 = vector.broadcast %cst_36 : f32 to vector<32x32xf32>
    %122 = arith.mulf %120, %121 : vector<32x32xf32>
    %123 = arith.addf %122, %18 : vector<32x32xf32>
    %cst_37 = arith.constant dense<0xFF800000> : vector<32xf32>
    %124 = vector.multi_reduction <maximumf>, %123, %cst_37 [1] : vector<32x32xf32> to vector<32xf32>
    %125 = vector.shape_cast %124 : vector<32xf32> to vector<32x1xf32>
    %126 = vector.broadcast %125 : vector<32x1xf32> to vector<32x32xf32>
    %127 = arith.subf %123, %126 : vector<32x32xf32>
    %128 = math.exp %127 : vector<32x32xf32>
    %cst_38 = arith.constant dense<0.000000e+00> : vector<32xf32>
    %129 = vector.multi_reduction <add>, %128, %cst_38 [1] : vector<32x32xf32> to vector<32xf32>
    %130 = vector.shape_cast %129 : vector<32xf32> to vector<32x1xf32>
    %131 = tpu.reciprocal %130 {approx = true} : vector<32x1xf32> -> vector<32x1xf32>
    %132 = vector.broadcast %131 : vector<32x1xf32> to vector<32x32xf32>
    %133 = arith.mulf %128, %132 : vector<32x32xf32>
    %134 = arith.truncf %133 : vector<32x32xf32> to vector<32x32xbf16>
    %cst_39 = arith.constant dense<0.000000e+00> : vector<32x32xf32>
    %135 = tpu.matmul %134, %119, %cst_39 {dimension_numbers = #tpu.dot_dimension_numbers<[1], [0], [0], [1], [0, 0, 1, 1], [], []>} : vector<32x32xbf16>, vector<32x32xbf16>, vector<32x32xf32> -> vector<32x32xf32>
    %c0_40 = arith.constant 0 : index
    %c96 = arith.constant 96 : index
    %136 = vector.load %arg16[%c0_40, %c96] : memref<32x128xf32, #tpu.memory_space<vmem>>, vector<32x32xf32>
    tpu.vector_store %arg16[%c0_40, %c96], %135 {strides = array<i32>} : memref<32x128xf32, #tpu.memory_space<vmem>>, vector<32x32xf32>,
    %c0_41 = arith.constant 0 : index
    %c0_42 = arith.constant 0 : index
    %137 = vector.load %arg16[%c0_41, %c0_42] : memref<32x128xf32, #tpu.memory_space<vmem>>, vector<32x128xf32>
    %138 = arith.truncf %137 : vector<32x128xf32> to vector<32x128xbf16>
    %c0_43 = arith.constant 0 : index
    %c0_44 = arith.constant 0 : index
    %c0_45 = arith.constant 0 : index
    %139 = vector.load %arg8[%c0_43, %c0_44, %c0_45] : memref<1x128x128xbf16, #tpu.memory_space<vmem>>, vector<1x128x128xbf16>
    %140 = vector.shape_cast %139 : vector<1x128x128xbf16> to vector<128x128xbf16>
    %cst_46 = arith.constant dense<0.000000e+00> : vector<32x128xf32>
    %141 = tpu.matmul %138, %140, %cst_46 {dimension_numbers = #tpu.dot_dimension_numbers<[1], [0], [0], [1], [0, 0, 1, 1], [], []>} : vector<32x128xbf16>, vector<128x128xbf16>, vector<32x128xf32> -> vector<32x128xf32>
    %c0_47 = arith.constant 0 : index
    %c0_48 = arith.constant 0 : index
    %c0_49 = arith.constant 0 : index
    %142 = vector.load %arg9[%c0_47, %c0_48, %c0_49] : memref<1x1x128xf32, #tpu.memory_space<vmem>>, vector<1x1x128xf32>
    %143 = vector.shape_cast %142 : vector<1x1x128xf32> to vector<1x128xf32>
    %144 = vector.broadcast %143 : vector<1x128xf32> to vector<32x128xf32>
    %145 = arith.addf %141, %144 : vector<32x128xf32>
    %146 = arith.addf %3, %145 : vector<32x128xf32>
    %cst_50 = arith.constant dense<0.000000e+00> : vector<32xf32>
    %147 = vector.multi_reduction <add>, %146, %cst_50 [1] : vector<32x128xf32> to vector<32xf32>
    %148 = vector.shape_cast %147 : vector<32xf32> to vector<32x1xf32>
    %cst_51 = arith.constant 1.280000e+02 : f32
    %149 = vector.broadcast %cst_51 : f32 to vector<32x1xf32>
    %150 = arith.divf %148, %149 : vector<32x1xf32>
    %151 = vector.broadcast %150 : vector<32x1xf32> to vector<32x128xf32>
    %152 = arith.subf %146, %151 : vector<32x128xf32>
    %153 = arith.mulf %152, %152 : vector<32x128xf32>
    %cst_52 = arith.constant dense<0.000000e+00> : vector<32xf32>
    %154 = vector.multi_reduction <add>, %153, %cst_52 [1] : vector<32x128xf32> to vector<32xf32>
    %155 = vector.shape_cast %154 : vector<32xf32> to vector<32x1xf32>
    %cst_53 = arith.constant 1.280000e+02 : f32
    %156 = vector.broadcast %cst_53 : f32 to vector<32x1xf32>
    %157 = arith.divf %155, %156 : vector<32x1xf32>
    %158 = vector.broadcast %150 : vector<32x1xf32> to vector<32x128xf32>
    %159 = arith.subf %146, %158 : vector<32x128xf32>
    %cst_54 = arith.constant 9.99999997E-7 : f32
    %160 = vector.broadcast %cst_54 : f32 to vector<32x1xf32>
    %161 = arith.addf %157, %160 : vector<32x1xf32>
    %162 = math.rsqrt %161 : vector<32x1xf32>
    %163 = vector.broadcast %162 : vector<32x1xf32> to vector<32x128xf32>
    %164 = arith.mulf %159, %163 : vector<32x128xf32>
    %165 = arith.truncf %164 : vector<32x128xf32> to vector<32x128xbf16>
    %c0_55 = arith.constant 0 : index
    %c0_56 = arith.constant 0 : index
    %c0_57 = arith.constant 0 : index
    %166 = vector.load %arg10[%c0_55, %c0_56, %c0_57] : memref<1x128x512xbf16, #tpu.memory_space<vmem>>, vector<1x128x512xbf16>
    %167 = vector.shape_cast %166 : vector<1x128x512xbf16> to vector<128x512xbf16>
    %cst_58 = arith.constant dense<0.000000e+00> : vector<32x512xf32>
    %168 = tpu.matmul %165, %167, %cst_58 {dimension_numbers = #tpu.dot_dimension_numbers<[1], [0], [0], [1], [0, 0, 1, 1], [], []>} : vector<32x128xbf16>, vector<128x512xbf16>, vector<32x512xf32> -> vector<32x512xf32>
    %c0_59 = arith.constant 0 : index
    %c0_60 = arith.constant 0 : index
    %c0_61 = arith.constant 0 : index
    %169 = vector.load %arg11[%c0_59, %c0_60, %c0_61] : memref<1x1x512xf32, #tpu.memory_space<vmem>>, vector<1x1x512xf32>
    %170 = vector.shape_cast %169 : vector<1x1x512xf32> to vector<1x512xf32>
    %171 = vector.broadcast %170 : vector<1x512xf32> to vector<32x512xf32>
    %172 = arith.addf %168, %171 : vector<32x512xf32>
    %173 = arith.mulf %172, %172 : vector<32x512xf32>
    %174 = arith.mulf %172, %173 : vector<32x512xf32>
    %cst_62 = arith.constant 4.471500e-02 : f32
    %175 = vector.broadcast %cst_62 : f32 to vector<32x512xf32>
    %176 = arith.mulf %175, %174 : vector<32x512xf32>
    %177 = arith.addf %172, %176 : vector<32x512xf32>
    %cst_63 = arith.constant 0.797884583 : f32
    %178 = vector.broadcast %cst_63 : f32 to vector<32x512xf32>
    %179 = arith.mulf %178, %177 : vector<32x512xf32>
    %180 = math.tanh %179 : vector<32x512xf32>
    %cst_64 = arith.constant 1.000000e+00 : f32
    %181 = vector.broadcast %cst_64 : f32 to vector<32x512xf32>
    %182 = arith.addf %181, %180 : vector<32x512xf32>
    %cst_65 = arith.constant 5.000000e-01 : f32
    %183 = vector.broadcast %cst_65 : f32 to vector<32x512xf32>
    %184 = arith.mulf %183, %182 : vector<32x512xf32>
    %185 = arith.mulf %172, %184 : vector<32x512xf32>
    %186 = arith.truncf %185 : vector<32x512xf32> to vector<32x512xbf16>
    %c0_66 = arith.constant 0 : index
    %c0_67 = arith.constant 0 : index
    %c0_68 = arith.constant 0 : index
    %187 = vector.load %arg12[%c0_66, %c0_67, %c0_68] : memref<1x512x128xbf16, #tpu.memory_space<vmem>>, vector<1x512x128xbf16>
    %188 = vector.shape_cast %187 : vector<1x512x128xbf16> to vector<512x128xbf16>
    %cst_69 = arith.constant dense<0.000000e+00> : vector<32x128xf32>
    %189 = tpu.matmul %186, %188, %cst_69 {dimension_numbers = #tpu.dot_dimension_numbers<[1], [0], [0], [1], [0, 0, 1, 1], [], []>} : vector<32x512xbf16>, vector<512x128xbf16>, vector<32x128xf32> -> vector<32x128xf32>
    %c0_70 = arith.constant 0 : index
    %c0_71 = arith.constant 0 : index
    %c0_72 = arith.constant 0 : index
    %190 = vector.load %arg13[%c0_70, %c0_71, %c0_72] : memref<1x1x128xf32, #tpu.memory_space<vmem>>, vector<1x1x128xf32>
    %191 = vector.shape_cast %190 : vector<1x1x128xf32> to vector<1x128xf32>
    %192 = vector.broadcast %191 : vector<1x128xf32> to vector<32x128xf32>
    %193 = arith.addf %189, %192 : vector<32x128xf32>
    %194 = arith.addf %146, %193 : vector<32x128xf32>
    %c0_73 = arith.constant 0 : index
    %c0_74 = arith.constant 0 : index
    %195 = vector.load %arg15[%c0_73, %c0_74] : memref<32x128xf32, #tpu.memory_space<vmem>>, vector<32x128xf32>
    tpu.vector_store %arg15[%c0_73, %c0_74], %194 {strides = array<i32>} : memref<32x128xf32, #tpu.memory_space<vmem>>, vector<32x128xf32>,
    %c0_75 = arith.constant 0 : index
    %c0_76 = arith.constant 0 : index
    %196 = memref.load %arg17[%c0_75, %c0_76] : memref<1x1xf32, #tpu.memory_space<smem>>
    %197 = vector.extract_strided_slice %194 {offsets = [0, 0], sizes = [16, 128], strides = [1, 1]} : vector<32x128xf32> to vector<16x128xf32>
    %198 = vector.extract_strided_slice %194 {offsets = [16, 0], sizes = [16, 128], strides = [1, 1]} : vector<32x128xf32> to vector<16x128xf32>
    %199 = arith.subf %197, %198 : vector<16x128xf32>
    %200 = tpu.iota {dimensions = array<i32: 0>} : vector<16x1xi32>
    %c7_i32_77 = arith.constant 7 : i32
    %201 = vector.broadcast %c7_i32_77 : i32 to vector<16x1xi32>
    %202 = arith.andi %200, %201 : vector<16x1xi32>
    %c5_i32_78 = arith.constant 5 : i32
    %203 = vector.broadcast %c5_i32_78 : i32 to vector<16x1xi32>
    %204 = arith.cmpi slt, %202, %203 : vector<16x1xi32>
    %205 = arith.extui %204 : vector<16x1xi1> to vector<16x1xi32>
    %206 = arith.sitofp %205 : vector<16x1xi32> to vector<16x1xf32>
    %207 = vector.broadcast %206 : vector<16x1xf32> to vector<16x128xf32>
    %208 = arith.mulf %199, %207 : vector<16x128xf32>
    %209 = arith.mulf %208, %208 : vector<16x128xf32>
    %210 = vector.shape_cast %209 : vector<16x128xf32> to vector<1x16x128xf32>
    %cst_79 = arith.constant dense<0.000000e+00> : vector<1xf32>
    %211 = vector.multi_reduction <add>, %210, %cst_79 [1, 2] : vector<1x16x128xf32> to vector<1xf32>
    %212 = vector.shape_cast %211 : vector<1xf32> to vector<1x1x1xf32>
    %213 = vector.extract %212[0, 0, 0] : f32 from vector<1x1x1xf32>
    %cst_80 = arith.constant 1.562500e-03 : f32
    %214 = arith.mulf %213, %cst_80 : f32
    %215 = arith.addf %196, %214 : f32
    %c0_81 = arith.constant 0 : index
    %c0_82 = arith.constant 0 : index
    %216 = memref.load %arg17[%c0_81, %c0_82] : memref<1x1xf32, #tpu.memory_space<smem>>
    memref.store %215, %arg17[%c0_81, %c0_82] : memref<1x1xf32, #tpu.memory_space<smem>>
    %c1_i32 = arith.constant 1 : i32
    %217 = arith.cmpi eq, %arg0, %c1_i32 : i32
    %218 = arith.extui %217 : i1 to i32
    %c0_i32_83 = arith.constant 0 : i32
    %219 = arith.cmpi ne, %218, %c0_i32_83 : i32
    scf.if %219 {
      %c0_84 = arith.constant 0 : index
      %c0_85 = arith.constant 0 : index
      %220 = memref.load %arg17[%c0_84, %c0_85] : memref<1x1xf32, #tpu.memory_space<smem>>
      %c0_86 = arith.constant 0 : index
      %c0_87 = arith.constant 0 : index
      %221 = memref.load %arg14[%c0_86, %c0_87] : memref<1x1xf32, #tpu.memory_space<smem>>
      memref.store %220, %arg14[%c0_86, %c0_87] : memref<1x1xf32, #tpu.memory_space<smem>>
    } else {
    }
    return
  }
  func.func @transform_0(%arg0: i32) -> (i32, i32) {
    %c0_i32 = arith.constant 0 : i32
    %c0_i32_0 = arith.constant 0 : i32
    %c0_i32_1 = arith.constant 0 : i32
    return %c0_i32, %c0_i32_0 : i32, i32
  }
  func.func @transform_1(%arg0: i32) -> (i32, i32) {
    %c0_i32 = arith.constant 0 : i32
    %c0_i32_0 = arith.constant 0 : i32
    %c0_i32_1 = arith.constant 0 : i32
    return %c0_i32, %c0_i32_0 : i32, i32
  }
  func.func @transform_2(%arg0: i32) -> (i32, i32) {
    %c0_i32 = arith.constant 0 : i32
    %c0_i32_0 = arith.constant 0 : i32
    %c0_i32_1 = arith.constant 0 : i32
    return %c0_i32, %c0_i32_0 : i32, i32
  }
  func.func @transform_3(%arg0: i32) -> (i32, i32) {
    %c0_i32 = arith.constant 0 : i32
    %c0_i32_0 = arith.constant 0 : i32
    %c0_i32_1 = arith.constant 0 : i32
    return %c0_i32, %c0_i32_0 : i32, i32
  }
  func.func @transform_4(%arg0: i32) -> (i32, i32) {
    %c0_i32 = arith.constant 0 : i32
    %c0_i32_0 = arith.constant 0 : i32
    %c0_i32_1 = arith.constant 0 : i32
    return %c0_i32, %c0_i32_0 : i32, i32
  }
  func.func @transform_5(%arg0: i32) -> (i32, i32, i32) {
    %c0_i32 = arith.constant 0 : i32
    %c0_i32_0 = arith.constant 0 : i32
    %c0_i32_1 = arith.constant 0 : i32
    return %arg0, %c0_i32, %c0_i32_0 : i32, i32, i32
  }
  func.func @transform_6(%arg0: i32) -> (i32, i32, i32) {
    %c0_i32 = arith.constant 0 : i32
    %c0_i32_0 = arith.constant 0 : i32
    %c0_i32_1 = arith.constant 0 : i32
    return %arg0, %c0_i32, %c0_i32_0 : i32, i32, i32
  }
  func.func @transform_7(%arg0: i32) -> (i32, i32, i32) {
    %c0_i32 = arith.constant 0 : i32
    %c0_i32_0 = arith.constant 0 : i32
    %c0_i32_1 = arith.constant 0 : i32
    return %arg0, %c0_i32, %c0_i32_0 : i32, i32, i32
  }
  func.func @transform_8(%arg0: i32) -> (i32, i32, i32) {
    %c0_i32 = arith.constant 0 : i32
    %c0_i32_0 = arith.constant 0 : i32
    %c0_i32_1 = arith.constant 0 : i32
    return %arg0, %c0_i32, %c0_i32_0 : i32, i32, i32
  }
  func.func @transform_9(%arg0: i32) -> (i32, i32, i32) {
    %c0_i32 = arith.constant 0 : i32
    %c0_i32_0 = arith.constant 0 : i32
    %c0_i32_1 = arith.constant 0 : i32
    return %arg0, %c0_i32, %c0_i32_0 : i32, i32, i32
  }
  func.func @transform_10(%arg0: i32) -> (i32, i32, i32) {
    %c0_i32 = arith.constant 0 : i32
    %c0_i32_0 = arith.constant 0 : i32
    %c0_i32_1 = arith.constant 0 : i32
    return %arg0, %c0_i32, %c0_i32_0 : i32, i32, i32
  }
  func.func @transform_11(%arg0: i32) -> (i32, i32, i32) {
    %c0_i32 = arith.constant 0 : i32
    %c0_i32_0 = arith.constant 0 : i32
    %c0_i32_1 = arith.constant 0 : i32
    return %arg0, %c0_i32, %c0_i32_0 : i32, i32, i32
  }
  func.func @transform_12(%arg0: i32) -> (i32, i32, i32) {
    %c0_i32 = arith.constant 0 : i32
    %c0_i32_0 = arith.constant 0 : i32
    %c0_i32_1 = arith.constant 0 : i32
    return %arg0, %c0_i32, %c0_i32_0 : i32, i32, i32
  }
  func.func @transform_13(%arg0: i32) -> (i32, i32) {
    %c0_i32 = arith.constant 0 : i32
    %c0_i32_0 = arith.constant 0 : i32
    %c0_i32_1 = arith.constant 0 : i32
    return %c0_i32, %c0_i32_0 : i32, i32
  }
}

</mosaic_0001>

<bundles_post_ra>
// kernel: dino_percep_loss.1
= control target key start
LH: loop header
LB: loop body
LE: loop exit
PB: predicated region body
PF: predicated region fallthrough
CT: control target
= control target key end

     0   :  { %s4882_s0 = inlined_call_operand.vmem [shape: bf16[16,588], index: 0, kind: input, shape index: {}]   ;;  %s4883_s1 = inlined_call_operand.vmem [shape: bf16[588,128], index: 1, kind: input, shape index: {}]   ;;  %s4884_s2 = inlined_call_operand.vmem [shape: f32[1,128], index: 2, kind: input, shape index: {}]   ;;  %s4885_s3 = inlined_call_operand.vmem [shape: f32[1,128], index: 3, kind: input, shape index: {}]   ;;  %s4886_s4 = inlined_call_operand.vmem [shape: f32[5,128], index: 4, kind: input, shape index: {}]   ;;  %s4887_s5 = inlined_call_operand.vmem [shape: bf16[2,128,384], index: 5, kind: input, shape index: {}]   ;;  %s4888_s6 = inlined_call_operand.vmem [shape: f32[2,1,384], index: 6, kind: input, shape index: {}]   ;;  %s4889_s7 = inlined_call_operand.vmem [shape: bf16[2,128,128], index: 7, kind: input, shape index: {}]   ;;  %s4890_s8 = inlined_call_operand.vmem [shape: f32[2,1,128], index: 8, kind: input, shape index: {}]   ;;  %s4891_s9 = inlined_call_operand.vmem [shape: bf16[2,128,512], index: 9, kind: input, shape index: {}]   ;;  %s4892_s10 = inlined_call_operand.vmem [shape: f32[2,1,512], index: 10, kind: input, shape index: {}]   ;;  %s4893_s11 = inlined_call_operand.vmem [shape: bf16[2,512,128], index: 11, kind: input, shape index: {}]   ;;  %s4894_s12 = inlined_call_operand.vmem [shape: f32[2,1,128], index: 12, kind: input, shape index: {}]   ;;  %s4895_s13 = inlined_call_operand.hbm [shape: f32[1,1], index: 13, kind: output, shape index: {}]  }
   0x1   :  { %4898 = sst [smem:[#allocation9_spill]] %s4884_s2 }
   0x2   :  { %4899 = sst [smem:[#allocation10_spill]] %s4886_s4 }
   0x3   :  { %4900 = sst [smem:[#allocation11_spill]] %s4895_s13 }
   0x4   :  { %18 = vsyncpa [#allocation6], 0  ;;  %s4027_s25 = smov 0  }
   0x5 LB: > { %4901 = sst [smem:[#allocation8_spill]] %s3947_s25  ;;  %s4033_s26 = sadd.s32 4294967295, %s3947_s25   ;;  %s3947_s25 = sphi %s4027_s25, %s24_s25  }
   0x6   : > { %p3042_p0 = scmp.ge.s32.totalorder %s3947_s25, 1  ;;  %p447_p1 = scmp.lt.s32.totalorder %s3947_s25, 3 }
   0x8   : > { %p448_p2 = pnand %p3042_p0, %p447_p1 }
   0x9   : > { %p515_p3 = scmp.lt.s32.totalorder (!%p448_p2), %s4033_s26, 1  ;;  %p3051_p4 = scmp.ne.s32.totalorder (!%p448_p2), %s4033_s26, 0 }
   0xa   : > { %451 = sbr.rel (%p448_p2) target bundleno = 2633 (0xa49), region = 72 }
   0xf   : > { %s4039_s27 = scalar_select %p515_p3, %s4033_s26, 1 }
  0x10   : > { %s4902_s22 = sld [smem:[#allocation10_spill]] (!%p3051_p4) }
  0x11   : > { %s3771_s28 = smul.u32 192, %s4039_s27  ;;  %s3630_s29 = sshll.u32 %s4039_s27, 6 }
  0x12   : > { %s3772_s30 = smul.u32 3, %s4039_s27  ;;  %s4047_s16 = scalar_lea.vmem %s4889_s7, %s3630_s29 }
  0x13   : > { %s4052_s19 = scalar_lea.vmem %s4887_s5, %s3771_s28  ;;  %s3631_s13 = sshll.u32 %s4039_s27, 8 }
  0x14   : > { %s4061_s25 = scalar_lea.vmem %s4888_s6, %s3772_s30  ;;  %s4067_s29 = scalar_lea.vmem %s4891_s9, %s3631_s13 }
  0x15   : > { %s3048_s14 = sshll.u32 %s4039_s27, 2  ;;  %s4078_s21 = scalar_lea.vmem %s4893_s11, %s3631_s13 }
  0x16   : > { %s4073_s28 = scalar_lea.vmem %s4892_s10, %s3048_s14  ;;  %s548_s24 = scalar_lea.vmem %s4894_s12, %s4039_s27 }
  0x17   : > { %553 = sbr.rel (%p3051_p4) target bundleno = 416 (0x1a0), region = 76  ;;  %s4903_s14 = sld [smem:[#allocation9_spill]] (!%p3051_p4) }
  0x1c   : > { %v3645_v0 = vld [vmem:[%s4883_s1 + $0x38] sm:$0xff]  ;;  %v3644_v4 = vld [vmem:[%s4883_s1 + $0x30] sm:$0xff]  ;;  %v3643_v8 = vld [vmem:[%s4883_s1 + $0x28] sm:$0xff]  ;;  %vm888_vm0 = vcmask 1045504   ;;  %vm884_vm1 = vcmask 621568   ;;  %v3949_v58 = vmov 0.0  }
  0x1d   : > { %v3661_v1 = vld [vmem:[%s4883_s1 + $0xb8] sm:$0xff]  ;;  %892 = vmatpush.bf16.msra.mxu0 %v3645_v0  ;;  %v3660_v5 = vld [vmem:[%s4883_s1 + $0xb0] sm:$0xff]  ;;  %v3659_v9 = vld [vmem:[%s4883_s1 + $0xa8] sm:$0xff]  ;;  %966 = vst [vmem:[#allocation2] sm:$0xff] %v3949_v58 }
  0x1e   : > { %v3669_v2 = vld [vmem:[%s4883_s1 + $0xf8] sm:$0xff]  ;;  %920 = vmatpush.bf16.msra.mxu2 %v3661_v1  ;;  %v3668_v6 = vld [vmem:[%s4883_s1 + $0xf0] sm:$0xff]  ;;  %v3667_v10 = vld [vmem:[%s4883_s1 + $0xe8] sm:$0xff]  ;;  %967 = vst [vmem:[#allocation2 + $0x8] sm:$0xff] %v3949_v58 }
  0x1f   : > { %v3653_v3 = vld [vmem:[%s4883_s1 + $0x78] sm:$0xff]  ;;  %934 = vmatpush.bf16.msra.mxu3 %v3669_v2  ;;  %v3652_v7 = vld [vmem:[%s4883_s1 + $0x70] sm:$0xff]  ;;  %v3651_v11 = vld [vmem:[%s4883_s1 + $0x68] sm:$0xff]  ;;  %968 = vst [vmem:[#allocation2 + $0x10] sm:$0xff] %v3949_v58 }
  0x20   : > { %906 = vmatpush.bf16.msra.mxu1 %v3653_v3  ;;  %v3642_v12 = vld [vmem:[%s4883_s1 + $0x20] sm:$0xff]  ;;  %v3641_v16 = vld [vmem:[%s4883_s1 + $0x18] sm:$0xff]  ;;  %v3640_v20 = vld [vmem:[%s4883_s1 + $0x10] sm:$0xff]  ;;  %969 = vst [vmem:[#allocation2 + $0x18] sm:$0xff] %v3949_v58 }
  0x21   : > { %893 = vmatpush.bf16.msra.mxu0 %v3644_v4  ;;  %v3658_v13 = vld [vmem:[%s4883_s1 + $0xa0] sm:$0xff]  ;;  %v3657_v17 = vld [vmem:[%s4883_s1 + $0x98] sm:$0xff]  ;;  %v3656_v21 = vld [vmem:[%s4883_s1 + $0x90] sm:$0xff] }
  0x22   : > { %921 = vmatpush.bf16.msra.mxu2 %v3660_v5  ;;  %v3666_v14 = vld [vmem:[%s4883_s1 + $0xe0] sm:$0xff]  ;;  %v3665_v18 = vld [vmem:[%s4883_s1 + $0xd8] sm:$0xff]  ;;  %v3664_v22 = vld [vmem:[%s4883_s1 + $0xd0] sm:$0xff] }
  0x23   : > { %935 = vmatpush.bf16.msra.mxu3 %v3668_v6  ;;  %v3650_v15 = vld [vmem:[%s4883_s1 + $0x60] sm:$0xff]  ;;  %v3649_v19 = vld [vmem:[%s4883_s1 + $0x58] sm:$0xff]  ;;  %v3648_v23 = vld [vmem:[%s4883_s1 + $0x50] sm:$0xff] }
  0x24   : > { %907 = vmatpush.bf16.msra.mxu1 %v3652_v7  ;;  %v3218_v24 = vld [vmem:[%s4883_s1 + $0x120] sm:$0xf]  ;;  %v3674_v25 = vld [vmem:[%s4883_s1 + $0x120] sm:$0x30]  ;;  %v3639_v26 = vld [vmem:[%s4883_s1 + $0x8] sm:$0xff] }
  0x25   : > { %894 = vmatpush.bf16.msra.mxu0 %v3643_v8  ;;  %v3655_v27 = vld [vmem:[%s4883_s1 + $0x88] sm:$0xff]  ;;  %v3219_v30 = vor.u32 %v3674_v25, %v3218_v24  ;;  %v3638_v31 = vld [vmem:[%s4883_s1] sm:$0xff]  ;;  %v3635_v34 = vld [vmem:[%s4882_s0 + $0x10] sm:$0xf0] }
  0x26   : > { %922 = vmatpush.bf16.msra.mxu2 %v3659_v9  ;;  %v3663_v28 = vld [vmem:[%s4883_s1 + $0xc8] sm:$0xff]  ;;  %v3654_v32 = vld [vmem:[%s4883_s1 + $0x80] sm:$0xff]  ;;  %v3636_v36 = vld [vmem:[%s4882_s0 + $0x18] sm:$0xf0] }
  0x27   : > { %936 = vmatpush.bf16.msra.mxu3 %v3667_v10  ;;  %v3647_v29 = vld [vmem:[%s4883_s1 + $0x48] sm:$0xff]  ;;  %v3054_v33 = vld [vmem:[%s4882_s0] sm:$0xf]  ;;  %v890_v40 = vsel %vm888_vm0, %v3219_v30, 0  ;;  %v3633_v42 = vld [vmem:[%s4882_s0 + $0x4] sm:$0xf] }
  0x28   : > { %908 = vmatpush.bf16.msra.mxu1 %v3651_v11  ;;  %v3062_v35 = vld [vmem:[%s4882_s0 + $0x8] sm:$0xf]  ;;  %v3662_v37 = vld [vmem:[%s4883_s1 + $0xc0] sm:$0xff]  ;;  %v3634_v38 = vld [vmem:[%s4882_s0 + $0xc] sm:$0xf]  ;;  %v3055_v44 = vor.u32 %v3635_v34, %v3054_v33 }
  0x29   : > { %895 = vmatpush.bf16.msra.mxu0 %v3642_v12  ;;  %v3064_v39 = vld [vmem:[%s4882_s0 + $0x1c] sm:$0xf0]  ;;  %v3056_v43 = vld [vmem:[%s4882_s0 + $0x14] sm:$0xf0]  ;;  %v3063_v45 = vor.u32 %v3636_v36, %v3062_v35  ;;  %v3672_v49 = vld [vmem:[%s4883_s1 + $0x110] sm:$0xff] }
  0x2a   : > { %923 = vmatpush.bf16.msra.mxu2 %v3658_v13  ;;  %v3646_v41 = vld [vmem:[%s4883_s1 + $0x40] sm:$0xff]  ;;  %v3067_v46 = vor.u32 %v3634_v38, %v3064_v39  ;;  %v3059_v47 = vor.u32 %v3633_v42, %v3056_v43  ;;  %v3673_v48 = vld [vmem:[%s4883_s1 + $0x118] sm:$0xff]  ;;  %v3671_v50 = vld [vmem:[%s4883_s1 + $0x108] sm:$0xff]  ;;  %v991_v13 = vlaneseq }
  0x2b   : > { %937 = vmatpush.bf16.msra.mxu3 %v3666_v14  ;;  %v3670_v51 = vld [vmem:[%s4883_s1 + $0x100] sm:$0xff]  ;;  %v3070_v52 = vld [vmem:[%s4882_s0 + $0x10] sm:$0xf] }
  0x2c   : > { %909 = vmatpush.bf16.msra.mxu1 %v3650_v15  ;;  %v3637_v53 = vld [vmem:[%s4882_s0 + $0x20] sm:$0xf0]  ;;  %v962_v55 = vld [vmem:[%s4885_s3] sm:$0x1] }
  0x2d   : > { %896 = vmatpush.bf16.msra.mxu0 %v3641_v16  ;;  %v3071_v54 = vor.u32 %v3637_v53, %v3070_v52  ;;  %v963_v56 = vld [vmem:[%s4902_s22] sm:$0x1]  ;;  %v965_v4 = vld [vmem:[%s4902_s22 + $0x1] sm:$0xf] }
  0x2e   : > { %924 = vmatpush.bf16.msra.mxu2 %v3657_v17  ;;  %v964_v57 = vadd.f32 %v963_v56, %v962_v55  ;;  %v3802_v59 = vld [vmem:[%s4903_s14] ss:$0 sm:$0xff]  ;;  %v975_v8 = vrot.slane %v965_v4, 4 }
  0x2f   : > { %938 = vmatpush.bf16.msra.mxu3 %v3665_v18  ;;  %v992_v18 = vshrl.u32 %v991_v13, 7 }
  0x30   : > { %910 = vmatpush.bf16.msra.mxu1 %v3649_v19  ;;  %970 = vst [vmem:[#allocation2] sm:$0x1] %v964_v57 }
  0x31   : > { %897 = vmatpush.bf16.msra.mxu0 %v3640_v20  ;;  %973 = vst [vmem:[#allocation2 + $0x8] sm:$0x1] %v964_v57  ;;  %v994_v25 = vand.u32 7, %v992_v18 }
  0x32   : > { %925 = vmatpush.bf16.msra.mxu2 %v3656_v21  ;;  %979 = vst [vmem:[#allocation2 + $0x10] sm:$0x1] %v964_v57 }
  0x33   : > { %939 = vmatpush.bf16.msra.mxu3 %v3664_v22  ;;  %982 = vst [vmem:[#allocation2 + $0x18] sm:$0x1] %v964_v57  ;;  %v993_v22 = vadd.s32 8, %v992_v18  ;;  %vm996_vm2 = vcmp.lt.s32.totalorder %v994_v25, 5 }
  0x34   : > { %911 = vmatpush.bf16.msra.mxu1 %v3648_v23 }
  0x35   : > { %898 = vmatpush.bf16.msra.mxu0 %v3639_v26  ;;  %v995_v26 = vand.u32 7, %v993_v22 }
  0x36   : > { %926 = vmatpush.bf16.msra.mxu2 %v3655_v27 }
  0x37   : > { %940 = vmatpush.bf16.msra.mxu3 %v3663_v28  ;;  %vm997_vm3 = vcmp.lt.s32.totalorder %v995_v26, 5 }
  0x38   : > { %912 = vmatpush.bf16.msra.mxu1 %v3647_v29  ;;  %v3221_v29 = vsel %vm996_vm2, 1.0, %v3949_v58  ;;  %v3222_v33 = vsel %vm997_vm3, 1.0, %v3949_v58 }
  0x39   : > { %899 = vmatpush.bf16.msra.mxu0 %v3638_v31 }
  0x3a   : > { %927 = vmatpush.bf16.msra.mxu2 %v3654_v32 }
  0x3b   : > { %941 = vmatpush.bf16.msra.mxu3 %v3662_v37 }
  0x3c   : > { %913 = vmatpush.bf16.msra.mxu1 %v3646_v41  ;;  %900 = vmatmul.bf16.vlgmr.msra.gmra.mxu0 %v3055_v44 }
  0x3d   : > { %951 = vmatpush.bf16.msrb.mxu0 %v890_v40  ;;  %928 = vmatmul.bf16.vlgmr.msra.gmra.mxu2 %v3063_v45 }
  0x3e   : > { %942 = vmatmul.bf16.vlgmr.msra.gmra.mxu3 %v3067_v46 }
  0x3f   : > { %914 = vmatmul.bf16.vlgmr.msra.gmra.mxu1 %v3059_v47 }
  0x41   : > { %952 = vmatpush.bf16.msrb.mxu0 %v3673_v48 }
  0x45   : > { %953 = vmatpush.bf16.msrb.mxu0 %v3672_v49 }
  0x49   : > { %954 = vmatpush.bf16.msrb.mxu0 %v3671_v50 }
  0x4d   : > { %955 = vmatpush.bf16.msrb.mxu0 %v3670_v51 }
  0x50   : > { %3220 = vmatmul.msk.bf16.vlgmr.msrb.gmra.mxu0 %vm884_vm1, %v3071_v54 }
  0xb9   : > { %v901_v60 = vpop.f32.mrf.mxu0 }
  0xba   : > { %v902_v61 = vadd.f32 %v3802_v59, %v901_v60 }
  0xbc   : > { %v915_v62 = vpop.f32.mrf.mxu1 }
  0xbd   : > { %v916_v0 = vadd.f32 %v915_v62, %v902_v61 }
  0xc0   : > { %v929_v63 = vpop.f32.mrf.mxu2 }
  0xc1   : > { %v903_v1 = vpop.f32.mrf.mxu0  ;;  %v943_v2 = vpop.f32.mrf.mxu3  ;;  %v930_v3 = vadd.f32 %v929_v63, %v916_v0 }
  0xc2   : > { %v904_v5 = vadd.f32 %v3802_v59, %v903_v1 }
  0xc3   : > { %v944_v7 = vadd.f32 %v943_v2, %v930_v3 }
  0xc4   : > { %v917_v6 = vpop.f32.mrf.mxu1 }
  0xc5   : > { %v918_v11 = vadd.f32 %v917_v6, %v904_v5 }
  0xc8   : > { %v931_v9 = vpop.f32.mrf.mxu2 }
  0xc9   : > { %v932_v14 = vadd.f32 %v931_v9, %v918_v11  ;;  %v945_v17 = vpop.f32.mrf.mxu3 }
  0xcb   : > { %v946_v19 = vadd.f32 %v945_v17, %v932_v14 }
  0xcd   : > { %v957_v10 = vpop.f32.mrf.mxu0 }
  0xce   : > { %v958_v12 = vadd.f32 %v957_v10, %v944_v7 }
  0xd0   : > { %v971_v15 = vadd.f32 %v965_v4, %v958_v12  ;;  %v977_v16 = vadd.f32 %v975_v8, %v958_v12 }
  0xd2   : > { %972 = vst [vmem:[#allocation2 + $0x1] sm:$0xf] %v971_v15 }
  0xd3   : > { %978 = vst [vmem:[#allocation2 + $0x5] sm:$0xf0] %v977_v16 }
  0xd5   : > { %v959_v20 = vpop.f32.mrf.mxu0 }
  0xd6   : > { %v960_v21 = vadd.f32 %v959_v20, %v946_v19 }
  0xd8   : > { %v980_v23 = vadd.f32 %v965_v4, %v960_v21  ;;  %v983_v24 = vadd.f32 %v975_v8, %v960_v21 }
  0xd9   : > { %v985_v27 = vld [vmem:[#allocation2] sm:$0xff] }
  0xda   : > { %981 = vst [vmem:[#allocation2 + $0x11] sm:$0xf] %v980_v23  ;;  %v986_v30 = vld [vmem:[#allocation2 + $0x8] sm:$0xff] }
  0xdb   : > { %984 = vst [vmem:[#allocation2 + $0x15] sm:$0xf0] %v983_v24 }
  0xe1   : > { %v987_v28 = vld [vmem:[#allocation2 + $0x10] sm:$0xff] }
  0xe2   : > { %v988_v31 = vld [vmem:[#allocation2 + $0x18] sm:$0xff]  ;;  %v989_v32 = vsub.f32 %v985_v27, %v987_v28 }
  0xe3   : > { %v990_v34 = vsub.f32 %v986_v30, %v988_v31 }
  0xe4   : > { %v1002_v35 = vmul.f32 %v3221_v29, %v989_v32 }
  0xe5   : > { %v1003_v36 = vmul.f32 %v3222_v33, %v990_v34 }
  0xe6   : > { %v1004_v37 = vmul.f32 %v1002_v35, %v1002_v35 }
  0xe7   : > { %v1005_v38 = vmul.f32 %v1003_v36, %v1003_v36 }
  0xe9   : > { %v1006_v39 = vadd.f32 %v1005_v38, %v1004_v37 }
  0xeb   : > { %1007 = vadd.xlane.f32.xlu0 %v1006_v39 }
 0x15e   : > { %v1008_v40 = vpop.xlane.xlu0 %1007 }
 0x15f   : > { %v1009_v41 = vrot.slane %v1008_v40, 4 }
 0x161   : > { %v1010_v42 = vadd.f32 %v1009_v41, %v1008_v40 }
 0x163   : > { %v1011_v43 = vrot.slane %v1010_v42, 2 }
 0x165   : > { %v1012_v44 = vadd.f32 %v1011_v43, %v1010_v42 }
 0x167   : > { %v1013_v45 = vrot.slane %v1012_v44, 1 }
 0x169   : > { %v1014_v46 = vadd.f32 %v1013_v45, %v1012_v44 }
 0x16b   : > { %3773 = vpush %v1014_v46 }
 0x19c   : > { %s3774_s18 = spop %3773 }
 0x19d   : > { %s1016_s20 = smul.f32 0.0015625, %s3774_s18 }
 0x19f   : > { %1018 = sst [smem:[#allocation4]] %s1016_s20 }
 0x1a0 PF: > { %v1021_v47 = vld [vmem:[#allocation2 + $0x10] sm:$0xff]  ;;  %v1019_v48 = vld [vmem:[#allocation2] sm:$0xff]  ;;  %v1022_v49 = vld [vmem:[#allocation2 + $0x18] sm:$0xff]  ;;  %v3950_v51 = vmov 128.0   ;;  %vm1369_vm1 = vcmask 261120   ;;  %s3953_s23 = smov 32   ;;  %s4906_s2 = scalar_lea.vmem %s4890_s8, %s4039_s27 }
 0x1a1   : > { %1053 = vadd.xlane.f32.xlu1 %v1021_v47  ;;  %1049 = vadd.xlane.f32.xlu0 %v1019_v48  ;;  %v1020_v50 = vld [vmem:[#allocation2 + $0x8] sm:$0xff]  ;;  %3805 = vrcp.f32 %v3950_v51  ;;  %v3697_v11 = vld [vmem:[%s4052_s19 + $0xb0] sm:$0xf0]  ;;  %v3311_v14 = vld [vmem:[%s4052_s19 + $0xb4] sm:$0xf0]  ;;  %s2878_s27 = sld [smem:[#allocation4]] }
 0x1a2   : > { %v3309_v10 = vld [vmem:[%s4052_s19 + $0xa8] sm:$0xf]  ;;  %v3696_v12 = vld [vmem:[%s4052_s19 + $0xac] sm:$0xf]  ;;  %v3317_v15 = vld [vmem:[%s4052_s19 + $0xb0] sm:$0xf] }
 0x1a3   : > { %v3310_v13 = vor.u32 %v3697_v11, %v3309_v10  ;;  %v3698_v16 = vld [vmem:[%s4052_s19 + $0xb8] sm:$0xf0]  ;;  %v3314_v17 = vor.u32 %v3696_v12, %v3311_v14  ;;  %v3297_v19 = vld [vmem:[%s4052_s19 + $0x90] sm:$0xf]  ;;  %v3693_v21 = vld [vmem:[%s4052_s19 + $0x94] sm:$0xf] }
 0x1a4   : > { %v3318_v18 = vor.u32 %v3698_v16, %v3317_v15  ;;  %v3694_v20 = vld [vmem:[%s4052_s19 + $0x98] sm:$0xf0]  ;;  %v3299_v23 = vld [vmem:[%s4052_s19 + $0x9c] sm:$0xf0]  ;;  %v3305_v24 = vld [vmem:[%s4052_s19 + $0x98] sm:$0xf] }
 0x1a5   : > { %1306 = vmatpush.bf16.msra.mxu0 %v3310_v13  ;;  %1325 = vmatpush.bf16.msra.mxu1 %v3314_v17  ;;  %v3298_v22 = vor.u32 %v3694_v20, %v3297_v19  ;;  %v3695_v25 = vld [vmem:[%s4052_s19 + $0xa0] sm:$0xf0]  ;;  %v3302_v26 = vor.u32 %v3693_v21, %v3299_v23  ;;  %v3285_v28 = vld [vmem:[%s4052_s19 + $0x78] sm:$0xf]  ;;  %v3690_v30 = vld [vmem:[%s4052_s19 + $0x7c] sm:$0xf] }
 0x1a6   : > { %1344 = vmatpush.bf16.msra.mxu2 %v3318_v18  ;;  %v3306_v27 = vor.u32 %v3695_v25, %v3305_v24  ;;  %v3691_v29 = vld [vmem:[%s4052_s19 + $0x80] sm:$0xf0]  ;;  %v3287_v32 = vld [vmem:[%s4052_s19 + $0x84] sm:$0xf0]  ;;  %v3293_v33 = vld [vmem:[%s4052_s19 + $0x80] sm:$0xf] }
 0x1a7   : > { %v3806_v52 = vpop.eup %3805  ;;  %v3286_v31 = vor.u32 %v3691_v29, %v3285_v28  ;;  %v3692_v34 = vld [vmem:[%s4052_s19 + $0x88] sm:$0xf0]  ;;  %v3290_v35 = vor.u32 %v3690_v30, %v3287_v32  ;;  %v3273_v37 = vld [vmem:[%s4052_s19 + $0x60] sm:$0xf]  ;;  %v3687_v39 = vld [vmem:[%s4052_s19 + $0x64] sm:$0xf] }
 0x1a8   : > { %v1058_v53 = vmul.f32 128.0, %v3806_v52  ;;  %vm1062_vm4 = vweird.f32 %v3806_v52  ;;  %v3294_v36 = vor.u32 %v3692_v34, %v3293_v33  ;;  %v3688_v38 = vld [vmem:[%s4052_s19 + $0x68] sm:$0xf0]  ;;  %v3275_v41 = vld [vmem:[%s4052_s19 + $0x6c] sm:$0xf0]  ;;  %s4907_s14 = sld [smem:[#allocation11_spill]] }
 0x1a9   : > { %1055 = vadd.xlane.f32.xlu1 %v1022_v49  ;;  %1051 = vadd.xlane.f32.xlu0 %v1020_v50  ;;  %v3274_v40 = vor.u32 %v3688_v38, %v3273_v37  ;;  %v3281_v42 = vld [vmem:[%s4052_s19 + $0x68] sm:$0xf]  ;;  %v3689_v43 = vld [vmem:[%s4052_s19 + $0x70] sm:$0xf0]  ;;  %v3278_v44 = vor.u32 %v3687_v39, %v3275_v41  ;;  %v3269_v51 = vld [vmem:[%s4052_s19 + $0x50] sm:$0xf] }
 0x1aa   : > { %v1059_v54 = vsub.f32 1.0, %v1058_v53  ;;  %1307 = vmatpush.bf16.msra.mxu0 %v3298_v22  ;;  %1326 = vmatpush.bf16.msra.mxu1 %v3302_v26  ;;  %v3282_v45 = vor.u32 %v3689_v43, %v3281_v42  ;;  %v3261_v46 = vld [vmem:[%s4052_s19 + $0x48] sm:$0xf]  ;;  %v3245_v10 = vld [vmem:[%s4052_s19 + $0x20] sm:$0xf]  ;;  %p3783_p5 = scmp.eq.s32.totalorder %s4033_s26, 1 }
 0x1ab   : > { %1345 = vmatpush.bf16.msra.mxu2 %v3306_v27  ;;  %v3680_v11 = vld [vmem:[%s4052_s19 + $0x28] sm:$0xf0]  ;;  %v3225_v14 = vld [vmem:[%s4052_s19] sm:$0xf]  ;;  %v3675_v16 = vld [vmem:[%s4052_s19 + $0x4] sm:$0xf] }
 0x1ac   : > { %v1060_v55 = vmul.f32 %v3806_v52, %v1059_v54  ;;  %v3246_v13 = vor.u32 %v3680_v11, %v3245_v10  ;;  %v3676_v15 = vld [vmem:[%s4052_s19 + $0x8] sm:$0xf0]  ;;  %v3227_v18 = vld [vmem:[%s4052_s19 + $0xc] sm:$0xf0]  ;;  %v3233_v19 = vld [vmem:[%s4052_s19 + $0x8] sm:$0xf] }
 0x1ad   : > { %v3226_v17 = vor.u32 %v3676_v15, %v3225_v14  ;;  %v3677_v20 = vld [vmem:[%s4052_s19 + $0x10] sm:$0xf0]  ;;  %v3230_v21 = vor.u32 %v3675_v16, %v3227_v18  ;;  %v1170_v10 = vld [vmem:[%s4061_s25] sm:$0x7]  ;;  %s3952_s25 = smov 64   ;;  %s3956_s18 = smov [#allocation5]  }
 0x1ae   : > { %v1061_v56 = vadd.f32 %v3806_v52, %v1060_v55  ;;  %1308 = vmatpush.bf16.msra.mxu0 %v3286_v31  ;;  %1327 = vmatpush.bf16.msra.mxu1 %v3290_v35  ;;  %v3249_v55 = vld [vmem:[%s4052_s19 + $0x30] sm:$0xf]  ;;  %v3234_v22 = vor.u32 %v3677_v20, %v3233_v19  ;;  %v1172_v11 = vperm.slane %v1170_v10, 0  ;;  %s2920_s17 = sshll.u32 %s4907_s14, 4  ;;  %s2921_s17 = int_to_ptr.hbm [resolvable:$true] %s2920_s17 }
 0x1af   : > { %1346 = vmatpush.bf16.msra.mxu2 %v3294_v36 }
 0x1b0   : > { %v4241_v57 = vsel %vm1062_vm4, %v3806_v52, %v1061_v56  ;;  %v3686_v52 = vld [vmem:[%s4052_s19 + $0x58] sm:$0xf0] }
 0x1b1   : > { %v3270_v54 = vor.u32 %v3686_v52, %v3269_v51  ;;  %v3682_v56 = vld [vmem:[%s4052_s19 + $0x38] sm:$0xf0] }
 0x1b2   : > { %1309 = vmatpush.bf16.msra.mxu0 %v3274_v40  ;;  %1328 = vmatpush.bf16.msra.mxu1 %v3278_v44 }
 0x1b3   : > { %1347 = vmatpush.bf16.msra.mxu2 %v3282_v45 }
 0x1b7   : > { %1348 = vmatpush.bf16.msra.mxu2 %v3270_v54 }
 0x214   : > { %v1054_v58 = vpop.xlane.xlu1 %1053  ;;  %v1050_v59 = vpop.xlane.xlu0 %1049 }
 0x215   : > { %v1066_v60 = vmul.f32 %v4241_v57, %v1054_v58  ;;  %v1064_v61 = vmul.f32 %v4241_v57, %v1050_v59  ;;  %v3681_v58 = vld [vmem:[%s4052_s19 + $0x34] sm:$0xf]  ;;  %v3250_v59 = vor.u32 %v3682_v56, %v3249_v55 }
 0x217   : > { %v4245_v62 = vsub.f32 %v1021_v47, %v1066_v60  ;;  %v4247_v63 = vsub.f32 %v1019_v48, %v1064_v61  ;;  %v3685_v47 = vld [vmem:[%s4052_s19 + $0x50] sm:$0xf0]  ;;  %v3684_v48 = vld [vmem:[%s4052_s19 + $0x4c] sm:$0xf]  ;;  %v3251_v60 = vld [vmem:[%s4052_s19 + $0x3c] sm:$0xf0] }
 0x218   : > { %v3257_v61 = vld [vmem:[%s4052_s19 + $0x38] sm:$0xf] }
 0x219   : > { %v1074_v0 = vmul.f32 %v4245_v62, %v4245_v62  ;;  %v1072_v1 = vmul.f32 %v4247_v63, %v4247_v63 }
 0x21b   : > { %1080 = vadd.xlane.f32.xlu0 %v1074_v0  ;;  %1076 = vadd.xlane.f32.xlu2 %v1072_v1  ;;  %v3683_v0 = vld [vmem:[%s4052_s19 + $0x40] sm:$0xf0]  ;;  %v3254_v1 = vor.u32 %v3681_v58, %v3251_v60 }
 0x21c   : > { %v1056_v2 = vpop.xlane.xlu1 %1055  ;;  %v1052_v3 = vpop.xlane.xlu0 %1051 }
 0x21d   : > { %v1067_v4 = vmul.f32 %v4241_v57, %v1056_v2  ;;  %v1065_v5 = vmul.f32 %v4241_v57, %v1052_v3  ;;  %v3258_v2 = vor.u32 %v3683_v0, %v3257_v61  ;;  %v3237_v3 = vld [vmem:[%s4052_s19 + $0x18] sm:$0xf] }
 0x21f   : > { %v4255_v6 = vsub.f32 %v1022_v49, %v1067_v4  ;;  %v4257_v7 = vsub.f32 %v1020_v50, %v1065_v5  ;;  %v3262_v49 = vor.u32 %v3685_v47, %v3261_v46  ;;  %v3263_v50 = vld [vmem:[%s4052_s19 + $0x54] sm:$0xf0]  ;;  %1349 = vmatpush.bf16.msra.mxu2 %v3258_v2  ;;  %v3679_v4 = vld [vmem:[%s4052_s19 + $0x20] sm:$0xf0]  ;;  %v3678_v5 = vld [vmem:[%s4052_s19 + $0x1c] sm:$0xf] }
 0x220   : > { %v3266_v53 = vor.u32 %v3684_v48, %v3263_v50 }
 0x221   : > { %v1075_v8 = vmul.f32 %v4255_v6, %v4255_v6  ;;  %v1073_v9 = vmul.f32 %v4257_v7, %v4257_v7  ;;  %1310 = vmatpush.bf16.msra.mxu0 %v3262_v49 }
 0x222   : > { %1329 = vmatpush.bf16.msra.mxu1 %v3266_v53 }
 0x223   : > { %1082 = vadd.xlane.f32.xlu1 %v1075_v8  ;;  %1078 = vadd.xlane.f32.xlu2 %v1073_v9  ;;  %v3238_v8 = vor.u32 %v3679_v4, %v3237_v3  ;;  %v3239_v9 = vld [vmem:[%s4052_s19 + $0x24] sm:$0xf0]  ;;  %s3951_s19 = smov 96  }
 0x224   : > { %v3242_v12 = vor.u32 %v3678_v5, %v3239_v9  ;;  %1350 = vmatpush.bf16.msra.mxu2 %v3246_v13 }
 0x225   : > { %1311 = vmatpush.bf16.msra.mxu0 %v3250_v59 }
 0x226   : > { %1330 = vmatpush.bf16.msra.mxu1 %v3254_v1 }
 0x228   : > { %1351 = vmatpush.bf16.msra.mxu2 %v3234_v22 }
 0x229   : > { %1312 = vmatpush.bf16.msra.mxu0 %v3238_v8 }
 0x22a   : > { %1331 = vmatpush.bf16.msra.mxu1 %v3242_v12  ;;  %v1173_v12 = vperm.slane %v1170_v10, 1 }
 0x22d   : > { %1313 = vmatpush.bf16.msra.mxu0 %v3226_v17 }
 0x22e   : > { %1332 = vmatpush.bf16.msra.mxu1 %v3230_v21 }
 0x28e   : > { %v1077_v23 = vpop.xlane.xlu2 %1076  ;;  %v1081_v26 = vpop.xlane.xlu0 %1080 }
 0x28f   : > { %v1084_v24 = vmul.f32 %v1077_v23, %v4241_v57  ;;  %v1086_v27 = vmul.f32 %v1081_v26, %v4241_v57 }
 0x291   : > { %v1088_v25 = vadd.f32 1e-06, %v1084_v24  ;;  %v1090_v36 = vadd.f32 1e-06, %v1086_v27 }
 0x293   : > { %3807 = vrsqrt.f32 %v1088_v25  ;;  %vm1098_vm6 = vweird.f32 %v1088_v25  ;;  %vm1118_vm13 = vweird.f32 %v1090_v36 }
 0x296   : > { %v1083_v28 = vpop.xlane.xlu1 %1082  ;;  %v1079_v29 = vpop.xlane.xlu2 %1078 }
 0x297   : > { %v1087_v30 = vmul.f32 %v1083_v28, %v4241_v57  ;;  %v1085_v31 = vmul.f32 %v1079_v29, %v4241_v57 }
 0x299   : > { %v3808_v32 = vpop.eup %3807  ;;  %v1091_v33 = vadd.f32 1e-06, %v1087_v30  ;;  %v1089_v34 = vadd.f32 1e-06, %v1085_v31  ;;  %v1174_v30 = vperm.slane %v1170_v10, 2 }
 0x29a   : > { %v1093_v35 = vmul.f32 %v3808_v32, %v1088_v25  ;;  %vm1099_vm5 = vweird.f32 %v3808_v32 }
 0x29b   : > { %3809 = vrsqrt.f32 %v1091_v33  ;;  %vm1100_vm8 = vmor %vm1098_vm6, %vm1099_vm5  ;;  %vm1108_vm9 = vweird.f32 %v1089_v34  ;;  %vm1128_vm11 = vweird.f32 %v1091_v33 }
 0x29c   : > { %v1094_v37 = vmul.f32 %v3808_v32, %v1093_v35  ;;  %3811 = vrsqrt.f32 %v1089_v34 }
 0x29d   : > { %3813 = vrsqrt.f32 %v1090_v36 }
 0x29e   : > { %v1095_v38 = vmul.f32 0.5, %v1094_v37 }
 0x2a0   : > { %v1096_v41 = vsub.f32 1.5, %v1095_v38 }
 0x2a1   : > { %v3810_v39 = vpop.eup %3809 }
 0x2a2   : > { %v3812_v40 = vpop.eup %3811  ;;  %v1123_v44 = vmul.f32 %v3810_v39, %v1091_v33  ;;  %v1097_v46 = vmul.f32 %v3808_v32, %v1096_v41  ;;  %vm1129_vm12 = vweird.f32 %v3810_v39 }
 0x2a3   : > { %v1103_v42 = vmul.f32 %v3812_v40, %v1089_v34  ;;  %v3814_v43 = vpop.eup %3813  ;;  %vm1109_vm7 = vweird.f32 %v3812_v40  ;;  %vm1130_vm15 = vmor %vm1128_vm11, %vm1129_vm12  ;;  %vm1630_vm11 = vcmask 523520   ;;  %vm1775_vm12 = vcmask 785920  }
 0x2a4   : > { %v1113_v47 = vmul.f32 %v3814_v43, %v1090_v36  ;;  %v1124_v49 = vmul.f32 %v3810_v39, %v1123_v44  ;;  %v1101_v53 = vsel %vm1100_vm8, %v3808_v32, %v1097_v46  ;;  %vm1110_vm10 = vmor %vm1108_vm9, %vm1109_vm7  ;;  %vm1119_vm14 = vweird.f32 %v3814_v43 }
 0x2a5   : > { %v1104_v45 = vmul.f32 %v3812_v40, %v1103_v42  ;;  %v1132_v56 = vmul.f32 %v1101_v53, %v4247_v63  ;;  %vm1120_vm0 = vmor %vm1118_vm13, %vm1119_vm14  ;;  %vm1920_vm13 = vcmask 1048320  }
 0x2a6   : > { %v1114_v51 = vmul.f32 %v3814_v43, %v1113_v47  ;;  %v1125_v54 = vmul.f32 0.5, %v1124_v49 }
 0x2a7   : > { %v1105_v48 = vmul.f32 0.5, %v1104_v45 }
 0x2a8   : > { %v1115_v59 = vmul.f32 0.5, %v1114_v51  ;;  %v1126_v61 = vsub.f32 1.5, %v1125_v54 }
 0x2a9   : > { %v1106_v50 = vsub.f32 1.5, %v1105_v48 }
 0x2aa   : > { %v1116_v0 = vsub.f32 1.5, %v1115_v59  ;;  %v1127_v1 = vmul.f32 %v3810_v39, %v1126_v61 }
 0x2ab   : > { %v1107_v52 = vmul.f32 %v3812_v40, %v1106_v50 }
 0x2ac   : > { %v1117_v2 = vmul.f32 %v3814_v43, %v1116_v0  ;;  %v1131_v3 = vsel %vm1130_vm15, %v3810_v39, %v1127_v1 }
 0x2ad   : > { %v1111_v55 = vsel %vm1110_vm10, %v3812_v40, %v1107_v52 }
 0x2ae   : > { %v1133_v58 = vmul.f32 %v1111_v55, %v4257_v7  ;;  %v1121_v63 = vsel %vm1120_vm0, %v3814_v43, %v1117_v2  ;;  %v1135_v7 = vmul.f32 %v1131_v3, %v4255_v6 }
 0x2af   : > { %v1134_v4 = vmul.f32 %v1121_v63, %v4245_v62 }
 0x2b0   : > { %v1136_v60 = vpack.c.bf16 %v1133_v58, %v1132_v56  ;;  %v1023_v58 = vlaneseq }
 0x2b1   : > { %v1137_v5 = vpack.c.bf16 %v1135_v7, %v1134_v4 }
 0x2b2   : > { %1314 = vmatmul.bf16.vlgmr.msra.gmra.mxu0 %v1136_v60  ;;  %1333 = vmatmul.bf16.vlgmr.msra.gmra.mxu1 %v1136_v60  ;;  %v1029_v61 = vand.u32 127, %v1023_v58 }
 0x2b3   : > { %1352 = vmatmul.bf16.vlgmr.msra.gmra.mxu2 %v1136_v60  ;;  %v4352_v60 = vshrl.u32 %v1023_v58, 7 }
 0x2b4   : > { %v1034_v1 = vshra.s32 %v1029_v61, 3  ;;  %v1039_v2 = vand.u32 7, %v1029_v61 }
 0x2b5   : > { %v1030_v0 = vshra.s32 %v4352_v60, 3  ;;  %v4361_v7 = vadd.s32 8, %v4352_v60 }
 0x2b6   : > { %vm4356_vm3 = vcmp.lt.s32.totalorder %v1039_v2, 5 }
 0x2b7   : > { %vm1035_vm2 = vcmp.eq.s32.totalorder %v1030_v0, %v1034_v1  ;;  %v1031_v4 = vshra.s32 %v4361_v7, 3 }
 0x2b8   : > { %vm1041_vm4 = vmand %vm1035_vm2, %vm4356_vm3 }
 0x2b9   : > { %vm1036_vm5 = vcmp.eq.s32.totalorder %v1031_v4, %v1034_v1 }
 0x2ba   : > { %vm1042_vm6 = vmand %vm1036_vm5, %vm4356_vm3 }
 0x2c2   : > { %1319 = vmatmul.bf16.gmra.mxu0 %v1137_v5  ;;  %1338 = vmatmul.bf16.gmra.mxu1 %v1137_v5 }
 0x2c3   : > { %1357 = vmatmul.bf16.gmra.mxu2 %v1137_v5 }
 0x32f   : > { %v1315_v8 = vpop.f32.mrf.mxu0  ;;  %v1334_v9 = vpop.f32.mrf.mxu1 }
 0x330   : > { %v1316_v16 = vadd.f32 %v1315_v8, %v1172_v11  ;;  %v1335_v17 = vadd.f32 %v1334_v9, %v1173_v12  ;;  %v3954_v8 = vmov -1e+30  }
 0x331   : > { %v4366_v9 = vsel %vm1041_vm4, 0.0, %v3954_v8 }
 0x336   : > { %v1353_v13 = vpop.f32.mrf.mxu2 }
 0x337   : > { %v1317_v14 = vpop.f32.mrf.mxu0  ;;  %v1336_v15 = vpop.f32.mrf.mxu1  ;;  %v1354_v40 = vadd.f32 %v1353_v13, %v1174_v30 }
 0x338   : > { %v1318_v18 = vadd.f32 %v1317_v14, %v1172_v11  ;;  %v1337_v19 = vadd.f32 %v1336_v15, %v1173_v12 }
 0x33a   : > { %v1363_v20 = vpack.c.bf16 %v1318_v18, %v1316_v16  ;;  %v1365_v6 = vpack.c.bf16 %v1337_v19, %v1335_v17  ;;  %v4376_v17 = vsel %vm1042_vm6, 0.0, %v3954_v8  ;;  %v1027_v19 = vadd.s32 24, %v4352_v60 }
 0x33c   : > { %1492 = vrot.lane.b32.xlu0 %v1365_v6, %s3951_s19  ;;  %1486 = vrot.lane.b32.xlu1 %v1363_v20, %s3951_s19  ;;  %v1377_v39 = vsel %vm1369_vm1, %v1365_v6, 0 }
 0x33e   : > { %v1355_v62 = vpop.f32.mrf.mxu2 }
 0x33f   : > { %v1339_v21 = vpop.f32.mrf.mxu1  ;;  %v1320_v22 = vpop.f32.mrf.mxu0  ;;  %v1356_v37 = vadd.f32 %v1355_v62, %v1174_v30  ;;  %v1033_v62 = vshra.s32 %v1027_v19, 3 }
 0x340   : > { %v1340_v25 = vadd.f32 %v1339_v21, %v1173_v12  ;;  %v1321_v33 = vadd.f32 %v1320_v22, %v1172_v11 }
 0x341   : > { %v4334_v41 = vpack.c.bf16 %v1356_v37, %v1354_v40  ;;  %vm1038_vm9 = vcmp.eq.s32.totalorder %v1033_v62, %v1034_v1 }
 0x342   : > { %vm1044_vm10 = vmand %vm1038_vm9, %vm4356_vm3 }
 0x344   : > { %1639 = vrot.lane.b32.xlu0 %v1365_v6, %s3952_s25 }
 0x346   : > { %v1358_v23 = vpop.f32.mrf.mxu2 }
 0x347   : > { %v1341_v24 = vpop.f32.mrf.mxu1  ;;  %v1322_v28 = vpop.f32.mrf.mxu0  ;;  %v1359_v35 = vadd.f32 %v1358_v23, %v1174_v30 }
 0x348   : > { %v1342_v26 = vadd.f32 %v1341_v24, %v1173_v12  ;;  %v1323_v31 = vadd.f32 %v1322_v28, %v1172_v11  ;;  %v1026_v11 = vadd.s32 16, %v4352_v60 }
 0x34a   : > { %v1366_v27 = vpack.c.bf16 %v1342_v26, %v1340_v25  ;;  %v1364_v36 = vpack.c.bf16 %v1323_v31, %v1321_v33  ;;  %v1032_v14 = vshra.s32 %v1026_v11, 3 }
 0x34c   : > { %1635 = vrot.lane.b32.xlu0 %v1363_v20, %s3952_s25  ;;  %1786 = vrot.lane.b32.xlu1 %v1366_v27, %s3953_s23  ;;  %v1380_v29 = vsel %vm1369_vm1, %v1366_v27, 0  ;;  %vm1037_vm7 = vcmp.eq.s32.totalorder %v1032_v14, %v1034_v1 }
 0x34d   : > { %1494 = vrot.lane.b32.xlu2 %v1366_v27, %s3951_s19  ;;  %1388 = vmatpush.bf16.xpose.msra.mxu3 %v1380_v29  ;;  %vm1043_vm8 = vmand %vm1037_vm7, %vm4356_vm3 }
 0x34e   : > { %v1360_v32 = vpop.f32.mrf.mxu2  ;;  %v4384_v22 = vsel %vm1043_vm8, 0.0, %v3954_v8 }
 0x34f   : > { %v1361_v34 = vadd.f32 %v1360_v32, %v1174_v30 }
 0x351   : > { %v4327_v38 = vpack.c.bf16 %v1361_v34, %v1359_v35 }
 0x354   : > { %1780 = vrot.lane.b32.xlu1 %v1363_v20, %s3953_s23  ;;  %1637 = vrot.lane.b32.xlu0 %v1364_v36, %s3952_s25 }
 0x355   : > { %1641 = vrot.lane.b32.xlu2 %v1366_v27, %s3952_s25  ;;  %1389 = vmatpush.bf16.xpose.msra.mxu3 %v1377_v39  ;;  %v4390_v27 = vsel %vm1044_vm10, 0.0, %v3954_v8 }
 0x35c   : > { %3319 = vmatmul.msk.bf16.vlgmr.msra.gmra.mxu3 %vm1369_vm1, %v1363_v20 }
 0x35d   : > { %1467 = vmatpush.bf16.msrb.mxu3 %v4327_v38  ;;  %1488 = vrot.lane.b32.xlu2 %v1364_v36, %s3951_s19 }
 0x361   : > { %1468 = vmatpush.bf16.msrb.mxu3 %v4334_v41 }
 0x365   : > { %1784 = vrot.lane.b32.xlu2 %v1365_v6, %s3953_s23 }
 0x36c   : > { %3320 = vmatmul.msk.bf16.gmra.mxu3 %vm1369_vm1, %v1364_v36 }
 0x36d   : > { %1782 = vrot.lane.b32.xlu2 %v1364_v36, %s3953_s23 }
 0x3a7   : > { %v1495_v42 = vpop.permute.xlu2 %1494 }
 0x3a8   : > { %v1506_v43 = vsel %vm1369_vm1, %v1495_v42, 0 }
 0x3a9   : > { %1514 = vmatpush.bf16.xpose.msrb.mxu0 %v1506_v43 }
 0x3ae   : > { %v1493_v44 = vpop.permute.xlu0 %1492  ;;  %v1487_v48 = vpop.permute.xlu1 %1486 }
 0x3af   : > { %v1642_v45 = vpop.permute.xlu2 %1641  ;;  %v1503_v46 = vsel %vm1369_vm1, %v1493_v44, 0 }
 0x3b0   : > { %v1653_v47 = vsel %vm1369_vm1, %v1642_v45, 0 }
 0x3b1   : > { %1515 = vmatpush.bf16.xpose.msrb.mxu0 %v1503_v46  ;;  %1661 = vmatpush.bf16.xpose.msrb.mxu2 %v1653_v47 }
 0x3b6   : > { %v1640_v49 = vpop.permute.xlu0 %1639 }
 0x3b7   : > { %v1650_v50 = vsel %vm1369_vm1, %v1640_v49, 0  ;;  %v1489_v51 = vpop.permute.xlu2 %1488 }
 0x3b8   : > { %3323 = vmatmul.msk.bf16.vlgmr.msrb.gmra.mxu0 %vm1369_vm1, %v1487_v48 }
 0x3b9   : > { %1662 = vmatpush.bf16.xpose.msrb.mxu2 %v1650_v50 }
 0x3be   : > { %v1787_v52 = vpop.permute.xlu1 %1786  ;;  %v1636_v53 = vpop.permute.xlu0 %1635 }
 0x3bf   : > { %v1798_v54 = vsel %vm1369_vm1, %v1787_v52, 0  ;;  %v1785_v55 = vpop.permute.xlu2 %1784 }
 0x3c0   : > { %3327 = vmatmul.msk.bf16.vlgmr.msrb.gmra.mxu2 %vm1369_vm1, %v1636_v53  ;;  %1806 = vmatpush.bf16.xpose.msra.mxu0 %v1798_v54  ;;  %v1795_v56 = vsel %vm1369_vm1, %v1785_v55, 0 }
 0x3c6   : > { %v1638_v59 = vpop.permute.xlu0 %1637  ;;  %v1781_v3 = vpop.permute.xlu1 %1780 }
 0x3c7   : > { %v1783_v15 = vpop.permute.xlu2 %1782 }
 0x3c8   : > { %3324 = vmatmul.msk.bf16.gmra.mxu0 %vm1369_vm1, %v1489_v51 }
 0x3c9   : > { %1807 = vmatpush.bf16.xpose.msra.mxu0 %v1795_v56 }
 0x3d0   : > { %3328 = vmatmul.msk.bf16.gmra.mxu2 %vm1369_vm1, %v1638_v59 }
 0x3d8   : > { %3331 = vmatmul.msk.bf16.vlgmr.msra.gmra.mxu0 %vm1369_vm1, %v1781_v3 }
 0x3df   : > { %v1391_v5 = vpop.f32.mrf.mxu3 }
 0x3e0   : > { %v1401_v10 = vmul.f32 0.17677669, %v1391_v5 }
 0x3e2   : > { %v4370_v12 = vadd.f32 %v1401_v10, %v4366_v9 }
 0x3e4   : > { %v1409_v13 = vsel %vm1369_vm1, %v4370_v12, -inf }
 0x3e5   : > { %1410 = vmax.xlane.f32.xlu1 %v1409_v13 }
 0x3e7   : > { %v1393_v16 = vpop.f32.mrf.mxu3 }
 0x3e8   : > { %v1402_v18 = vmul.f32 0.17677669, %v1393_v16  ;;  %3332 = vmatmul.msk.bf16.gmra.mxu0 %vm1369_vm1, %v1783_v15 }
 0x3ea   : > { %v1406_v20 = vadd.f32 %v1402_v18, %v4376_v17 }
 0x3ec   : > { %v1412_v6 = vsel %vm1369_vm1, %v1406_v20, -inf }
 0x3ed   : > { %1413 = vmax.xlane.f32.xlu0 %v1412_v6 }
 0x3ef   : > { %v1396_v21 = vpop.f32.mrf.mxu3 }
 0x3f0   : > { %v1403_v23 = vmul.f32 0.17677669, %v1396_v21 }
 0x3f2   : > { %v1407_v24 = vadd.f32 %v1403_v23, %v4384_v22 }
 0x3f4   : > { %v1415_v25 = vsel %vm1369_vm1, %v1407_v24, -inf }
 0x3f5   : > { %1416 = vmax.xlane.f32.xlu0 %v1415_v25 }
 0x3f7   : > { %v1398_v26 = vpop.f32.mrf.mxu3 }
 0x3f8   : > { %v1404_v28 = vmul.f32 0.17677669, %v1398_v26 }
 0x3fa   : > { %v4393_v29 = vadd.f32 %v1404_v28, %v4390_v27 }
 0x3fc   : > { %v1418_v30 = vsel %vm1369_vm1, %v4393_v29, -inf }
 0x3fd   : > { %1419 = vmax.xlane.f32.xlu2 %v1418_v30 }
 0x3fe   : > { %1583 = vrot.lane.b32.xlu1 %v4334_v41, %s3951_s19 }
 0x435   : > { %v1517_v31 = vpop.f32.mrf.mxu0 }
 0x436   : > { %v1527_v32 = vmul.f32 0.17677669, %v1517_v31 }
 0x438   : > { %v4400_v33 = vadd.f32 %v1527_v32, %v4366_v9 }
 0x43a   : > { %v1535_v34 = vsel %vm1369_vm1, %v4400_v33, -inf }
 0x43b   : > { %1536 = vmax.xlane.f32.xlu2 %v1535_v34 }
 0x43d   : > { %v1519_v35 = vpop.f32.mrf.mxu0 }
 0x43e   : > { %v1528_v36 = vmul.f32 0.17677669, %v1519_v35 }
 0x440   : > { %v4405_v37 = vadd.f32 %v1528_v36, %v4376_v17 }
 0x442   : > { %v1538_v39 = vsel %vm1369_vm1, %v4405_v37, -inf }
 0x443   : > { %1539 = vmax.xlane.f32.xlu1 %v1538_v39  ;;  %v1664_v40 = vpop.f32.mrf.mxu2 }
 0x444   : > { %v1674_v23 = vmul.f32 0.17677669, %v1664_v40 }
 0x445   : > { %v1522_v42 = vpop.f32.mrf.mxu0 }
 0x446   : > { %v1529_v48 = vmul.f32 0.17677669, %v1522_v42  ;;  %v4452_v28 = vadd.f32 %v1674_v23, %v4366_v9 }
 0x448   : > { %v4422_v53 = vadd.f32 %v1529_v48, %v4384_v22 }
 0x44a   : > { %v1541_v55 = vsel %vm1369_vm1, %v4422_v53, -inf }
 0x44b   : > { %v1666_v43 = vpop.f32.mrf.mxu2 }
 0x44c   : > { %v1675_v44 = vmul.f32 0.17677669, %v1666_v43 }
 0x44d   : > { %v1524_v45 = vpop.f32.mrf.mxu0 }
 0x44e   : > { %v1530_v46 = vmul.f32 0.17677669, %v1524_v45  ;;  %v4410_v47 = vadd.f32 %v1675_v44, %v4376_v17 }
 0x450   : > { %v1685_v49 = vsel %vm1369_vm1, %v4410_v47, -inf  ;;  %v4415_v50 = vadd.f32 %v1530_v46, %v4390_v27 }
 0x451   : > { %1686 = vmax.xlane.f32.xlu1 %v1685_v49 }
 0x452   : > { %v1544_v51 = vsel %vm1369_vm1, %v4415_v50, -inf }
 0x453   : > { %1585 = vrot.lane.b32.xlu2 %v4327_v38, %s3951_s19  ;;  %1545 = vmax.xlane.f32.xlu0 %v1544_v51  ;;  %v1669_v52 = vpop.f32.mrf.mxu2 }
 0x454   : > { %v1676_v54 = vmul.f32 0.17677669, %v1669_v52 }
 0x455   : > { %v1809_v61 = vpop.f32.mrf.mxu0 }
 0x456   : > { %v4427_v59 = vadd.f32 %v1676_v54, %v4384_v22  ;;  %v1819_v1 = vmul.f32 0.17677669, %v1809_v61 }
 0x458   : > { %v1688_v2 = vsel %vm1369_vm1, %v4427_v59, -inf  ;;  %v4437_v8 = vadd.f32 %v1819_v1, %v4366_v9  ;;  %v1411_v18 = vpop.xlane.xlu1 %1410 }
 0x459   : > { %1542 = vmax.xlane.f32.xlu1 %v1541_v55  ;;  %v1421_v62 = vsub.f32 %v4370_v12, %v1411_v18  ;;  %v1682_v12 = vsel %vm1369_vm1, %v4452_v28, -inf }
 0x45a   : > { %v1827_v10 = vsel %vm1369_vm1, %v4437_v8, -inf }
 0x45b   : > { %v1671_v56 = vpop.f32.mrf.mxu2  ;;  %v1425_v26 = vmul.f32 1.442695, %v1421_v62 }
 0x45c   : > { %v1677_v58 = vmul.f32 0.17677669, %v1671_v56 }
 0x45d   : > { %v1811_v19 = vpop.f32.mrf.mxu0 }
 0x45e   : > { %v4430_v0 = vadd.f32 %v1677_v58, %v4390_v27  ;;  %v1820_v9 = vmul.f32 0.17677669, %v1811_v19 }
 0x460   : > { %v1691_v3 = vsel %vm1369_vm1, %v4430_v0, -inf  ;;  %v1414_v63 = vpop.xlane.xlu0 %1413  ;;  %v4470_v40 = vadd.f32 %v1820_v9, %v4376_v17 }
 0x461   : > { %1689 = vmax.xlane.f32.xlu1 %v1688_v2  ;;  %1692 = vmax.xlane.f32.xlu0 %v1691_v3  ;;  %v1422_v4 = vsub.f32 %v1406_v20, %v1414_v63 }
 0x462   : > { %v1830_v44 = vsel %vm1369_vm1, %v4470_v40, -inf }
 0x463   : > { %v1427_v5 = vmul.f32 1.442695, %v1422_v4 }
 0x465   : > { %3815 = vpow2.f32 %v1427_v5  ;;  %v1814_v30 = vpop.f32.mrf.mxu0 }
 0x468   : > { %v1417_v11 = vpop.xlane.xlu0 %1416 }
 0x469   : > { %1828 = vmax.xlane.f32.xlu0 %v1827_v10  ;;  %v1423_v13 = vsub.f32 %v1407_v24, %v1417_v11 }
 0x46b   : > { %v4441_v14 = vpop.eup %3815  ;;  %v1429_v15 = vmul.f32 1.442695, %v1423_v13 }
 0x46c   : > { %v1436_v16 = vsel %vm1369_vm1, %v4441_v14, 0.0 }
 0x46d   : > { %3817 = vpow2.f32 %v1429_v15  ;;  %1437 = vadd.xlane.f32.xlu1 %v1436_v16  ;;  %v1816_v42 = vpop.f32.mrf.mxu0 }
 0x46e   : > { %v1822_v43 = vmul.f32 0.17677669, %v1816_v42 }
 0x470   : > { %v1420_v20 = vpop.xlane.xlu2 %1419  ;;  %v1584_v46 = vpop.permute.xlu1 %1583 }
 0x471   : > { %v1424_v6 = vsub.f32 %v4393_v29, %v1420_v20  ;;  %v1821_v29 = vmul.f32 0.17677669, %v1814_v30 }
 0x473   : > { %v4447_v21 = vpop.eup %3817  ;;  %v1431_v25 = vmul.f32 1.442695, %v1424_v6  ;;  %v4463_v35 = vadd.f32 %v1821_v29, %v4384_v22  ;;  %v4475_v22 = vadd.f32 %v1822_v43, %v4390_v27 }
 0x474   : > { %v1439_v24 = vsel %vm1369_vm1, %v4447_v21, 0.0 }
 0x475   : > { %3819 = vpow2.f32 %v1431_v25  ;;  %1440 = vadd.xlane.f32.xlu1 %v1439_v24  ;;  %v1833_v39 = vsel %vm1369_vm1, %v4463_v35, -inf  ;;  %v1836_v45 = vsel %vm1369_vm1, %v4475_v22, -inf }
 0x476   : > { %3821 = vpow2.f32 %v1425_v26 }
 0x47b   : > { %v4454_v31 = vpop.eup %3819 }
 0x47c   : > { %1683 = vmax.xlane.f32.xlu2 %v1682_v12  ;;  %v1442_v32 = vsel %vm1369_vm1, %v4454_v31, 0.0  ;;  %v4460_v34 = vpop.eup %3821 }
 0x47d   : > { %1443 = vadd.xlane.f32.xlu0 %v1442_v32  ;;  %v1433_v36 = vsel %vm1369_vm1, %v4460_v34, 0.0 }
 0x484   : > { %1434 = vadd.xlane.f32.xlu2 %v1433_v36 }
 0x485   : > { %1834 = vmax.xlane.f32.xlu0 %v1833_v39 }
 0x48c   : > { %1831 = vmax.xlane.f32.xlu2 %v1830_v44 }
 0x494   : > { %1837 = vmax.xlane.f32.xlu2 %v1836_v45 }
 0x499   : > { %1728 = vrot.lane.b32.xlu0 %v4334_v41, %s3952_s25 }
 0x4ae   : > { %v1537_v48 = vpop.xlane.xlu2 %1536 }
 0x4af   : > { %v1547_v17 = vsub.f32 %v4400_v33, %v1537_v48 }
 0x4b1   : > { %v1551_v49 = vmul.f32 1.442695, %v1547_v17 }
 0x4b3   : > { %3823 = vpow2.f32 %v1551_v49 }
 0x4b6   : > { %v1586_v51 = vpop.permute.xlu2 %1585  ;;  %v1540_v52 = vpop.xlane.xlu1 %1539 }
 0x4b7   : > { %v1548_v54 = vsub.f32 %v4405_v37, %v1540_v52  ;;  %1601 = vmatpush.bf16.msrb.mxu1 %v1586_v51 }
 0x4b9   : > { %v4483_v27 = vpop.eup %3823  ;;  %v1553_v55 = vmul.f32 1.442695, %v1548_v54 }
 0x4ba   : > { %v1559_v56 = vsel %vm1369_vm1, %v4483_v27, 0.0 }
 0x4bb   : > { %3825 = vpow2.f32 %v1553_v55  ;;  %1602 = vmatpush.bf16.msrb.mxu1 %v1584_v46  ;;  %1560 = vadd.xlane.f32.xlu1 %v1559_v56 }
 0x4c1   : > { %v4487_v58 = vpop.eup %3825 }
 0x4c2   : > { %v1562_v33 = vsel %vm1369_vm1, %v4487_v58, 0.0 }
 0x4c3   : > { %1563 = vadd.xlane.f32.xlu0 %v1562_v33 }
 0x4c4   : > { %v1687_v61 = vpop.xlane.xlu1 %1686 }
 0x4c5   : > { %v1695_v1 = vsub.f32 %v4410_v47, %v1687_v61 }
 0x4c6   : > { %v1546_v2 = vpop.xlane.xlu0 %1545 }
 0x4c7   : > { %v1700_v37 = vmul.f32 1.442695, %v1695_v1  ;;  %v1550_v5 = vsub.f32 %v4415_v50, %v1546_v2 }
 0x4c9   : > { %3827 = vpow2.f32 %v1700_v37  ;;  %v1557_v13 = vmul.f32 1.442695, %v1550_v5 }
 0x4cc   : > { %v1543_v3 = vpop.xlane.xlu1 %1542 }
 0x4cd   : > { %v1549_v63 = vsub.f32 %v4422_v53, %v1543_v3 }
 0x4cf   : > { %v4493_v4 = vpop.eup %3827  ;;  %v1555_v10 = vmul.f32 1.442695, %v1549_v63 }
 0x4d0   : > { %v1709_v11 = vsel %vm1369_vm1, %v4493_v4, 0.0 }
 0x4d1   : > { %3829 = vpow2.f32 %v1555_v10  ;;  %1710 = vadd.xlane.f32.xlu0 %v1709_v11 }
 0x4d2   : > { %3831 = vpow2.f32 %v1557_v13 }
 0x4d4   : > { %1730 = vrot.lane.b32.xlu1 %v4327_v38, %s3952_s25  ;;  %v4500_v47 = vpop.xlane.xlu0 %1692  ;;  %v1690_v23 = vpop.xlane.xlu1 %1689 }
 0x4d5   : > { %v1696_v26 = vsub.f32 %v4427_v59, %v1690_v23 }
 0x4d7   : > { %v4502_v15 = vpop.eup %3829  ;;  %v1702_v29 = vmul.f32 1.442695, %v1696_v26 }
 0x4d8   : > { %v1565_v53 = vsel %vm1369_vm1, %v4502_v15, 0.0  ;;  %v4506_v16 = vpop.eup %3831 }
 0x4d9   : > { %1566 = vadd.xlane.f32.xlu0 %v1565_v53  ;;  %v1568_v20 = vsel %vm1369_vm1, %v4506_v16, 0.0 }
 0x4dc   : > { %v1829_v50 = vpop.xlane.xlu0 %1828 }
 0x4dd   : > { %v1839_v18 = vsub.f32 %v4437_v8, %v1829_v50 }
 0x4df   : > { %v1843_v19 = vmul.f32 1.442695, %v1839_v18 }
 0x4e0   : > { %v1438_v8 = vpop.xlane.xlu1 %1437 }
 0x4e1   : > { %3833 = vpow2.f32 %v1843_v19  ;;  %1569 = vadd.xlane.f32.xlu0 %v1568_v20 }
 0x4e7   : > { %v4511_v6 = vpop.eup %3833 }
 0x4e8   : > { %v1851_v62 = vsel %vm1369_vm1, %v4511_v6, 0.0  ;;  %v1441_v51 = vpop.xlane.xlu1 %1440 }
 0x4e9   : > { %1852 = vadd.xlane.f32.xlu0 %v1851_v62 }
 0x4ef   : > { %v1684_v25 = vpop.xlane.xlu2 %1683 }
 0x4f0   : > { %v1694_v24 = vsub.f32 %v4452_v28, %v1684_v25  ;;  %v1444_v12 = vpop.xlane.xlu0 %1443 }
 0x4f2   : > { %v1698_v30 = vmul.f32 1.442695, %v1694_v24 }
 0x4f4   : > { %3835 = vpow2.f32 %v1698_v30 }
 0x4f5   : > { %3837 = vrcp.f32 %v1438_v8 }
 0x4f7   : > { %v1435_v32 = vpop.xlane.xlu2 %1434 }
 0x4f8   : > { %3839 = vrcp.f32 %v1435_v32  ;;  %v1835_v43 = vpop.xlane.xlu0 %1834 }
 0x4f9   : > { %3841 = vpow2.f32 %v1702_v29  ;;  %v1841_v17 = vsub.f32 %v4463_v35, %v1835_v43 }
 0x4fa   : > { %v4517_v9 = vpop.eup %3835  ;;  %3843 = vrcp.f32 %v1444_v12 }
 0x4fb   : > { %v1706_v36 = vsel %vm1369_vm1, %v4517_v9, 0.0  ;;  %v3838_v39 = vpop.eup %3837 }
 0x4fc   : > { %1707 = vadd.xlane.f32.xlu2 %v1706_v36  ;;  %v1450_v28 = vmul.f32 %v3838_v39, %v4441_v14  ;;  %v1847_v14 = vmul.f32 1.442695, %v1841_v17 }
 0x4fd   : > { %1875 = vrot.lane.b32.xlu0 %v4327_v38, %s3953_s23 }
 0x4fe   : > { %v3840_v59 = vpop.eup %3839 }
 0x4ff   : > { %v1449_v42 = vmul.f32 %v3840_v59, %v4460_v34  ;;  %v1832_v44 = vpop.xlane.xlu2 %1831  ;;  %v4525_v45 = vpop.eup %3841 }
 0x500   : > { %v1840_v46 = vsub.f32 %v4470_v40, %v1832_v44  ;;  %v1712_v38 = vsel %vm1369_vm1, %v4525_v45, 0.0  ;;  %v3844_v52 = vpop.eup %3843 }
 0x501   : > { %v1453_v48 = vpack.c.bf16 %v1450_v28, %v1449_v42  ;;  %v1452_v56 = vmul.f32 %v3844_v52, %v4454_v31 }
 0x502   : > { %v1845_v49 = vmul.f32 1.442695, %v1840_v46 }
 0x503   : > { %3321 = vmatmul.msk.bf16.vlgmr.msrb.gmra.mxu3 %vm1369_vm1, %v1453_v48 }
 0x504   : > { %3845 = vpow2.f32 %v1845_v49  ;;  %1713 = vadd.xlane.f32.xlu2 %v1712_v38 }
 0x505   : > { %3847 = vrcp.f32 %v1441_v51 }
 0x506   : > { %3849 = vpow2.f32 %v1847_v14 }
 0x507   : > { %v1838_v34 = vpop.xlane.xlu2 %1837 }
 0x508   : > { %v1842_v40 = vsub.f32 %v4475_v22, %v1838_v34  ;;  %v1697_v22 = vsub.f32 %v4430_v0, %v4500_v47 }
 0x50a   : > { %v4532_v54 = vpop.eup %3845  ;;  %v1849_v33 = vmul.f32 1.442695, %v1842_v40  ;;  %v1704_v63 = vmul.f32 1.442695, %v1697_v22 }
 0x50b   : > { %v1854_v35 = vsel %vm1369_vm1, %v4532_v54, 0.0  ;;  %v3848_v55 = vpop.eup %3847  ;;  %v1729_v10 = vpop.permute.xlu0 %1728 }
 0x50c   : > { %1855 = vadd.xlane.f32.xlu1 %v1854_v35  ;;  %v1451_v61 = vmul.f32 %v3848_v55, %v4447_v21  ;;  %v4539_v1 = vpop.eup %3849  ;;  %3851 = vpow2.f32 %v1849_v33 }
 0x50d   : > { %v1857_v2 = vsel %vm1369_vm1, %v4539_v1, 0.0  ;;  %3853 = vpow2.f32 %v1704_v63 }
 0x50e   : > { %v1454_v37 = vpack.c.bf16 %v1452_v56, %v1451_v61 }
 0x512   : > { %v4546_v3 = vpop.eup %3851 }
 0x513   : > { %3322 = vmatmul.msk.bf16.gmra.mxu3 %vm1369_vm1, %v1454_v37  ;;  %v1860_v31 = vsel %vm1369_vm1, %v4546_v3, 0.0  ;;  %v4552_v21 = vpop.eup %3853 }
 0x514   : > { %1858 = vadd.xlane.f32.xlu1 %v1857_v2  ;;  %v1715_v5 = vsel %vm1369_vm1, %v4552_v21, 0.0 }
 0x51c   : > { %1873 = vrot.lane.b32.xlu2 %v4334_v41, %s3953_s23  ;;  %1861 = vadd.xlane.f32.xlu1 %v1860_v31 }
 0x527   : > { %1716 = vadd.xlane.f32.xlu0 %v1715_v5 }
 0x52e   : > { %v1561_v11 = vpop.xlane.xlu1 %1560 }
 0x52f   : > { %3855 = vrcp.f32 %v1561_v11 }
 0x535   : > { %v3856_v13 = vpop.eup %3855 }
 0x536   : > { %v1564_v0 = vpop.xlane.xlu0 %1563  ;;  %v1575_v53 = vmul.f32 %v3856_v13, %v4483_v27  ;;  %v3706_v13 = vld [vmem:[%s4047_s16 + $0x38] sm:$0xff] }
 0x537   : > { %3857 = vrcp.f32 %v1564_v0  ;;  %1999 = vmatpush.bf16.msra.mxu2 %v3706_v13  ;;  %v3483_v13 = vld [vmem:[%s4067_s29 + $0xf0] sm:$0xf0] }
 0x53d   : > { %v3858_v47 = vpop.eup %3857 }
 0x53e   : > { %v1576_v50 = vmul.f32 %v3858_v47, %v4487_v58  ;;  %v3705_v47 = vld [vmem:[%s4047_s16 + $0x30] sm:$0xff] }
 0x53f   : > { %2000 = vmatpush.bf16.msra.mxu2 %v3705_v47  ;;  %v3489_v47 = vld [vmem:[%s4067_s29 + $0xe8] sm:$0xf] }
 0x540   : > { %v1579_v41 = vpack.c.bf16 %v1576_v50, %v1575_v53  ;;  %v3704_v53 = vld [vmem:[%s4047_s16 + $0x28] sm:$0xff]  ;;  %v3703_v50 = vld [vmem:[%s4047_s16 + $0x20] sm:$0xff] }
 0x542   : > { %3325 = vmatmul.msk.bf16.vlgmr.msrb.gmra.mxu1 %vm1369_vm1, %v1579_v41 }
 0x543   : > { %2001 = vmatpush.bf16.msra.mxu2 %v3704_v53  ;;  %v3738_v53 = vld [vmem:[%s4067_s29 + $0xf4] sm:$0xf0] }
 0x544   : > { %v1711_v18 = vpop.xlane.xlu0 %1710 }
 0x546   : > { %v1731_v19 = vpop.permute.xlu1 %1730 }
 0x547   : > { %1746 = vmatpush.bf16.msra.mxu3 %v1731_v19  ;;  %2002 = vmatpush.bf16.msra.mxu2 %v3703_v50  ;;  %v3701_v19 = vld [vmem:[%s4047_s16 + $0x10] sm:$0xff] }
 0x54b   : > { %1747 = vmatpush.bf16.msra.mxu3 %v1729_v10 }
 0x54c   : > { %v1567_v20 = vpop.xlane.xlu0 %1566 }
 0x54d   : > { %3859 = vrcp.f32 %v1567_v20 }
 0x553   : > { %v3860_v23 = vpop.eup %3859 }
 0x554   : > { %v1570_v62 = vpop.xlane.xlu0 %1569  ;;  %v1577_v24 = vmul.f32 %v3860_v23, %v4502_v15  ;;  %v3699_v23 = vld [vmem:[%s4047_s16] sm:$0xff] }
 0x555   : > { %3861 = vrcp.f32 %v1570_v62  ;;  %v3700_v62 = vld [vmem:[%s4047_s16 + $0x8] sm:$0xff] }
 0x556   : > { %3863 = vrcp.f32 %v1711_v18  ;;  %v3702_v18 = vld [vmem:[%s4047_s16 + $0x18] sm:$0xff] }
 0x557   : > { %2003 = vmatpush.bf16.msra.mxu2 %v3702_v18  ;;  %v3736_v18 = vld [vmem:[%s4067_s29 + $0xec] sm:$0xf] }
 0x55b   : > { %v3862_v25 = vpop.eup %3861  ;;  %2004 = vmatpush.bf16.msra.mxu2 %v3701_v19  ;;  %v3491_v19 = vld [vmem:[%s4067_s29 + $0xf8] sm:$0xf0] }
 0x55c   : > { %v1578_v26 = vmul.f32 %v3862_v25, %v4506_v16  ;;  %v1853_v58 = vpop.xlane.xlu0 %1852  ;;  %v3864_v12 = vpop.eup %3863 }
 0x55d   : > { %v1723_v32 = vmul.f32 %v3864_v12, %v4493_v4 }
 0x55e   : > { %v1580_v27 = vpack.c.bf16 %v1578_v26, %v1577_v24 }
 0x55f   : > { %2005 = vmatpush.bf16.msra.mxu2 %v3700_v62  ;;  %v3465_v62 = vld [vmem:[%s4067_s29 + $0xc0] sm:$0xf] }
 0x560   : > { %3326 = vmatmul.msk.bf16.gmra.mxu1 %vm1369_vm1, %v1580_v27 }
 0x563   : > { %2006 = vmatpush.bf16.msra.mxu2 %v3699_v23  ;;  %v3733_v23 = vld [vmem:[%s4067_s29 + $0xcc] sm:$0xf0] }
 0x56f   : > { %v1708_v30 = vpop.xlane.xlu2 %1707  ;;  %v1876_v8 = vpop.permute.xlu0 %1875 }
 0x570   : > { %3865 = vrcp.f32 %v1708_v30  ;;  %1891 = vmatpush.bf16.msra.mxu1 %v1876_v8 }
 0x571   : > { %3867 = vrcp.f32 %v1853_v58 }
 0x576   : > { %v3866_v29 = vpop.eup %3865 }
 0x577   : > { %v1722_v36 = vmul.f32 %v3866_v29, %v4517_v9  ;;  %v1714_v39 = vpop.xlane.xlu2 %1713  ;;  %v3868_v28 = vpop.eup %3867 }
 0x578   : > { %v1867_v44 = vmul.f32 %v3868_v28, %v4511_v6 }
 0x579   : > { %v1726_v59 = vpack.c.bf16 %v1723_v32, %v1722_v36 }
 0x57b   : > { %3329 = vmatmul.msk.bf16.vlgmr.msra.gmra.mxu3 %vm1369_vm1, %v1726_v59 }
 0x57f   : > { %v1874_v15 = vpop.permute.xlu2 %1873  ;;  %v1856_v16 = vpop.xlane.xlu1 %1855 }
 0x580   : > { %3869 = vrcp.f32 %v1856_v16  ;;  %1892 = vmatpush.bf16.msra.mxu1 %v1874_v15  ;;  %v3803_v16 = vld [vmem:[%s4906_s2] ss:$0 sm:$0xff] }
 0x586   : > { %v3870_v42 = vpop.eup %3869  ;;  %v1470_v43 = vpop.f32.mrf.mxu3 }
 0x587   : > { %v1868_v46 = vmul.f32 %v3870_v42, %v4532_v54  ;;  %1480 = vst.msk [vmem:[#allocation3] sm:$0xff] %vm1369_vm1, %v1470_v43  ;;  %v1859_v4 = vpop.xlane.xlu1 %1858  ;;  %v3919_v43 = vld [vmem:[#allocation2] sm:$0xff] }
 0x588   : > { %3871 = vrcp.f32 %v1859_v4 }
 0x589   : > { %v1871_v9 = vpack.c.bf16 %v1868_v46, %v1867_v44 }
 0x58b   : > { %3333 = vmatmul.msk.bf16.vlgmr.msra.gmra.mxu1 %vm1369_vm1, %v1871_v9  ;;  %v3920_v9 = vld [vmem:[#allocation2 + $0x8] sm:$0xff] }
 0x58e   : > { %v1472_v48 = vpop.f32.mrf.mxu3  ;;  %v3872_v49 = vpop.eup %3871 }
 0x58f   : > { %1481 = vst.msk [vmem:[#allocation3 + $0x8] sm:$0xff] %vm1369_vm1, %v1472_v48  ;;  %v1862_v17 = vpop.xlane.xlu1 %1861  ;;  %v1869_v6 = vmul.f32 %v3872_v49, %v4539_v1 }
 0x590   : > { %3873 = vrcp.f32 %v1862_v17 }
 0x591   : > { %3875 = vrcp.f32 %v1714_v39 }
 0x596   : > { %v3874_v51 = vpop.eup %3873  ;;  %v1475_v38 = vpop.f32.mrf.mxu3 }
 0x597   : > { %1482 = vst.msk [vmem:[#allocation3 + $0x10] sm:$0xff] %vm1369_vm1, %v1475_v38  ;;  %v1870_v14 = vmul.f32 %v3874_v51, %v4546_v3  ;;  %v3876_v40 = vpop.eup %3875  ;;  %v3921_v51 = vld [vmem:[#allocation2 + $0x10] sm:$0xff] }
 0x598   : > { %v1724_v55 = vmul.f32 %v3876_v40, %v4525_v45 }
 0x599   : > { %v1872_v34 = vpack.c.bf16 %v1870_v14, %v1869_v6 }
 0x59a   : > { %v1717_v52 = vpop.xlane.xlu0 %1716 }
 0x59b   : > { %3877 = vrcp.f32 %v1717_v52  ;;  %3334 = vmatmul.msk.bf16.gmra.mxu1 %vm1369_vm1, %v1872_v34  ;;  %v3922_v34 = vld [vmem:[#allocation2 + $0x18] sm:$0xff] }
 0x59e   : > { %v1477_v54 = vpop.f32.mrf.mxu3 }
 0x59f   : > { %1483 = vst.msk [vmem:[#allocation3 + $0x18] sm:$0xff] %vm1369_vm1, %v1477_v54 }
 0x5a1   : > { %v3878_v35 = vpop.eup %3877 }
 0x5a2   : > { %v1725_v56 = vmul.f32 %v3878_v35, %v4552_v21 }
 0x5a4   : > { %v1727_v33 = vpack.c.bf16 %v1725_v56, %v1724_v55 }
 0x5a6   : > { %3330 = vmatmul.msk.bf16.gmra.mxu3 %vm1369_vm1, %v1727_v33 }
 0x5bf   : > { %v1604_v61 = vpop.f32.mrf.mxu1 }
 0x5c0   : > { %1618 = vrot.lane.b32.xlu2 %v1604_v61, %s3953_s23 }
 0x5c7   : > { %v1606_v1 = vpop.f32.mrf.mxu1 }
 0x5c8   : > { %1620 = vrot.lane.b32.xlu1 %v1606_v1, %s3953_s23 }
 0x5dd   : > { %v1609_v37 = vpop.f32.mrf.mxu1 }
 0x5de   : > { %1622 = vrot.lane.b32.xlu1 %v1609_v37, %s3953_s23 }
 0x5e5   : > { %v1611_v22 = vpop.f32.mrf.mxu1 }
 0x5fe   : > { %v1749_v2 = vpop.f32.mrf.mxu3 }
 0x5ff   : > { %1763 = vrot.lane.b32.xlu2 %v1749_v2, %s3952_s25 }
 0x606   : > { %v1751_v3 = vpop.f32.mrf.mxu3 }
 0x607   : > { %1765 = vrot.lane.b32.xlu2 %v1751_v3, %s3952_s25 }
 0x608   : > { %v1894_v45 = vpop.f32.mrf.mxu1 }
 0x609   : > { %1908 = vrot.lane.b32.xlu0 %v1894_v45, %s3951_s19 }
 0x610   : > { %v1896_v63 = vpop.f32.mrf.mxu1 }
 0x611   : > { %1910 = vrot.lane.b32.xlu2 %v1896_v63, %s3951_s19 }
 0x618   : > { %v1899_v21 = vpop.f32.mrf.mxu1 }
 0x619   : > { %1624 = vrot.lane.b32.xlu2 %v1611_v22, %s3953_s23 }
 0x61a   : > { %v1619_v31 = vpop.permute.xlu2 %1618 }
 0x61b   : > { %1631 = vst.msk [vmem:[#allocation3] sm:$0xff] %vm1630_vm11, %v1619_v31 }
 0x620   : > { %v1901_v10 = vpop.f32.mrf.mxu1 }
 0x621   : > { %1912 = vrot.lane.b32.xlu2 %v1899_v21, %s3951_s19 }
 0x629   : > { %v1754_v5 = vpop.f32.mrf.mxu3 }
 0x62a   : > { %1767 = vrot.lane.b32.xlu1 %v1754_v5, %s3952_s25  ;;  %v3481_v5 = vld [vmem:[%s4067_s29 + $0xe0] sm:$0xf] }
 0x631   : > { %v1756_v11 = vpop.f32.mrf.mxu3 }
 0x632   : > { %1914 = vrot.lane.b32.xlu1 %v1901_v10, %s3951_s19  ;;  %1769 = vrot.lane.b32.xlu0 %v1756_v11, %s3952_s25  ;;  %v3737_v10 = vld [vmem:[%s4067_s29 + $0xec] sm:$0xf0]  ;;  %v3735_v11 = vld [vmem:[%s4067_s29 + $0xe4] sm:$0xf] }
 0x633   : > { %v3486_v50 = vor.u32 %v3735_v11, %v3483_v13  ;;  %v3720_v13 = vld [vmem:[%s4067_s29 + $0x6c] sm:$0xf] }
 0x635   : > { %2325 = vmatpush.bf16.msrb.mxu0 %v3486_v50  ;;  %v3401_v50 = vld [vmem:[%s4067_s29 + $0x40] sm:$0xf] }
 0x63a   : > { %v1621_v0 = vpop.permute.xlu1 %1620 }
 0x63b   : > { %1632 = vst.msk [vmem:[#allocation3 + $0x8] sm:$0xff] %vm1630_vm11, %v1621_v0  ;;  %v3482_v0 = vor.u32 %v3737_v10, %v3481_v5  ;;  %v3425_v5 = vld [vmem:[%s4067_s29 + $0x68] sm:$0xf]  ;;  %v3722_v10 = vld [vmem:[%s4067_s29 + $0x74] sm:$0xf0] }
 0x63d   : > { %2306 = vmatpush.bf16.msrb.mxu3 %v3482_v0  ;;  %v3426_v0 = vor.u32 %v3722_v10, %v3425_v5 }
 0x650   : > { %v1623_v41 = vpop.permute.xlu1 %1622 }
 0x651   : > { %1633 = vst.msk [vmem:[#allocation3 + $0x10] sm:$0xff] %vm1630_vm11, %v1623_v41  ;;  %v3490_v41 = vor.u32 %v3738_v53, %v3489_v47  ;;  %v3427_v47 = vld [vmem:[%s4067_s29 + $0x78] sm:$0xf0] }
 0x652   : > { %v3430_v53 = vor.u32 %v3720_v13, %v3427_v47 }
 0x653   : > { %2344 = vmatpush.bf16.msrb.mxu1 %v3490_v41  ;;  %v3717_v41 = vld [vmem:[%s4067_s29 + $0x4c] sm:$0xf0] }
 0x659   : > { %v1764_v20 = vpop.permute.xlu2 %1763 }
 0x65a   : > { %1776 = vst.msk [vmem:[#allocation3] sm:$0xff] %vm1775_vm12, %v1764_v20  ;;  %v3494_v20 = vor.u32 %v3736_v18, %v3491_v19  ;;  %v3715_v18 = vld [vmem:[%s4067_s29 + $0x44] sm:$0xf]  ;;  %v3402_v19 = vor.u32 %v3717_v41, %v3401_v50 }
 0x65c   : > { %2363 = vmatpush.bf16.msrb.mxu2 %v3494_v20  ;;  %v3403_v20 = vld [vmem:[%s4067_s29 + $0x50] sm:$0xf0] }
 0x661   : > { %v1766_v25 = vpop.permute.xlu2 %1765 }
 0x662   : > { %1777 = vst.msk [vmem:[#allocation3 + $0x8] sm:$0xff] %vm1775_vm12, %v1766_v25  ;;  %v3731_v25 = vld [vmem:[%s4067_s29 + $0xc4] sm:$0xf] }
 0x66b   : > { %v1911_v24 = vpop.permute.xlu2 %1910 }
 0x66c   : > { %1922 = vst.msk [vmem:[#allocation3 + $0x8] sm:$0xff] %vm1920_vm13, %v1911_v24  ;;  %v3466_v24 = vor.u32 %v3733_v23, %v3465_v62  ;;  %v3409_v62 = vld [vmem:[%s4067_s29 + $0x48] sm:$0xf]  ;;  %v3718_v23 = vld [vmem:[%s4067_s29 + $0x54] sm:$0xf0] }
 0x66e   : > { %2307 = vmatpush.bf16.msrb.mxu3 %v3466_v24  ;;  %v3410_v24 = vor.u32 %v3718_v23, %v3409_v62 }
 0x673   : > { %v1625_v26 = vpop.permute.xlu2 %1624  ;;  %v1926_v30 = vld [vmem:[#allocation3 + $0x8] sm:$0xff] }
 0x674   : > { %1634 = vst.msk [vmem:[#allocation3 + $0x18] sm:$0xff] %vm1630_vm11, %v1625_v26  ;;  %v3467_v26 = vld [vmem:[%s4067_s29 + $0xd0] sm:$0xf0] }
 0x67b   : > { %v1909_v27 = vpop.permute.xlu0 %1908  ;;  %v1913_v29 = vpop.permute.xlu2 %1912 }
 0x67c   : > { %1921 = vst.msk [vmem:[#allocation3] sm:$0xff] %vm1920_vm13, %v1909_v27  ;;  %v3473_v27 = vld [vmem:[%s4067_s29 + $0xc8] sm:$0xf] }
 0x683   : > { %v1925_v58 = vld [vmem:[#allocation3] sm:$0xff] }
 0x684   : > { %v1929_v8 = vpack.c.bf16 %v1926_v30, %v1925_v58  ;;  %v3734_v58 = vld [vmem:[%s4067_s29 + $0xd4] sm:$0xf0]  ;;  %v3470_v30 = vor.u32 %v3731_v25, %v3467_v26  ;;  %v3406_v25 = vor.u32 %v3715_v18, %v3403_v20  ;;  %v3716_v26 = vld [vmem:[%s4067_s29 + $0x4c] sm:$0xf] }
 0x686   : > { %2007 = vmatmul.bf16.vlgmr.msra.gmra.mxu2 %v1929_v8  ;;  %v3474_v8 = vor.u32 %v3734_v58, %v3473_v27  ;;  %2326 = vmatpush.bf16.msrb.mxu0 %v3470_v30  ;;  %v3411_v27 = vld [vmem:[%s4067_s29 + $0x58] sm:$0xf0]  ;;  %v3385_v30 = vld [vmem:[%s4067_s29 + $0x20] sm:$0xf] }
 0x687   : > { %v3414_v58 = vor.u32 %v3716_v26, %v3411_v27 }
 0x688   : > { %2345 = vmatpush.bf16.msrb.mxu1 %v3474_v8  ;;  %v3713_v8 = vld [vmem:[%s4067_s29 + $0x2c] sm:$0xf0] }
 0x69c   : > { %v1768_v12 = vpop.permute.xlu1 %1767 }
 0x69d   : > { %1778 = vst.msk [vmem:[#allocation3 + $0x10] sm:$0xff] %vm1775_vm12, %v1768_v12  ;;  %v3732_v12 = vld [vmem:[%s4067_s29 + $0xcc] sm:$0xf] }
 0x69e   : > { %1923 = vst.msk [vmem:[#allocation3 + $0x10] sm:$0xff] %vm1920_vm13, %v1913_v29  ;;  %v3475_v29 = vld [vmem:[%s4067_s29 + $0xd8] sm:$0xf0] }
 0x6a4   : > { %v1915_v32 = vpop.permute.xlu1 %1914  ;;  %v1770_v36 = vpop.permute.xlu0 %1769 }
 0x6a5   : > { %1779 = vst.msk [vmem:[#allocation3 + $0x18] sm:$0xff] %vm1775_vm12, %v1770_v36  ;;  %v1927_v39 = vld [vmem:[#allocation3 + $0x10] sm:$0xff]  ;;  %v3449_v36 = vld [vmem:[%s4067_s29 + $0xa0] sm:$0xf] }
 0x6a6   : > { %1924 = vst.msk [vmem:[#allocation3 + $0x18] sm:$0xff] %vm1920_vm13, %v1915_v32  ;;  %v3478_v32 = vor.u32 %v3732_v12, %v3475_v29  ;;  %v3711_v12 = vld [vmem:[%s4067_s29 + $0x24] sm:$0xf]  ;;  %v3386_v29 = vor.u32 %v3713_v8, %v3385_v30 }
 0x6a8   : > { %2364 = vmatpush.bf16.msrb.mxu2 %v3478_v32  ;;  %v3387_v32 = vld [vmem:[%s4067_s29 + $0x30] sm:$0xf0] }
 0x6ad   : > { %v1928_v59 = vld [vmem:[#allocation3 + $0x18] sm:$0xff] }
 0x6ae   : > { %v1930_v15 = vpack.c.bf16 %v1928_v59, %v1927_v39  ;;  %v3729_v39 = vld [vmem:[%s4067_s29 + $0xac] sm:$0xf0]  ;;  %v3727_v59 = vld [vmem:[%s4067_s29 + $0xa4] sm:$0xf] }
 0x6b0   : > { %2012 = vmatmul.bf16.gmra.mxu2 %v1930_v15  ;;  %v3450_v15 = vor.u32 %v3729_v39, %v3449_v36  ;;  %v3393_v36 = vld [vmem:[%s4067_s29 + $0x28] sm:$0xf]  ;;  %v3714_v39 = vld [vmem:[%s4067_s29 + $0x34] sm:$0xf0] }
 0x6b2   : > { %2308 = vmatpush.bf16.msrb.mxu3 %v3450_v15  ;;  %v3394_v15 = vor.u32 %v3714_v39, %v3393_v36 }
 0x709   : > { %v2008_v28 = vpop.f32.mrf.mxu2 }
 0x70a   : > { %v2009_v42 = vadd.f32 %v3803_v16, %v2008_v28  ;;  %v3457_v28 = vld [vmem:[%s4067_s29 + $0xa8] sm:$0xf] }
 0x70c   : > { %v4615_v44 = vadd.f32 %v3919_v43, %v2009_v42  ;;  %v3730_v42 = vld [vmem:[%s4067_s29 + $0xb4] sm:$0xf0] }
 0x70e   : > { %2022 = vadd.xlane.f32.xlu0 %v4615_v44 }
 0x711   : > { %v2010_v46 = vpop.f32.mrf.mxu2 }
 0x712   : > { %v2011_v4 = vadd.f32 %v3803_v16, %v2010_v46  ;;  %v3458_v46 = vor.u32 %v3730_v42, %v3457_v28  ;;  %v3395_v28 = vld [vmem:[%s4067_s29 + $0x38] sm:$0xf0] }
 0x714   : > { %v4618_v48 = vadd.f32 %v3920_v9, %v2011_v4  ;;  %v3728_v4 = vld [vmem:[%s4067_s29 + $0xac] sm:$0xf]  ;;  %v3459_v9 = vld [vmem:[%s4067_s29 + $0xb8] sm:$0xf0]  ;;  %2346 = vmatpush.bf16.msrb.mxu1 %v3458_v46  ;;  %v3709_v46 = vld [vmem:[%s4067_s29 + $0xc] sm:$0xf0] }
 0x716   : > { %2024 = vadd.xlane.f32.xlu2 %v4618_v48 }
 0x733   : > { %v2013_v17 = vpop.f32.mrf.mxu2 }
 0x734   : > { %v2014_v49 = vadd.f32 %v3803_v16, %v2013_v17  ;;  %v3462_v17 = vor.u32 %v3728_v4, %v3459_v9  ;;  %v3707_v4 = vld [vmem:[%s4067_s29 + $0x4] sm:$0xf] }
 0x736   : > { %v4621_v38 = vadd.f32 %v3921_v51, %v2014_v49  ;;  %v3433_v49 = vld [vmem:[%s4067_s29 + $0x80] sm:$0xf]  ;;  %v3725_v51 = vld [vmem:[%s4067_s29 + $0x8c] sm:$0xf0]  ;;  %2365 = vmatpush.bf16.msrb.mxu2 %v3462_v17  ;;  %v3371_v17 = vld [vmem:[%s4067_s29 + $0x10] sm:$0xf0] }
 0x738   : > { %2026 = vadd.xlane.f32.xlu1 %v4621_v38 }
 0x73b   : > { %v2015_v6 = vpop.f32.mrf.mxu2 }
 0x73c   : > { %v2016_v14 = vadd.f32 %v3803_v16, %v2015_v6  ;;  %v3451_v16 = vld [vmem:[%s4067_s29 + $0xb0] sm:$0xf0]  ;;  %v3723_v6 = vld [vmem:[%s4067_s29 + $0x84] sm:$0xf] }
 0x73d   : > { %v3454_v43 = vor.u32 %v3727_v59, %v3451_v16  ;;  %v3390_v59 = vor.u32 %v3711_v12, %v3387_v32  ;;  %v3712_v16 = vld [vmem:[%s4067_s29 + $0x2c] sm:$0xf] }
 0x73e   : > { %v4624_v52 = vadd.f32 %v3922_v34, %v2016_v14  ;;  %v3434_v14 = vor.u32 %v3725_v51, %v3433_v49  ;;  %v3435_v34 = vld [vmem:[%s4067_s29 + $0x90] sm:$0xf0]  ;;  %v3398_v42 = vor.u32 %v3712_v16, %v3395_v28  ;;  %v3377_v49 = vld [vmem:[%s4067_s29 + $0x8] sm:$0xf]  ;;  %v3710_v51 = vld [vmem:[%s4067_s29 + $0x14] sm:$0xf0] }
 0x73f   : > { %2327 = vmatpush.bf16.msrb.mxu0 %v3454_v43  ;;  %v3369_v43 = vld [vmem:[%s4067_s29] sm:$0xf] }
 0x740   : > { %2028 = vadd.xlane.f32.xlu0 %v4624_v52  ;;  %2309 = vmatpush.bf16.msrb.mxu3 %v3434_v14  ;;  %v3370_v9 = vor.u32 %v3709_v46, %v3369_v43  ;;  %v3374_v14 = vor.u32 %v3707_v4, %v3371_v17  ;;  %v3754_v4 = vld [vmem:[%s4078_s21 + $0x78] sm:$0xff]  ;;  %v3753_v17 = vld [vmem:[%s4078_s21 + $0x70] sm:$0xff] }
 0x781   : > { %v2023_v54 = vpop.xlane.xlu0 %2022 }
 0x782   : > { %v2030_v40 = vmul.f32 %v2023_v54, %v4241_v57  ;;  %v3441_v54 = vld [vmem:[%s4067_s29 + $0x88] sm:$0xf] }
 0x784   : > { %v4629_v35 = vsub.f32 %v4615_v44, %v2030_v40  ;;  %v3726_v40 = vld [vmem:[%s4067_s29 + $0x94] sm:$0xf0] }
 0x786   : > { %v2038_v55 = vmul.f32 %v4629_v35, %v4629_v35 }
 0x788   : > { %2042 = vadd.xlane.f32.xlu2 %v2038_v55  ;;  %v3438_v55 = vor.u32 %v3723_v6, %v3435_v34  ;;  %v3378_v34 = vor.u32 %v3710_v51, %v3377_v49  ;;  %v3761_v49 = vld [vmem:[%s4078_s21 + $0xb0] sm:$0xff]  ;;  %v3752_v51 = vld [vmem:[%s4078_s21 + $0x68] sm:$0xff] }
 0x789   : > { %v2025_v56 = vpop.xlane.xlu2 %2024 }
 0x78a   : > { %v2031_v33 = vmul.f32 %v2025_v56, %v4241_v57  ;;  %v3442_v56 = vor.u32 %v3726_v40, %v3441_v54  ;;  %2328 = vmatpush.bf16.msrb.mxu0 %v3438_v55  ;;  %v3708_v54 = vld [vmem:[%s4067_s29 + $0xc] sm:$0xf]  ;;  %v3379_v40 = vld [vmem:[%s4067_s29 + $0x18] sm:$0xf0] }
 0x78c   : > { %v4635_v61 = vsub.f32 %v4618_v48, %v2031_v33  ;;  %v3724_v33 = vld [vmem:[%s4067_s29 + $0x8c] sm:$0xf]  ;;  %2347 = vmatpush.bf16.msrb.mxu1 %v3442_v56  ;;  %v3382_v56 = vor.u32 %v3708_v54, %v3379_v40  ;;  %v3751_v54 = vld [vmem:[%s4078_s21 + $0x60] sm:$0xff] }
 0x78d   : > { %v3759_v40 = vld [vmem:[%s4078_s21 + $0xa0] sm:$0xff] }
 0x78e   : > { %v2039_v1 = vmul.f32 %v4635_v61, %v4635_v61 }
 0x790   : > { %2044 = vadd.xlane.f32.xlu1 %v2039_v1  ;;  %v3443_v1 = vld [vmem:[%s4067_s29 + $0x98] sm:$0xf0]  ;;  %2348 = vmatpush.bf16.msrb.mxu1 %v3426_v0 }
 0x794   : > { %2349 = vmatpush.bf16.msrb.mxu1 %v3410_v24 }
 0x798   : > { %2350 = vmatpush.bf16.msrb.mxu1 %v3394_v15 }
 0x79c   : > { %2351 = vmatpush.bf16.msrb.mxu1 %v3378_v34  ;;  %v3769_v34 = vld [vmem:[%s4078_s21 + $0xf0] sm:$0xff] }
 0x7ab   : > { %v2027_v37 = vpop.xlane.xlu1 %2026 }
 0x7ac   : > { %v2032_v2 = vmul.f32 %v2027_v37, %v4241_v57  ;;  %v3446_v37 = vor.u32 %v3724_v33, %v3443_v1 }
 0x7ae   : > { %v4641_v22 = vsub.f32 %v4621_v38, %v2032_v2  ;;  %v3417_v2 = vld [vmem:[%s4067_s29 + $0x60] sm:$0xf]  ;;  %2366 = vmatpush.bf16.msrb.mxu2 %v3446_v37 }
 0x7b0   : > { %v2040_v3 = vmul.f32 %v4641_v22, %v4641_v22 }
 0x7b2   : > { %2046 = vadd.xlane.f32.xlu0 %v2040_v3  ;;  %v3721_v3 = vld [vmem:[%s4067_s29 + $0x6c] sm:$0xf0]  ;;  %2367 = vmatpush.bf16.msrb.mxu2 %v3430_v53 }
 0x7b3   : > { %v2029_v45 = vpop.xlane.xlu0 %2028 }
 0x7b4   : > { %v2033_v63 = vmul.f32 %v2029_v45, %v4241_v57  ;;  %v3719_v45 = vld [vmem:[%s4067_s29 + $0x64] sm:$0xf] }
 0x7b6   : > { %v4647_v31 = vsub.f32 %v4624_v52, %v2033_v63  ;;  %v3418_v63 = vor.u32 %v3721_v3, %v3417_v2  ;;  %2368 = vmatpush.bf16.msrb.mxu2 %v3414_v58 }
 0x7b8   : > { %v2041_v21 = vmul.f32 %v4647_v31, %v4647_v31  ;;  %2310 = vmatpush.bf16.msrb.mxu3 %v3418_v63 }
 0x7ba   : > { %2048 = vadd.xlane.f32.xlu2 %v2041_v21  ;;  %v3419_v21 = vld [vmem:[%s4067_s29 + $0x70] sm:$0xf0]  ;;  %2369 = vmatpush.bf16.msrb.mxu2 %v3398_v42 }
 0x7bb   : > { %v3422_v11 = vor.u32 %v3719_v45, %v3419_v21 }
 0x7bc   : > { %2311 = vmatpush.bf16.msrb.mxu3 %v3402_v19 }
 0x7bd   : > { %2329 = vmatpush.bf16.msrb.mxu0 %v3422_v11 }
 0x7be   : > { %2370 = vmatpush.bf16.msrb.mxu2 %v3382_v56  ;;  %v3768_v56 = vld [vmem:[%s4078_s21 + $0xe8] sm:$0xff] }
 0x7c0   : > { %2312 = vmatpush.bf16.msrb.mxu3 %v3386_v29 }
 0x7c1   : > { %2330 = vmatpush.bf16.msrb.mxu0 %v3406_v25 }
 0x7c4   : > { %2313 = vmatpush.bf16.msrb.mxu3 %v3370_v9  ;;  %v3762_v9 = vld [vmem:[%s4078_s21 + $0xb8] sm:$0xff] }
 0x7c5   : > { %2331 = vmatpush.bf16.msrb.mxu0 %v3390_v59  ;;  %2832 = vmatpush.bf16.msra.mxu1 %v3762_v9 }
 0x7c9   : > { %2332 = vmatpush.bf16.msrb.mxu0 %v3374_v14  ;;  %2833 = vmatpush.bf16.msra.mxu1 %v3761_v49  ;;  %v3745_v14 = vld [vmem:[%s4078_s21 + $0x30] sm:$0xff] }
 0x7cd   : > { %2813 = vmatpush.bf16.msra.mxu0 %v3754_v4 }
 0x7d1   : > { %2814 = vmatpush.bf16.msra.mxu0 %v3753_v17 }
 0x7d5   : > { %2815 = vmatpush.bf16.msra.mxu0 %v3752_v51 }
 0x7d9   : > { %2816 = vmatpush.bf16.msra.mxu0 %v3751_v54 }
 0x7fb   : > { %v2043_v6 = vpop.xlane.xlu2 %2042 }
 0x7fc   : > { %v2050_v55 = vmul.f32 %v2043_v6, %v4241_v57  ;;  %v3760_v6 = vld [vmem:[%s4078_s21 + $0xa8] sm:$0xff] }
 0x7fd   : > { %2834 = vmatpush.bf16.msra.mxu1 %v3760_v6 }
 0x7fe   : > { %v2054_v33 = vadd.f32 1e-06, %v2050_v55  ;;  %v3744_v55 = vld [vmem:[%s4078_s21 + $0x28] sm:$0xff] }
 0x800   : > { %3879 = vrsqrt.f32 %v2054_v33  ;;  %vm2064_vm15 = vweird.f32 %v2054_v33 }
 0x801   : > { %2835 = vmatpush.bf16.msra.mxu1 %v3759_v40 }
 0x803   : > { %v2045_v1 = vpop.xlane.xlu1 %2044 }
 0x804   : > { %v2051_v37 = vmul.f32 %v2045_v1, %v4241_v57  ;;  %v3758_v1 = vld [vmem:[%s4078_s21 + $0x98] sm:$0xff] }
 0x805   : > { %2836 = vmatpush.bf16.msra.mxu1 %v3758_v1 }
 0x806   : > { %v3880_v2 = vpop.eup %3879  ;;  %v2055_v3 = vadd.f32 1e-06, %v2051_v37  ;;  %v3743_v37 = vld [vmem:[%s4078_s21 + $0x20] sm:$0xff] }
 0x807   : > { %v2059_v45 = vmul.f32 %v3880_v2, %v2054_v33  ;;  %vm2065_vm14 = vweird.f32 %v3880_v2  ;;  %v3750_v33 = vld [vmem:[%s4078_s21 + $0x58] sm:$0xff] }
 0x808   : > { %3881 = vrsqrt.f32 %v2055_v3  ;;  %vm2066_vm1 = vmor %vm2064_vm15, %vm2065_vm14  ;;  %vm2074_vm2 = vweird.f32 %v2055_v3  ;;  %2817 = vmatpush.bf16.msra.mxu0 %v3750_v33 }
 0x809   : > { %v2060_v63 = vmul.f32 %v3880_v2, %v2059_v45  ;;  %v3757_v45 = vld [vmem:[%s4078_s21 + $0x90] sm:$0xff] }
 0x80a   : > { %2837 = vmatpush.bf16.msra.mxu1 %v3757_v45 }
 0x80b   : > { %v2061_v21 = vmul.f32 0.5, %v2060_v63  ;;  %v2136_v63 = vld [vmem:[%s4073_s28] sm:$0xf] }
 0x80d   : > { %v2062_v10 = vsub.f32 1.5, %v2061_v21  ;;  %v3742_v21 = vld [vmem:[%s4078_s21 + $0x18] sm:$0xff] }
 0x80e   : > { %v3882_v5 = vpop.eup %3881 }
 0x80f   : > { %v2069_v11 = vmul.f32 %v3882_v5, %v2055_v3  ;;  %v2063_v13 = vmul.f32 %v3880_v2, %v2062_v10  ;;  %vm2075_vm0 = vweird.f32 %v3882_v5  ;;  %v3749_v3 = vld [vmem:[%s4078_s21 + $0x50] sm:$0xff]  ;;  %v3748_v10 = vld [vmem:[%s4078_s21 + $0x48] sm:$0xff] }
 0x810   : > { %vm2076_vm3 = vmor %vm2074_vm2, %vm2075_vm0  ;;  %2818 = vmatpush.bf16.msra.mxu0 %v3749_v3 }
 0x811   : > { %v2070_v0 = vmul.f32 %v3882_v5, %v2069_v11  ;;  %v2067_v50 = vsel %vm2066_vm1, %v3880_v2, %v2063_v13  ;;  %v3767_v2 = vld [vmem:[%s4078_s21 + $0xe0] sm:$0xff]  ;;  %v3756_v11 = vld [vmem:[%s4078_s21 + $0x88] sm:$0xff]  ;;  %v4750_v13 = vperm.slane %v2136_v63, 2 }
 0x812   : > { %v2098_v19 = vmul.f32 %v2067_v50, %v4629_v35  ;;  %2838 = vmatpush.bf16.msra.mxu1 %v3756_v11 }
 0x813   : > { %v2071_v47 = vmul.f32 0.5, %v2070_v0  ;;  %v4748_v0 = vperm.slane %v2136_v63, 1 }
 0x814   : > { %2819 = vmatpush.bf16.msra.mxu0 %v3748_v10 }
 0x815   : > { %v2072_v53 = vsub.f32 1.5, %v2071_v47  ;;  %v3741_v47 = vld [vmem:[%s4078_s21 + $0x10] sm:$0xff] }
 0x817   : > { %v2073_v41 = vmul.f32 %v3882_v5, %v2072_v53  ;;  %v3765_v53 = vld [vmem:[%s4078_s21 + $0xd0] sm:$0xff] }
 0x819   : > { %v2077_v18 = vsel %vm2076_vm3, %v3882_v5, %v2073_v41  ;;  %v3766_v5 = vld [vmem:[%s4078_s21 + $0xd8] sm:$0xff]  ;;  %v3747_v41 = vld [vmem:[%s4078_s21 + $0x40] sm:$0xff] }
 0x81a   : > { %v2099_v20 = vmul.f32 %v2077_v18, %v4635_v61  ;;  %v3755_v18 = vld [vmem:[%s4078_s21 + $0x80] sm:$0xff]  ;;  %2820 = vmatpush.bf16.msra.mxu0 %v3747_v41 }
 0x81b   : > { %2839 = vmatpush.bf16.msra.mxu1 %v3755_v18 }
 0x81c   : > { %v2102_v62 = vpack.c.bf16 %v2099_v20, %v2098_v19 }
 0x81e   : > { %2314 = vmatmul.bf16.vlgmr.msrb.gmra.mxu3 %v2102_v62  ;;  %2333 = vmatmul.bf16.vlgmr.msrb.gmra.mxu0 %v2102_v62 }
 0x81f   : > { %2352 = vmatmul.bf16.vlgmr.msrb.gmra.mxu1 %v2102_v62  ;;  %2371 = vmatmul.bf16.vlgmr.msrb.gmra.mxu2 %v2102_v62 }
 0x825   : > { %v2047_v23 = vpop.xlane.xlu0 %2046 }
 0x826   : > { %v2052_v25 = vmul.f32 %v2047_v23, %v4241_v57  ;;  %v3740_v23 = vld [vmem:[%s4078_s21 + $0x8] sm:$0xff] }
 0x828   : > { %v2056_v24 = vadd.f32 1e-06, %v2052_v25  ;;  %v3764_v25 = vld [vmem:[%s4078_s21 + $0xc8] sm:$0xff] }
 0x82a   : > { %3883 = vrsqrt.f32 %v2056_v24  ;;  %vm2084_vm5 = vweird.f32 %v2056_v24 }
 0x82d   : > { %v2049_v26 = vpop.xlane.xlu2 %2048 }
 0x82e   : > { %v2053_v27 = vmul.f32 %v2049_v26, %v4241_v57  ;;  %v4766_v26 = vperm.slane %v2136_v63, 0 }
 0x830   : > { %v3884_v58 = vpop.eup %3883  ;;  %v2057_v30 = vadd.f32 1e-06, %v2053_v27 }
 0x831   : > { %v2079_v8 = vmul.f32 %v3884_v58, %v2056_v24  ;;  %vm2085_vm4 = vweird.f32 %v3884_v58 }
 0x832   : > { %3885 = vrsqrt.f32 %v2057_v30  ;;  %vm2086_vm7 = vmor %vm2084_vm5, %vm2085_vm4  ;;  %vm2094_vm8 = vweird.f32 %v2057_v30 }
 0x833   : > { %v2080_v35 = vmul.f32 %v3884_v58, %v2079_v8 }
 0x835   : > { %v2081_v12 = vmul.f32 0.5, %v2080_v35 }
 0x837   : > { %v2082_v29 = vsub.f32 1.5, %v2081_v12  ;;  %v3739_v12 = vld [vmem:[%s4078_s21] sm:$0xff] }
 0x838   : > { %v3886_v61 = vpop.eup %3885 }
 0x839   : > { %v2089_v32 = vmul.f32 %v3886_v61, %v2057_v30  ;;  %v2083_v39 = vmul.f32 %v3884_v58, %v2082_v29  ;;  %vm2095_vm6 = vweird.f32 %v3886_v61 }
 0x83a   : > { %vm2096_vm9 = vmor %vm2094_vm8, %vm2095_vm6 }
 0x83b   : > { %v2090_v36 = vmul.f32 %v3886_v61, %v2089_v32  ;;  %v2087_v57 = vsel %vm2086_vm7, %v3884_v58, %v2083_v39  ;;  %v4770_v58 = vperm.slane %v2136_v63, 3 }
 0x83c   : > { %v2100_v42 = vmul.f32 %v2087_v57, %v4641_v22  ;;  %v3746_v22 = vld [vmem:[%s4078_s21 + $0x38] sm:$0xff] }
 0x83d   : > { %v2091_v59 = vmul.f32 0.5, %v2090_v36  ;;  %2794 = vmatpush.bf16.msra.mxu3 %v3746_v22 }
 0x83f   : > { %v2092_v15 = vsub.f32 1.5, %v2091_v59 }
 0x841   : > { %v2093_v16 = vmul.f32 %v3886_v61, %v2092_v15  ;;  %2795 = vmatpush.bf16.msra.mxu3 %v3745_v14 }
 0x843   : > { %v2097_v28 = vsel %vm2096_vm9, %v3886_v61, %v2093_v16  ;;  %v3763_v61 = vld [vmem:[%s4078_s21 + $0xc0] sm:$0xff] }
 0x844   : > { %v2101_v43 = vmul.f32 %v2097_v28, %v4647_v31  ;;  %v3770_v31 = vld [vmem:[%s4078_s21 + $0xf8] sm:$0xff] }
 0x845   : > { %2851 = vmatpush.bf16.msra.mxu2 %v3770_v31  ;;  %2796 = vmatpush.bf16.msra.mxu3 %v3744_v55 }
 0x846   : > { %v2103_v46 = vpack.c.bf16 %v2101_v43, %v2100_v42 }
 0x848   : > { %2319 = vmatmul.bf16.gmra.mxu3 %v2103_v46  ;;  %2338 = vmatmul.bf16.gmra.mxu0 %v2103_v46 }
 0x849   : > { %2357 = vmatmul.bf16.gmra.mxu1 %v2103_v46  ;;  %2376 = vmatmul.bf16.gmra.mxu2 %v2103_v46 }
 0x84a   : > { %2852 = vmatpush.bf16.msra.mxu2 %v3769_v34  ;;  %2797 = vmatpush.bf16.msra.mxu3 %v3743_v37 }
 0x84e   : > { %2853 = vmatpush.bf16.msra.mxu2 %v3768_v56  ;;  %2798 = vmatpush.bf16.msra.mxu3 %v3742_v21 }
 0x852   : > { %2854 = vmatpush.bf16.msra.mxu2 %v3767_v2  ;;  %2799 = vmatpush.bf16.msra.mxu3 %v3741_v47 }
 0x856   : > { %2855 = vmatpush.bf16.msra.mxu2 %v3766_v5  ;;  %2800 = vmatpush.bf16.msra.mxu3 %v3740_v23 }
 0x85a   : > { %2856 = vmatpush.bf16.msra.mxu2 %v3765_v53  ;;  %2801 = vmatpush.bf16.msra.mxu3 %v3739_v12 }
 0x85e   : > { %2857 = vmatpush.bf16.msra.mxu2 %v3764_v25 }
 0x862   : > { %2858 = vmatpush.bf16.msra.mxu2 %v3763_v61 }
 0x89b   : > { %v2334_v50 = vpop.f32.mrf.mxu0 }
 0x89c   : > { %v4757_v19 = vadd.f32 %v2334_v50, %v4748_v0  ;;  %v2353_v20 = vpop.f32.mrf.mxu1 }
 0x89d   : > { %v4760_v62 = vadd.f32 %v2353_v20, %v4750_v13 }
 0x89e   : > { %v2383_v24 = vmul.f32 %v4757_v19, %v4757_v19 }
 0x89f   : > { %v2384_v27 = vmul.f32 %v4760_v62, %v4760_v62 }
 0x8a0   : > { %v2399_v30 = vmul.f32 %v2383_v24, %v4757_v19 }
 0x8a1   : > { %v2400_v8 = vmul.f32 %v2384_v27, %v4760_v62  ;;  %v2315_v35 = vpop.f32.mrf.mxu3 }
 0x8a2   : > { %v2415_v29 = vmul.f32 0.044715, %v2399_v30  ;;  %v4777_v32 = vadd.f32 %v2315_v35, %v4766_v26  ;;  %v2372_v36 = vpop.f32.mrf.mxu2 }
 0x8a3   : > { %v2416_v39 = vmul.f32 0.044715, %v2400_v8  ;;  %v4780_v59 = vadd.f32 %v2372_v36, %v4770_v58  ;;  %v2336_v15 = vpop.f32.mrf.mxu0 }
 0x8a4   : > { %v2431_v57 = vadd.f32 %v2415_v29, %v4757_v19  ;;  %v2382_v16 = vmul.f32 %v4777_v32, %v4777_v32  ;;  %v4786_v28 = vadd.f32 %v2336_v15, %v4748_v0  ;;  %v2355_v42 = vpop.f32.mrf.mxu1 }
 0x8a5   : > { %v2432_v43 = vadd.f32 %v2416_v39, %v4760_v62  ;;  %v2385_v46 = vmul.f32 %v4780_v59, %v4780_v59  ;;  %v4792_v4 = vadd.f32 %v2355_v42, %v4750_v13 }
 0x8a6   : > { %v2447_v9 = vmul.f32 0.7978846, %v2431_v57  ;;  %v2398_v17 = vmul.f32 %v2382_v16, %v4777_v32  ;;  %v2387_v49 = vmul.f32 %v4786_v28, %v4786_v28 }
 0x8a7   : > { %v2448_v22 = vmul.f32 0.7978846, %v2432_v43  ;;  %v2401_v31 = vmul.f32 %v2385_v46, %v4780_v59  ;;  %v2388_v51 = vmul.f32 %v4792_v4, %v4792_v4 }
 0x8a8   : > { %v2414_v6 = vmul.f32 0.044715, %v2398_v17  ;;  %v2403_v14 = vmul.f32 %v2387_v49, %v4786_v28  ;;  %3887 = vtanh.f32 %v2447_v9 }
 0x8a9   : > { %v2417_v34 = vmul.f32 0.044715, %v2401_v31  ;;  %v2404_v54 = vmul.f32 %v2388_v51, %v4792_v4  ;;  %v2317_v40 = vpop.f32.mrf.mxu3  ;;  %3889 = vtanh.f32 %v2448_v22 }
 0x8aa   : > { %v2430_v55 = vadd.f32 %v2414_v6, %v4777_v32  ;;  %v2419_v56 = vmul.f32 0.044715, %v2403_v14  ;;  %v2318_v33 = vadd.f32 %v2317_v40, %v4766_v26  ;;  %v2374_v1 = vpop.f32.mrf.mxu2 }
 0x8ab   : > { %v2433_v37 = vadd.f32 %v2417_v34, %v4780_v59  ;;  %v2420_v2 = vmul.f32 0.044715, %v2404_v54  ;;  %v2375_v3 = vadd.f32 %v2374_v1, %v4770_v58 }
 0x8ac   : > { %v2446_v45 = vmul.f32 0.7978846, %v2430_v55  ;;  %v2435_v63 = vadd.f32 %v2419_v56, %v4786_v28  ;;  %v2386_v21 = vmul.f32 %v2318_v33, %v2318_v33 }
 0x8ad   : > { %v2449_v5 = vmul.f32 0.7978846, %v2433_v37  ;;  %v2436_v10 = vadd.f32 %v2420_v2, %v4792_v4  ;;  %v2389_v11 = vmul.f32 %v2375_v3, %v2375_v3 }
 0x8ae   : > { %3891 = vtanh.f32 %v2446_v45  ;;  %v2451_v47 = vmul.f32 0.7978846, %v2435_v63  ;;  %v2402_v53 = vmul.f32 %v2386_v21, %v2318_v33  ;;  %v3888_v18 = vpop.eup %3887 }
 0x8af   : > { %3893 = vtanh.f32 %v2449_v5  ;;  %v2452_v50 = vmul.f32 0.7978846, %v2436_v10  ;;  %v2405_v41 = vmul.f32 %v2389_v11, %v2375_v3  ;;  %v3890_v23 = vpop.eup %3889  ;;  %v2479_v27 = vadd.f32 1.0, %v3888_v18 }
 0x8b0   : > { %3895 = vtanh.f32 %v2451_v47  ;;  %v2418_v20 = vmul.f32 0.044715, %v2402_v53  ;;  %v2480_v35 = vadd.f32 1.0, %v3890_v23 }
 0x8b1   : > { %3897 = vtanh.f32 %v2452_v50  ;;  %v2421_v25 = vmul.f32 0.044715, %v2405_v41  ;;  %v2495_v15 = vmul.f32 0.5, %v2479_v27 }
 0x8b2   : > { %v2434_v24 = vadd.f32 %v2418_v20, %v2318_v33  ;;  %v2496_v16 = vmul.f32 0.5, %v2480_v35 }
 0x8b3   : > { %v2437_v30 = vadd.f32 %v2421_v25, %v2375_v3  ;;  %v2511_v49 = vmul.f32 %v2495_v15, %v4757_v19 }
 0x8b4   : > { %v3892_v8 = vpop.eup %3891  ;;  %v2450_v12 = vmul.f32 0.7978846, %v2434_v24  ;;  %v2512_v51 = vmul.f32 %v2496_v16, %v4760_v62 }
 0x8b5   : > { %v3894_v61 = vpop.eup %3893  ;;  %v2453_v29 = vmul.f32 0.7978846, %v2437_v30  ;;  %v2478_v43 = vadd.f32 1.0, %v3892_v8 }
 0x8b6   : > { %v3896_v36 = vpop.eup %3895  ;;  %3899 = vtanh.f32 %v2450_v12  ;;  %v2481_v9 = vadd.f32 1.0, %v3894_v61 }
 0x8b7   : > { %v3898_v39 = vpop.eup %3897  ;;  %v2483_v57 = vadd.f32 1.0, %v3896_v36  ;;  %3901 = vtanh.f32 %v2453_v29  ;;  %v2494_v34 = vmul.f32 0.5, %v2478_v43 }
 0x8b8   : > { %v2484_v42 = vadd.f32 1.0, %v3898_v39  ;;  %v2497_v55 = vmul.f32 0.5, %v2481_v9 }
 0x8b9   : > { %v2499_v46 = vmul.f32 0.5, %v2483_v57  ;;  %v2510_v19 = vmul.f32 %v2494_v34, %v4777_v32 }
 0x8ba   : > { %v2500_v17 = vmul.f32 0.5, %v2484_v42 }
 0x8bb   : > { %v2515_v22 = vmul.f32 %v2499_v46, %v4786_v28  ;;  %v2513_v28 = vmul.f32 %v2497_v55, %v4780_v59 }
 0x8bc   : > { %v3900_v31 = vpop.eup %3899  ;;  %v2516_v6 = vmul.f32 %v2500_v17, %v4792_v4 }
 0x8bd   : > { %v3902_v14 = vpop.eup %3901  ;;  %v2482_v54 = vadd.f32 1.0, %v3900_v31  ;;  %v2527_v40 = vpack.c.bf16 %v2515_v22, %v2511_v49 }
 0x8be   : > { %v2485_v56 = vadd.f32 1.0, %v3902_v14  ;;  %v2528_v1 = vpack.c.bf16 %v2516_v6, %v2512_v51 }
 0x8bf   : > { %v2498_v37 = vmul.f32 0.5, %v2482_v54  ;;  %2821 = vmatmul.bf16.vlgmr.msra.gmra.mxu0 %v2527_v40 }
 0x8c0   : > { %v2501_v2 = vmul.f32 0.5, %v2485_v56  ;;  %2840 = vmatmul.bf16.vlgmr.msra.gmra.mxu1 %v2528_v1 }
 0x8c1   : > { %v2514_v45 = vmul.f32 %v2498_v37, %v2318_v33 }
 0x8c2   : > { %v2517_v63 = vmul.f32 %v2501_v2, %v2375_v3 }
 0x8c3   : > { %v2526_v62 = vpack.c.bf16 %v2514_v45, %v2510_v19 }
 0x8c4   : > { %v2529_v21 = vpack.c.bf16 %v2517_v63, %v2513_v28 }
 0x8c5   : > { %v2339_v4 = vpop.f32.mrf.mxu0  ;;  %2802 = vmatmul.bf16.vlgmr.msra.gmra.mxu3 %v2526_v62 }
 0x8c6   : > { %v4815_v5 = vadd.f32 %v2339_v4, %v4748_v0  ;;  %v2358_v10 = vpop.f32.mrf.mxu1  ;;  %2859 = vmatmul.bf16.vlgmr.msra.gmra.mxu2 %v2529_v21 }
 0x8c7   : > { %v4818_v11 = vadd.f32 %v2358_v10, %v4750_v13 }
 0x8c8   : > { %v2391_v47 = vmul.f32 %v4815_v5, %v4815_v5 }
 0x8c9   : > { %v2392_v32 = vmul.f32 %v4818_v11, %v4818_v11 }
 0x8ca   : > { %v2407_v59 = vmul.f32 %v2391_v47, %v4815_v5 }
 0x8cb   : > { %v2408_v33 = vmul.f32 %v2392_v32, %v4818_v11  ;;  %v2320_v3 = vpop.f32.mrf.mxu3 }
 0x8cc   : > { %v2423_v53 = vmul.f32 0.044715, %v2407_v59  ;;  %v4827_v50 = vadd.f32 %v2320_v3, %v4766_v26  ;;  %v2377_v41 = vpop.f32.mrf.mxu2 }
 0x8cd   : > { %v2424_v18 = vmul.f32 0.044715, %v2408_v33  ;;  %v4830_v20 = vadd.f32 %v2377_v41, %v4770_v58  ;;  %v2341_v23 = vpop.f32.mrf.mxu0 }
 0x8ce   : > { %v2439_v25 = vadd.f32 %v2423_v53, %v4815_v5  ;;  %v2390_v24 = vmul.f32 %v4827_v50, %v4827_v50  ;;  %v4836_v27 = vadd.f32 %v2341_v23, %v4748_v0  ;;  %v2360_v30 = vpop.f32.mrf.mxu1 }
 0x8cf   : > { %v2440_v8 = vadd.f32 %v2424_v18, %v4818_v11  ;;  %v2393_v35 = vmul.f32 %v4830_v20, %v4830_v20  ;;  %v4842_v12 = vadd.f32 %v2360_v30, %v4750_v13 }
 0x8d0   : > { %v2406_v61 = vmul.f32 %v2390_v24, %v4827_v50  ;;  %v2395_v29 = vmul.f32 %v4836_v27, %v4836_v27  ;;  %v2455_v36 = vmul.f32 0.7978846, %v2439_v25 }
 0x8d1   : > { %v2409_v39 = vmul.f32 %v2393_v35, %v4830_v20  ;;  %v2396_v0 = vmul.f32 %v4842_v12, %v4842_v12  ;;  %v2456_v15 = vmul.f32 0.7978846, %v2440_v8 }
 0x8d2   : > { %v2422_v57 = vmul.f32 0.044715, %v2406_v61  ;;  %v2411_v16 = vmul.f32 %v2395_v29, %v4836_v27  ;;  %3903 = vtanh.f32 %v2455_v36 }
 0x8d3   : > { %v2425_v42 = vmul.f32 0.044715, %v2409_v39  ;;  %v2412_v43 = vmul.f32 %v2396_v0, %v4842_v12  ;;  %v2322_v13 = vpop.f32.mrf.mxu3  ;;  %3905 = vtanh.f32 %v2456_v15 }
 0x8d4   : > { %v2438_v46 = vadd.f32 %v2422_v57, %v4827_v50  ;;  %v2427_v9 = vmul.f32 0.044715, %v2411_v16  ;;  %v2323_v17 = vadd.f32 %v2322_v13, %v4766_v26  ;;  %v2379_v49 = vpop.f32.mrf.mxu2 }
 0x8d5   : > { %v2441_v22 = vadd.f32 %v2425_v42, %v4830_v20  ;;  %v2428_v31 = vmul.f32 0.044715, %v2412_v43  ;;  %v2380_v51 = vadd.f32 %v2379_v49, %v4770_v58 }
 0x8d6   : > { %v2443_v6 = vadd.f32 %v2427_v9, %v4836_v27  ;;  %v2394_v14 = vmul.f32 %v2323_v17, %v2323_v17  ;;  %v2454_v34 = vmul.f32 0.7978846, %v2438_v46 }
 0x8d7   : > { %v2444_v54 = vadd.f32 %v2428_v31, %v4842_v12  ;;  %v2397_v40 = vmul.f32 %v2380_v51, %v2380_v51  ;;  %v2457_v55 = vmul.f32 0.7978846, %v2441_v22  ;;  %v3804_v22 = vld [vmem:[%s548_s24] ss:$0 sm:$0xff] }
 0x8d8   : > { %v2410_v56 = vmul.f32 %v2394_v14, %v2323_v17  ;;  %v2459_v1 = vmul.f32 0.7978846, %v2443_v6  ;;  %3907 = vtanh.f32 %v2454_v34  ;;  %v3904_v2 = vpop.eup %3903 }
 0x8d9   : > { %v2413_v26 = vmul.f32 %v2397_v40, %v2380_v51  ;;  %v2460_v37 = vmul.f32 0.7978846, %v2444_v54  ;;  %3909 = vtanh.f32 %v2457_v55  ;;  %v3906_v45 = vpop.eup %3905  ;;  %v2487_v62 = vadd.f32 1.0, %v3904_v2 }
 0x8da   : > { %v2426_v19 = vmul.f32 0.044715, %v2410_v56  ;;  %3911 = vtanh.f32 %v2459_v1  ;;  %v2488_v4 = vadd.f32 1.0, %v3906_v45 }
 0x8db   : > { %v2429_v58 = vmul.f32 0.044715, %v2413_v26  ;;  %3913 = vtanh.f32 %v2460_v37  ;;  %v2503_v53 = vmul.f32 0.5, %v2487_v62 }
 0x8dc   : > { %v2442_v28 = vadd.f32 %v2426_v19, %v2323_v17  ;;  %v2504_v18 = vmul.f32 0.5, %v2488_v4 }
 0x8dd   : > { %v2445_v63 = vadd.f32 %v2429_v58, %v2380_v51  ;;  %v2519_v8 = vmul.f32 %v2503_v53, %v4815_v5 }
 0x8de   : > { %v3908_v21 = vpop.eup %3907  ;;  %v2458_v10 = vmul.f32 0.7978846, %v2442_v28  ;;  %v2520_v29 = vmul.f32 %v2504_v18, %v4818_v11 }
 0x8df   : > { %v3910_v47 = vpop.eup %3909  ;;  %v2461_v32 = vmul.f32 0.7978846, %v2445_v63  ;;  %v2486_v25 = vadd.f32 1.0, %v3908_v21 }
 0x8e0   : > { %v3912_v59 = vpop.eup %3911  ;;  %3915 = vtanh.f32 %v2458_v10  ;;  %v2489_v30 = vadd.f32 1.0, %v3910_v47 }
 0x8e1   : > { %v3914_v33 = vpop.eup %3913  ;;  %v2491_v3 = vadd.f32 1.0, %v3912_v59  ;;  %3917 = vtanh.f32 %v2461_v32  ;;  %v2502_v57 = vmul.f32 0.5, %v2486_v25 }
 0x8e2   : > { %v2492_v41 = vadd.f32 1.0, %v3914_v33  ;;  %v2505_v43 = vmul.f32 0.5, %v2489_v30  ;;  %v2881_v33 = vand.u32 7, %v4352_v60  ;;  %v3955_v30 = vmov 0.0  }
 0x8e3   : > { %v2507_v23 = vmul.f32 0.5, %v2491_v3  ;;  %v2518_v5 = vmul.f32 %v2502_v57, %v4827_v50 }
 0x8e4   : > { %v2508_v24 = vmul.f32 0.5, %v2492_v41  ;;  %v2521_v9 = vmul.f32 %v2505_v43, %v4830_v20  ;;  %vm2883_vm10 = vcmp.lt.s32.totalorder %v2881_v33, 5 }
 0x8e5   : > { %v2523_v35 = vmul.f32 %v2507_v23, %v4836_v27 }
 0x8e6   : > { %v3916_v61 = vpop.eup %3915  ;;  %v2524_v36 = vmul.f32 %v2508_v24, %v4842_v12 }
 0x8e7   : > { %v3918_v39 = vpop.eup %3917  ;;  %v2531_v0 = vpack.c.bf16 %v2523_v35, %v2519_v8  ;;  %v2490_v15 = vadd.f32 1.0, %v3916_v61  ;;  %v3623_v8 = vsel %vm2883_vm10, 1.0, %v3955_v30 }
 0x8e8   : > { %v2532_v16 = vpack.c.bf16 %v2524_v36, %v2520_v29  ;;  %v2493_v42 = vadd.f32 1.0, %v3918_v39 }
 0x8e9   : > { %2826 = vmatmul.bf16.gmra.mxu0 %v2531_v0  ;;  %v2506_v13 = vmul.f32 0.5, %v2490_v15 }
 0x8ea   : > { %2845 = vmatmul.bf16.gmra.mxu1 %v2532_v16  ;;  %v2509_v46 = vmul.f32 0.5, %v2493_v42 }
 0x8eb   : > { %v2522_v27 = vmul.f32 %v2506_v13, %v2323_v17 }
 0x8ec   : > { %v2525_v11 = vmul.f32 %v2509_v46, %v2380_v51 }
 0x8ed   : > { %v2530_v49 = vpack.c.bf16 %v2522_v27, %v2518_v5 }
 0x8ee   : > { %v2533_v12 = vpack.c.bf16 %v2525_v11, %v2521_v9 }
 0x8ef   : > { %2807 = vmatmul.bf16.gmra.mxu3 %v2530_v49 }
 0x8f0   : > { %2864 = vmatmul.bf16.gmra.mxu2 %v2533_v12 }
 0x93c   : > { %v2822_v31 = vpop.f32.mrf.mxu0 }
 0x93d   : > { %v2841_v34 = vpop.f32.mrf.mxu1 }
 0x944   : > { %v2824_v56 = vpop.f32.mrf.mxu0 }
 0x945   : > { %v2843_v26 = vpop.f32.mrf.mxu1 }
 0x948   : > { %v2803_v6 = vpop.f32.mrf.mxu3 }
 0x949   : > { %v2804_v14 = vadd.f32 %v3804_v22, %v2803_v6  ;;  %v2860_v40 = vpop.f32.mrf.mxu2 }
 0x94b   : > { %v2823_v54 = vadd.f32 %v2822_v31, %v2804_v14 }
 0x94d   : > { %v2842_v50 = vadd.f32 %v2841_v34, %v2823_v54 }
 0x94f   : > { %v2861_v17 = vadd.f32 %v2860_v40, %v2842_v50 }
 0x950   : > { %v2805_v55 = vpop.f32.mrf.mxu3 }
 0x951   : > { %v2870_v20 = vadd.f32 %v2861_v17, %v4615_v44  ;;  %v2806_v51 = vadd.f32 %v3804_v22, %v2805_v55  ;;  %v2862_v2 = vpop.f32.mrf.mxu2 }
 0x953   : > { %2874 = vst [vmem:[#allocation2] sm:$0xff] %v2870_v20  ;;  %v2825_v1 = vadd.f32 %v2824_v56, %v2806_v51 }
 0x955   : > { %v2844_v37 = vadd.f32 %v2843_v26, %v2825_v1 }
 0x957   : > { %v2863_v19 = vadd.f32 %v2862_v2, %v2844_v37 }
 0x959   : > { %v2871_v45 = vadd.f32 %v2863_v19, %v4618_v48  ;;  %v2882_v48 = vand.u32 7, %v4361_v7 }
 0x95b   : > { %2875 = vst [vmem:[#allocation2 + $0x8] sm:$0xff] %v2871_v45  ;;  %vm2884_vm11 = vcmp.lt.s32.totalorder %v2882_v48, 5 }
 0x966   : > { %v2827_v58 = vpop.f32.mrf.mxu0 }
 0x967   : > { %v2846_v62 = vpop.f32.mrf.mxu1 }
 0x96e   : > { %v2829_v3 = vpop.f32.mrf.mxu0 }
 0x96f   : > { %v2848_v41 = vpop.f32.mrf.mxu1 }
 0x972   : > { %v2808_v28 = vpop.f32.mrf.mxu3 }
 0x973   : > { %v2809_v63 = vadd.f32 %v3804_v22, %v2808_v28  ;;  %v2865_v4 = vpop.f32.mrf.mxu2 }
 0x975   : > { %v2828_v21 = vadd.f32 %v2827_v58, %v2809_v63 }
 0x977   : > { %v2847_v10 = vadd.f32 %v2846_v62, %v2828_v21 }
 0x979   : > { %v2866_v47 = vadd.f32 %v2865_v4, %v2847_v10 }
 0x97a   : > { %v2810_v44 = vpop.f32.mrf.mxu3 }
 0x97b   : > { %v2872_v32 = vadd.f32 %v2866_v47, %v4621_v38  ;;  %v2811_v59 = vadd.f32 %v3804_v22, %v2810_v44  ;;  %v2867_v23 = vpop.f32.mrf.mxu2  ;;  %v3624_v38 = vsel %vm2884_vm11, 1.0, %v3955_v30 }
 0x97d   : > { %2876 = vst [vmem:[#allocation2 + $0x10] sm:$0xff] %v2872_v32  ;;  %v2830_v53 = vadd.f32 %v2829_v3, %v2811_v59  ;;  %v2879_v25 = vsub.f32 %v2870_v20, %v2872_v32 }
 0x97f   : > { %v2849_v18 = vadd.f32 %v2848_v41, %v2830_v53  ;;  %v2889_v60 = vmul.f32 %v3623_v8, %v2879_v25 }
 0x981   : > { %v2868_v24 = vadd.f32 %v2867_v23, %v2849_v18  ;;  %v2891_v36 = vmul.f32 %v2889_v60, %v2889_v60 }
 0x983   : > { %v2873_v35 = vadd.f32 %v2868_v24, %v4624_v52 }
 0x985   : > { %2877 = vst [vmem:[#allocation2 + $0x18] sm:$0xff] %v2873_v35  ;;  %v2880_v61 = vsub.f32 %v2871_v45, %v2873_v35 }
 0x987   : > { %v2890_v29 = vmul.f32 %v3624_v38, %v2880_v61 }
 0x989   : > { %v2892_v39 = vmul.f32 %v2890_v29, %v2890_v29 }
 0x98b   : > { %v2893_v7 = vadd.f32 %v2892_v39, %v2891_v36 }
 0x98d   : > { %2894 = vadd.xlane.f32.xlu1 %v2893_v7 }
 0xa00   : > { %v2895_v0 = vpop.xlane.xlu1 %2894 }
 0xa01   : > { %v2896_v15 = vrot.slane %v2895_v0, 4 }
 0xa03   : > { %v2897_v57 = vadd.f32 %v2896_v15, %v2895_v0 }
 0xa05   : > { %v2898_v16 = vrot.slane %v2897_v57, 2 }
 0xa07   : > { %v2899_v42 = vadd.f32 %v2898_v16, %v2897_v57 }
 0xa09   : > { %v2900_v43 = vrot.slane %v2899_v42, 1 }
 0xa0b   : > { %v2901_v13 = vadd.f32 %v2900_v43, %v2899_v42 }
 0xa0d   : > { %3775 = vpush %v2901_v13 }
 0xa3e   : > { %s3776_s21 = spop %3775 }
 0xa3f   : > { %s2903_s24 = smul.f32 0.0015625, %s3776_s21 }
 0xa41   : > { %s2904_s13 = sadd.f32 %s2903_s24, %s2878_s27 }
 0xa43   : > { %2906 = sst [smem:[#allocation4]] %s2904_s13 }
 0xa44   : > { %3778 = sst [smem:[#allocation5]] (%p3783_p5), %s2904_s13 }
 0xa45   : > { %3780 = dma.smem_to_hbm (%p3783_p5), %s3956_s18, 16, %s2921_s17, [#allocation6]  }
 0xa46   : > { %3942 = dma.done.wait (%p3783_p5), [#allocation6], 16  }
 0xa47   : > { %3944 = vsyncadd (%p3783_p5), [#allocation6], 4294967280 }
 0xa48   : > { %2929 = sfence }
 0xa49 PF: > { %s4908_s20 = sld [smem:[#allocation8_spill]] }
 0xa4f   : > { %s24_s25 = sadd.s32 1, %s4908_s20  }
 0xa50   : > { %p21_p6 = scmp.ge.s32.totalorder %s24_s25, 4  }
 0xa52   :  { %23 = sbr.rel (!%p21_p6) target bundleno = 5 (0x5), region = 131 }
 0xa57   :  { %2935 = vsyncpa [#allocation6], 1 }
 0xa58   :  { %2937 = vsyncpa [#allocation6 + $0x1], 1 }

</bundles_post_ra>
